<compile_context>
chip_gen: v6e
topology: v6e:2x2x1
jax: 0.10.0
libtpu: 0.0.40
codegen_flags: <defaults>
</compile_context>

<pallas_src>
import functools

import jax
import jax.numpy as jnp
import numpy as np
from jax.experimental import pallas as pl
from jax.experimental.pallas import tpu as pltpu


def _vm_kernel(coords_ref,   # (3, TN)   f32  points-on-lanes
               g_ref,        # (MG, RT)  fused [plane | line] stationary matrix
               o_ref,        # (1, TN)   f32  lane-dense output
               *, rx, ry, rz, c, compute_dtype):
    f32 = jnp.float32
    tn = coords_ref.shape[1]
    h1, h2, h3 = ry, rz, rz                 # H axis of plane_yx / plane_zx / plane_zy
    mt = c * (h1 + h2 + h3)

    cr = coords_ref[...].astype(f32)        # (3, TN)
    # align_corners=True pixel coordinates per axis
    px = (cr[0:1, :] + 1.0) * (0.5 * (rx - 1))
    py = (cr[1:2, :] + 1.0) * (0.5 * (ry - 1))
    pz = (cr[2:3, :] + 1.0) * (0.5 * (rz - 1))

    # Bilinear "tent" weights per axis, built in f32 (p - idx needs f32 range).
    def tent(p, r):
        idx = jax.lax.broadcasted_iota(jnp.int32, (r, tn), 0).astype(f32)
        return jnp.maximum(0.0, 1.0 - jnp.abs(p - idx))

    wx = tent(px, rx)                       # (rx, TN) f32
    wy = tent(py, ry)                       # (ry, TN) f32
    wz = tent(pz, rz)                       # (rz, TN) f32

    # Single fused MXU matmul (bf16 x bf16 -> f32 accumulate on the MXU path):
    # plane coefficients contracted over their W axis + line interpolation.
    w_full = jnp.concatenate([wx, wy, wz], axis=0).astype(compute_dtype)   # (RT, TN)
    big = jnp.dot(g_ref[...], w_full, preferred_element_type=f32)          # (mt+3c, TN)

    t_all = big[:mt, :]                     # plane features, row = chan*h + h_idx
    ls = big[mt:, :]                        # (3c, TN) line features [z | y | x]

    # Per-channel multiply by the H-axis tent weight and sum over H.
    # (replaces the old rep_blk MXU block and the block-sum matmul: pure
    #  broadcast-multiply + sublane reductions on the XLU.)
    s1 = jnp.sum(t_all[:c * h1].reshape(c, h1, tn) * wy[None, :, :], axis=1)            # (c, TN)
    s2 = jnp.sum(t_all[c * h1:c * (h1 + h2)].reshape(c, h2, tn) * wz[None, :, :], axis=1)
    s3 = jnp.sum(t_all[c * (h1 + h2):].reshape(c, h3, tn) * wz[None, :, :], axis=1)

    # f1 + f2 + f3, lane-dense (1, TN) store.
    o_ref[...] = (jnp.sum(s1 * ls[0:c, :], axis=0, keepdims=True)
                  + jnp.sum(s2 * ls[c:2 * c, :], axis=0, keepdims=True)
                  + jnp.sum(s3 * ls[2 * c:, :], axis=0, keepdims=True))


def _build_static(params, resolution, c, dtype=jnp.bfloat16):
    """Host-side construction of the fused stationary matrix G = [plane | line]."""
    rx, ry, rz = resolution
    h1, h2, h3 = ry, rz, rz
    f32 = jnp.float32

    p1 = params["plane_yx"][0].reshape(c * h1, rx).astype(f32)   # contracts WX
    p2 = params["plane_zx"][0].reshape(c * h2, rx).astype(f32)   # contracts WX
    p3 = params["plane_zy"][0].reshape(c * h3, ry).astype(f32)   # contracts WY
    lz = params["line_z"][0, :, :, 0].astype(f32)                # (c, rz)
    ly = params["line_y"][0, :, :, 0].astype(f32)                # (c, ry)
    lx = params["line_x"][0, :, :, 0].astype(f32)                # (c, rx)

    z = lambda r, cc: jnp.zeros((r, cc), f32)

    # Plane block: each plane contracted against the tent weights of its W axis.
    plane_blk = jnp.concatenate([
        jnp.concatenate([p1, z(c * h1, ry), z(c * h1, rz)], axis=1),
        jnp.concatenate([p2, z(c * h2, ry), z(c * h2, rz)], axis=1),
        jnp.concatenate([z(c * h3, rx), p3, z(c * h3, rz)], axis=1),
    ], axis=0)                                                   # (mt, rt)

    # Line block: 1-D interpolation of the three line coefficient sets.
    line_blk = jnp.concatenate([
        jnp.concatenate([z(c, rx), z(c, ry), lz], axis=1),       # line_z vs WZ
        jnp.concatenate([z(c, rx), ly, z(c, rz)], axis=1),       # line_y vs WY
        jnp.concatenate([lx, z(c, ry), z(c, rz)], axis=1),       # line_x vs WX
    ], axis=0)                                                   # (3c, rt)

    return jnp.concatenate([plane_blk, line_blk], axis=0).astype(dtype)   # (mt+3c, rt)


def vm_decoding_forward(in_tensor, params, resolution, num_components,
                        tile_n=512, compute_dtype=jnp.bfloat16):
    rx, ry, rz = resolution
    c = num_components[0]
    assert num_components[0] == num_components[1] == num_components[2]
    assert tile_n % 128 == 0, "tile_n must be a multiple of 128 (lane width)"

    batch_shape = in_tensor.shape[:-1]
    coords = in_tensor.reshape(-1, 3).astype(jnp.float32)
    n = coords.shape[0]

    # Keep >= 2 grid steps when possible so both v7x TensorCores get work.
    tn = int(tile_n)
    if (n + tn - 1) // tn < 2:
        tn = max(128, (((n + 1) // 2) + 127) // 128 * 128)

    n_total = ((n + tn - 1) // tn) * tn
    if n_total != n:
        # Padded points are (0,0,0): in-range, finite garbage sliced off below.
        coords = jnp.concatenate(
            [coords, jnp.zeros((n_total - n, 3), jnp.float32)], axis=0)
    coords_t = coords.T                                          # (3, n_total)

    g = _build_static(params, resolution, c, dtype=compute_dtype)
    rt = rx + ry + rz
    mt = c * (ry + 2 * rz)
    mg = g.shape[0]                                              # mt + 3c

    kernel = functools.partial(_vm_kernel, rx=rx, ry=ry, rz=rz, c=c,
                               compute_dtype=compute_dtype)

    # --- cost + VMEM sizing -------------------------------------------------
    itemsize = jnp.dtype(compute_dtype).itemsize
    flops = int(n_total) * 2 * mg * rt + int(n_total) * (4 * rt + 3 * mt + 6 * c)
    bytes_accessed = 4 * n_total * 4 + g.size * itemsize
    est_vmem = (2 * g.size * itemsize                       # resident weights (dbl-buffered)
                + 2 * (3 * tn * 4 + tn * 4)                  # coord / out blocks
                + (rt * (4 + itemsize) + mg * 4 + 2 * mt * 4 + 8 * c * 4) * tn)
    vmem_limit = int(min(max(2 * est_vmem, 32 * 1024 * 1024), 56 * 1024 * 1024))

    out = pl.pallas_call(
        kernel,
        out_shape=jax.ShapeDtypeStruct((1, n_total), jnp.float32),
        grid=(n_total // tn,),
        in_specs=[
            pl.BlockSpec((3, tn), lambda i: (0, i)),         # points-on-lanes
            pl.BlockSpec(g.shape, lambda i: (0, 0)),         # resident fused params
        ],
        out_specs=pl.BlockSpec((1, tn), lambda i: (0, i)),   # lane-dense output
        compiler_params=pltpu.CompilerParams(
            dimension_semantics=("parallel",),
            vmem_limit_bytes=vmem_limit),
        cost_estimate=pl.CostEstimate(
            flops=int(flops), transcendentals=0,
            bytes_accessed=int(bytes_accessed)),
    )(coords_t, g)

    return out[0, :n].reshape(batch_shape)


def init_params(key, resolution, num_components, scale=0.1):
    rx, ry, rz = resolution
    c0, c1, c2 = num_components
    ks = jax.random.split(key, 6)
    return dict(
        plane_yx=scale * jax.random.normal(ks[0], (1, c0, ry, rx), jnp.float32),
        line_z=scale * jax.random.normal(ks[1], (1, c0, rz, 1), jnp.float32),
        plane_zx=scale * jax.random.normal(ks[2], (1, c1, rz, rx), jnp.float32),
        line_y=scale * jax.random.normal(ks[3], (1, c1, ry, 1), jnp.float32),
        plane_zy=scale * jax.random.normal(ks[4], (1, c2, rz, ry), jnp.float32),
        line_x=scale * jax.random.normal(ks[5], (1, c2, rx, 1), jnp.float32),
    )


# ---------------- pure-JAX reference (gather-based grid_sample) ----------------
def _ref_bilerp_plane(plane, gx, gy):
    # plane: (C, H, W); gx indexes W, gy indexes H; align_corners=True
    cch, h, w = plane.shape
    px = (gx + 1.0) * 0.5 * (w - 1)
    py = (gy + 1.0) * 0.5 * (h - 1)
    x0 = jnp.floor(px).astype(jnp.int32)
    y0 = jnp.floor(py).astype(jnp.int32)
    x0c = jnp.clip(x0, 0, w - 1); x1c = jnp.clip(x0 + 1, 0, w - 1)
    y0c = jnp.clip(y0, 0, h - 1); y1c = jnp.clip(y0 + 1, 0, h - 1)
    wx1 = px - x0; wx0 = 1.0 - wx1
    wy1 = py - y0; wy0 = 1.0 - wy1
    g = lambda yi, xi: plane[:, yi, xi]                 # (C, N)
    return (g(y0c, x0c) * (wy0 * wx0) + g(y0c, x1c) * (wy0 * wx1)
            + g(y1c, x0c) * (wy1 * wx0) + g(y1c, x1c) * (wy1 * wx1))


def _ref_lerp_line(line, g):
    # line: (C, H); align_corners=True 1-D interp
    cch, h = line.shape
    p = (g + 1.0) * 0.5 * (h - 1)
    i0 = jnp.floor(p).astype(jnp.int32)
    i0c = jnp.clip(i0, 0, h - 1); i1c = jnp.clip(i0 + 1, 0, h - 1)
    w1 = p - i0; w0 = 1.0 - w1
    return line[:, i0c] * w0 + line[:, i1c] * w1


def vm_decoding_reference(in_tensor, params):
    batch_shape = in_tensor.shape[:-1]
    pts = in_tensor.reshape(-1, 3)
    x, y, z = pts[:, 0], pts[:, 1], pts[:, 2]
    f1 = jnp.sum(_ref_bilerp_plane(params["plane_yx"][0], x, y)
                 * _ref_lerp_line(params["line_z"][0, :, :, 0], z), axis=0)
    f2 = jnp.sum(_ref_bilerp_plane(params["plane_zx"][0], x, z)
                 * _ref_lerp_line(params["line_y"][0, :, :, 0], y), axis=0)
    f3 = jnp.sum(_ref_bilerp_plane(params["plane_zy"][0], y, z)
                 * _ref_lerp_line(params["line_x"][0, :, :, 0], x), axis=0)
    return (f1 + f2 + f3).reshape(batch_shape)


if __name__ == "__main__":
    # Distinct per-axis resolutions to exercise the x/y/z plumbing.
    resolution = [16, 24, 32]
    num_components = [8, 8, 8]

    key = jax.random.PRNGKey(0)
    kp, kx = jax.random.split(key)
    params = init_params(kp, resolution, num_components)

    # in_tensor: (bs..., 3) positions in [-1, 1]; n=1200 -> padded to 1536 -> 3 tiles.
    in_tensor = jax.random.uniform(kx, (4, 300, 3), jnp.float32,
                                   minval=-1.0, maxval=1.0)

    ref = vm_decoding_reference(in_tensor, params)

    # Exact-semantics check on the f32 MXU path.
    out_f32 = vm_decoding_forward(in_tensor, params, resolution, num_components,
                                  tile_n=512, compute_dtype=jnp.float32)
    out_f32 = jax.block_until_ready(out_f32)
    np.testing.assert_allclose(np.asarray(out_f32), np.asarray(ref),
                               rtol=1e-4, atol=1e-5)

    # Production bf16 MXU path (both dot operands bf16, f32 accumulate):
    # re-validated with a tolerance appropriate for bf16 operand rounding.
    out_bf16 = vm_decoding_forward(in_tensor, params, resolution, num_components,
                                   tile_n=512, compute_dtype=jnp.bfloat16)
    out_bf16 = jax.block_until_ready(out_bf16)
    np.testing.assert_allclose(np.asarray(out_bf16), np.asarray(ref),
                               rtol=2e-2, atol=5e-3)

    assert out_f32.shape == in_tensor.shape[:-1]
    assert out_bf16.shape == in_tensor.shape[:-1]
    print("KERNEL_OK")
</pallas_src>

<mosaic_0001>
module attributes {stable_mosaic.version = 11 : i64} {
  func.func @_vm_kernel(%arg0: i32, %arg1: memref<3x512xf32, #tpu.memory_space<vmem>>, %arg2: memref<728x72xf32, #tpu.memory_space<vmem>>, %arg3: memref<1x512xf32, #tpu.memory_space<vmem>>) attributes {dimension_semantics = [#tpu.dimension_semantics<parallel>], iteration_bounds = array<i64: 3>, scalar_prefetch = 0 : i64, scratch_operands = 0 : i64, tpu.core_type = #tpu.core_type<tc>, window_params = [{transform_indices = @transform_0, window_bounds = array<i64: 3, 512>}, {pipeline_mode = #tpu.pipeline_mode<synchronous>, transform_indices = @transform_1, window_bounds = array<i64: 728, 72>}, {transform_indices = @transform_2, window_bounds = array<i64: 1, 512>}]} {
    %c0 = arith.constant 0 : index
    %c0_0 = arith.constant 0 : index
    %0 = vector.load %arg1[%c0, %c0_0] : memref<3x512xf32, #tpu.memory_space<vmem>>, vector<3x512xf32>
    %1 = vector.extract_strided_slice %0 {offsets = [0, 0], sizes = [1, 512], strides = [1, 1]} : vector<3x512xf32> to vector<1x512xf32>
    %cst = arith.constant 1.000000e+00 : f32
    %2 = vector.broadcast %cst : f32 to vector<1x512xf32>
    %3 = arith.addf %1, %2 : vector<1x512xf32>
    %cst_1 = arith.constant 7.500000e+00 : f32
    %4 = vector.broadcast %cst_1 : f32 to vector<1x512xf32>
    %5 = arith.mulf %3, %4 : vector<1x512xf32>
    %6 = vector.extract_strided_slice %0 {offsets = [1, 0], sizes = [1, 512], strides = [1, 1]} : vector<3x512xf32> to vector<1x512xf32>
    %cst_2 = arith.constant 1.000000e+00 : f32
    %7 = vector.broadcast %cst_2 : f32 to vector<1x512xf32>
    %8 = arith.addf %6, %7 : vector<1x512xf32>
    %cst_3 = arith.constant 1.150000e+01 : f32
    %9 = vector.broadcast %cst_3 : f32 to vector<1x512xf32>
    %10 = arith.mulf %8, %9 : vector<1x512xf32>
    %11 = vector.extract_strided_slice %0 {offsets = [2, 0], sizes = [1, 512], strides = [1, 1]} : vector<3x512xf32> to vector<1x512xf32>
    %cst_4 = arith.constant 1.000000e+00 : f32
    %12 = vector.broadcast %cst_4 : f32 to vector<1x512xf32>
    %13 = arith.addf %11, %12 : vector<1x512xf32>
    %cst_5 = arith.constant 1.550000e+01 : f32
    %14 = vector.broadcast %cst_5 : f32 to vector<1x512xf32>
    %15 = arith.mulf %13, %14 : vector<1x512xf32>
    %16 = tpu.iota {dimensions = array<i32: 0>} : vector<16x512xi32>
    %17 = arith.sitofp %16 : vector<16x512xi32> to vector<16x512xf32>
    %18 = vector.broadcast %5 : vector<1x512xf32> to vector<16x512xf32>
    %19 = arith.subf %18, %17 : vector<16x512xf32>
    %20 = math.absf %19 : vector<16x512xf32>
    %cst_6 = arith.constant 1.000000e+00 : f32
    %21 = vector.broadcast %cst_6 : f32 to vector<16x512xf32>
    %22 = arith.subf %21, %20 : vector<16x512xf32>
    %cst_7 = arith.constant 0.000000e+00 : f32
    %23 = vector.broadcast %cst_7 : f32 to vector<16x512xf32>
    %24 = arith.maximumf %23, %22 : vector<16x512xf32>
    %25 = tpu.iota {dimensions = array<i32: 0>} : vector<24x512xi32>
    %26 = arith.sitofp %25 : vector<24x512xi32> to vector<24x512xf32>
    %27 = vector.broadcast %10 : vector<1x512xf32> to vector<24x512xf32>
    %28 = arith.subf %27, %26 : vector<24x512xf32>
    %29 = math.absf %28 : vector<24x512xf32>
    %cst_8 = arith.constant 1.000000e+00 : f32
    %30 = vector.broadcast %cst_8 : f32 to vector<24x512xf32>
    %31 = arith.subf %30, %29 : vector<24x512xf32>
    %cst_9 = arith.constant 0.000000e+00 : f32
    %32 = vector.broadcast %cst_9 : f32 to vector<24x512xf32>
    %33 = arith.maximumf %32, %31 : vector<24x512xf32>
    %34 = tpu.iota {dimensions = array<i32: 0>} : vector<32x512xi32>
    %35 = arith.sitofp %34 : vector<32x512xi32> to vector<32x512xf32>
    %36 = vector.broadcast %15 : vector<1x512xf32> to vector<32x512xf32>
    %37 = arith.subf %36, %35 : vector<32x512xf32>
    %38 = math.absf %37 : vector<32x512xf32>
    %cst_10 = arith.constant 1.000000e+00 : f32
    %39 = vector.broadcast %cst_10 : f32 to vector<32x512xf32>
    %40 = arith.subf %39, %38 : vector<32x512xf32>
    %cst_11 = arith.constant 0.000000e+00 : f32
    %41 = vector.broadcast %cst_11 : f32 to vector<32x512xf32>
    %42 = arith.maximumf %41, %40 : vector<32x512xf32>
    %43 = tpu.concatenate %24, %33, %42 in 0 : vector<16x512xf32>, vector<24x512xf32>, vector<32x512xf32> -> vector<72x512xf32>
    %c0_12 = arith.constant 0 : index
    %c0_13 = arith.constant 0 : index
    %44 = vector.load %arg2[%c0_12, %c0_13] : memref<728x72xf32, #tpu.memory_space<vmem>>, vector<728x72xf32>
    %cst_14 = arith.constant dense<0.000000e+00> : vector<728x512xf32>
    %45 = tpu.matmul %44, %43, %cst_14 {dimension_numbers = #tpu.dot_dimension_numbers<[1], [0], [0], [1], [0, 0, 1, 1], [], []>} : vector<728x72xf32>, vector<72x512xf32>, vector<728x512xf32> -> vector<728x512xf32>
    %46 = vector.extract_strided_slice %45 {offsets = [0, 0], sizes = [704, 512], strides = [1, 1]} : vector<728x512xf32> to vector<704x512xf32>
    %47 = vector.extract_strided_slice %45 {offsets = [704, 0], sizes = [24, 512], strides = [1, 1]} : vector<728x512xf32> to vector<24x512xf32>
    %48 = vector.extract_strided_slice %46 {offsets = [0, 0], sizes = [192, 512], strides = [1, 1]} : vector<704x512xf32> to vector<192x512xf32>
    %49 = vector.shape_cast %48 : vector<192x512xf32> to vector<8x24x512xf32>
    %50 = vector.shape_cast %33 : vector<24x512xf32> to vector<1x24x512xf32>
    %51 = vector.broadcast %50 : vector<1x24x512xf32> to vector<8x24x512xf32>
    %52 = arith.mulf %49, %51 : vector<8x24x512xf32>
    %cst_15 = arith.constant dense<0.000000e+00> : vector<8x512xf32>
    %53 = vector.multi_reduction <add>, %52, %cst_15 [1] : vector<8x24x512xf32> to vector<8x512xf32>
    %54 = vector.extract_strided_slice %46 {offsets = [192, 0], sizes = [256, 512], strides = [1, 1]} : vector<704x512xf32> to vector<256x512xf32>
    %55 = vector.shape_cast %54 : vector<256x512xf32> to vector<8x32x512xf32>
    %56 = vector.shape_cast %42 : vector<32x512xf32> to vector<1x32x512xf32>
    %57 = vector.broadcast %56 : vector<1x32x512xf32> to vector<8x32x512xf32>
    %58 = arith.mulf %55, %57 : vector<8x32x512xf32>
    %cst_16 = arith.constant dense<0.000000e+00> : vector<8x512xf32>
    %59 = vector.multi_reduction <add>, %58, %cst_16 [1] : vector<8x32x512xf32> to vector<8x512xf32>
    %60 = vector.extract_strided_slice %46 {offsets = [448, 0], sizes = [256, 512], strides = [1, 1]} : vector<704x512xf32> to vector<256x512xf32>
    %61 = vector.shape_cast %60 : vector<256x512xf32> to vector<8x32x512xf32>
    %62 = vector.shape_cast %42 : vector<32x512xf32> to vector<1x32x512xf32>
    %63 = vector.broadcast %62 : vector<1x32x512xf32> to vector<8x32x512xf32>
    %64 = arith.mulf %61, %63 : vector<8x32x512xf32>
    %cst_17 = arith.constant dense<0.000000e+00> : vector<8x512xf32>
    %65 = vector.multi_reduction <add>, %64, %cst_17 [1] : vector<8x32x512xf32> to vector<8x512xf32>
    %66 = vector.extract_strided_slice %47 {offsets = [0, 0], sizes = [8, 512], strides = [1, 1]} : vector<24x512xf32> to vector<8x512xf32>
    %67 = arith.mulf %53, %66 : vector<8x512xf32>
    %cst_18 = arith.constant dense<0.000000e+00> : vector<512xf32>
    %68 = vector.multi_reduction <add>, %67, %cst_18 [0] : vector<8x512xf32> to vector<512xf32>
    %69 = vector.shape_cast %68 : vector<512xf32> to vector<1x512xf32>
    %70 = vector.extract_strided_slice %47 {offsets = [8, 0], sizes = [8, 512], strides = [1, 1]} : vector<24x512xf32> to vector<8x512xf32>
    %71 = arith.mulf %59, %70 : vector<8x512xf32>
    %cst_19 = arith.constant dense<0.000000e+00> : vector<512xf32>
    %72 = vector.multi_reduction <add>, %71, %cst_19 [0] : vector<8x512xf32> to vector<512xf32>
    %73 = vector.shape_cast %72 : vector<512xf32> to vector<1x512xf32>
    %74 = arith.addf %69, %73 : vector<1x512xf32>
    %75 = vector.extract_strided_slice %47 {offsets = [16, 0], sizes = [8, 512], strides = [1, 1]} : vector<24x512xf32> to vector<8x512xf32>
    %76 = arith.mulf %65, %75 : vector<8x512xf32>
    %cst_20 = arith.constant dense<0.000000e+00> : vector<512xf32>
    %77 = vector.multi_reduction <add>, %76, %cst_20 [0] : vector<8x512xf32> to vector<512xf32>
    %78 = vector.shape_cast %77 : vector<512xf32> to vector<1x512xf32>
    %79 = arith.addf %74, %78 : vector<1x512xf32>
    %c0_21 = arith.constant 0 : index
    %c0_22 = arith.constant 0 : index
    %80 = vector.load %arg3[%c0_21, %c0_22] : memref<1x512xf32, #tpu.memory_space<vmem>>, vector<1x512xf32>
    tpu.vector_store %arg3[%c0_21, %c0_22], %79 {strides = array<i32>} : memref<1x512xf32, #tpu.memory_space<vmem>>, vector<1x512xf32>,
    return
  }
  func.func @transform_0(%arg0: i32) -> (i32, i32) {
    %c0_i32 = arith.constant 0 : i32
    %c0_i32_0 = arith.constant 0 : i32
    return %c0_i32, %arg0 : i32, i32
  }
  func.func @transform_1(%arg0: i32) -> (i32, i32) {
    %c0_i32 = arith.constant 0 : i32
    %c0_i32_0 = arith.constant 0 : i32
    %c0_i32_1 = arith.constant 0 : i32
    return %c0_i32, %c0_i32_0 : i32, i32
  }
  func.func @transform_2(%arg0: i32) -> (i32, i32) {
    %c0_i32 = arith.constant 0 : i32
    %c0_i32_0 = arith.constant 0 : i32
    return %c0_i32, %arg0 : i32, i32
  }
}

</mosaic_0001>

<bundles_post_ra>
// kernel: tpu_custom_call.1
= control target key start
LH: loop header
LB: loop body
LE: loop exit
PB: predicated region body
PF: predicated region fallthrough
CT: control target
= control target key end

     0   :  { %7 = vsyncpa [#allocation3], 0  ;;  %s6600_s0 = inlined_call_operand.vmem [shape: f32[3,1536], index: 0, kind: input, shape index: {}]   ;;  %s6601_s1 = inlined_call_operand.vmem [shape: f32[728,72], index: 1, kind: input, shape index: {}]   ;;  %s6602_s2 = inlined_call_operand.hbm [shape: f32[1,1536], index: 2, kind: output, shape index: {}]  }
   0x1   :  { %9 = vsyncpa [#allocation3 + $0x1], 0  ;;  %s4268_s9 = smov 0   ;;  %s4270_s10 = smov 0  }
   0x2   :  { %s4272_s11 = smov 0   ;;  %s4274_s12 = smov 0  }
   0x3 LB: > { %s4289_s13 = sadd.s32 4294967295, %s4248_s12   ;;  %s3952_s14 = sadd.s32 4294967294, %s4248_s12   ;;  %s4248_s12 = sphi %s4274_s12, %s6868_s12   ;;  %s4244_s11 = sphi %s4272_s11, %s6867_s11   ;;  %s4240_s10 = sphi %s4270_s10, %s6866_s10   ;;  %s4236_s9 = sphi %s4268_s9, %s6865_s9  }
   0x4   : > { %s4293_s15 = sadd.s32 1, %s4248_s12   ;;  %s69_s16 = sadd.s32 1, %s4244_s11 }
   0x5   : > { %s66_s17 = ssub.s32 %s4248_s12, %s4293_s15  ;;  %p79_p0 = scmp.ne.s32.totalorder %s4244_s11, %s4240_s10 }
   0x6   : > { %p67_p1 = scmp.eq.s32.totalorder %s66_s17, 0  ;;  %p80_p2 = scmp.eq.s32.totalorder %s4289_s13, 2 }
   0x7   : > { %p85_p3 = scmp.ne.s32.totalorder %s4240_s10, %s4236_s9  ;;  %p86_p4 = scmp.eq.s32.totalorder %s3952_s14, 2 }
   0x8   : > { %s4304_s18 = scalar_select %p67_p1, %s4244_s11, %s69_s16  }
   0x9   : > { %p4306_p5 = por %p80_p2, %p79_p0  ;;  %p4310_p6 = por %p86_p4, %p85_p3 }
   0xa   : > { %p3955_p7 = scmp.ge.s32.totalorder %s4248_s12, 1  ;;  %p116_p8 = scmp.lt.s32.totalorder %s4248_s12, 4 }
   0xc   : > { %p117_p9 = pnand %p3955_p7, %p116_p8 }
   0xe   : > { %120 = sbr.rel (%p117_p9) target bundleno = 761 (0x2f9), region = 28 }
  0x13   : > { %s3957_s21 = sshll.u32 %s4289_s13, 2  ;;  %v6603_v0 = vlaneseq  ;;  %v6615_v1 = vmov 0.0   ;;  %vm513_vm0 = vcmask 588800   ;;  %vm3322_vm1 = vcmask 1041409   ;;  %s135_s14 = sand.u32 1, %s4240_s10  }
  0x14   : > { %p139_p10 = scmp.lt.s32.totalorder %s3957_s21, 11  ;;  %851 = vmatprep.mubr.f32.mxu0 %v6615_v1  ;;  %1462 = vmatprep.mubr.f32.mxu1 %v6615_v1  ;;  %vm3325_vm2 = vcmask 1042434   ;;  %vm3328_vm3 = vcmask 1043459   ;;  %vm3331_vm4 = vcmask 1044484   ;;  %vm3334_vm5 = vcmask 1045509   ;;  %s3956_s16 = sshll.u32 %s135_s14, 2 }
  0x15   : > { %v4320_v2 = vshrl.u32 %v6603_v0, 7  ;;  %vm3337_vm6 = vcmask 1046534   ;;  %vm3340_vm7 = vcmask 1047559   ;;  %s4146_s17 = sshll.u32 %s4289_s13, 6  ;;  %s3879_s26 = scalar_lea.sflag [#allocation3], %s135_s14 }
  0x16   : > { %s6870_s21 = smov (!%p139_p10, %s3957_s21), 11  ;;  %s4252_s28 = smov [#allocation2]  }
  0x17   : > { %6633 = vst [vmem:[#allocation5_spill] sm:$0xff] %v4320_v2  ;;  %s3958_s22 = sshll.u32 %s6870_s21, 2  ;;  %v318_v3 = vadd.s32 24, %v4320_v2  ;;  %v230_v4 = vadd.s32 16, %v4320_v2  ;;  %v324_v5 = vsub.s32 2, %v4320_v2  ;;  %v328_v7 = vsub.s32 6, %v4320_v2 }
  0x18   : > { %s142_s25 = scalar_lea.vmem %s6600_s0, %s3958_s22  ;;  %v157_v9 = vadd.s32 8, %v4320_v2  ;;  %v4331_v12 = vcvt.s32.f32 %v4320_v2  ;;  %v236_v13 = vsub.s32 1, %v4320_v2  ;;  %v240_v16 = vsub.s32 5, %v4320_v2  ;;  %s137_s21 = scalar_lea.vmem [#allocation2], %s3956_s16 }
  0x19   : > { %v145_v6 = vld [vmem:[%s142_s25] sm:$0x77]  ;;  %v146_v8 = vld [vmem:[%s142_s25 + $0x8] sm:$0x77]  ;;  %v319_v14 = vcvt.s32.f32 %v318_v3  ;;  %v4334_v15 = vcvt.s32.f32 %v230_v4  ;;  %v4338_v17 = vsub.s32 0, %v4320_v2  ;;  %v168_v24 = vsub.s32 4, %v4320_v2  ;;  %s3891_s25 = scalar_lea.hbm %s6602_s2, %s4146_s17 }
  0x1a   : > { %v147_v10 = vadd.f32 1.0, %v145_v6  ;;  %v148_v11 = vadd.f32 1.0, %v146_v8  ;;  %v4340_v22 = vcvt.s32.f32 %v157_v9  ;;  %s3893_s22 = sshll.u32 %s137_s21, 4  ;;  %s4192_s13 = sshll.u32 %s4252_s28, 4  ;;  %s3894_s22 = int_to_ptr.vmem [resolvable:$true] %s3893_s22  ;;  %s4193_s13 = int_to_ptr.vmem [resolvable:$false] %s4192_s13 }
  0x1b   : > { %s4188_s27 = scalar_lea.vmem %s3894_s22, 64  ;;  %s4194_s29 = scalar_lea.vmem %s4193_s13, 128 }
  0x1c   : > { %v153_v18 = vmul.f32 15.5, %v147_v10  ;;  %v154_v19 = vmul.f32 15.5, %v148_v11  ;;  %v151_v20 = vmul.f32 11.5, %v147_v10  ;;  %v152_v21 = vmul.f32 11.5, %v148_v11  ;;  %p4189_p11 = scmp.ne.s32.totalorder %s3894_s22, %s4188_s27  ;;  %p4195_p0 = scmp.lt.s32.totalorder %s3894_s22, %s4193_s13 }
  0x1d   : > { %v4342_v23 = vmul.f32 7.5, %v147_v10  ;;  %v4345_v25 = vmul.f32 7.5, %v148_v11  ;;  %p4196_p1 = scmp.lt.s32.totalorder %s4194_s29, %s4188_s27 }
  0x1e   : > { %v329_v26 = vrot.slane %v153_v18, %v328_v7  ;;  %v337_v27 = vrot.slane %v154_v19, %v328_v7  ;;  %v325_v28 = vrot.slane %v153_v18, %v324_v5  ;;  %v333_v29 = vrot.slane %v154_v19, %v324_v5  ;;  %p4190_p12 = pnand %p4189_p11, %p4306_p5 }
  0x1f   : > { %v241_v30 = vrot.slane %v151_v20, %v240_v16  ;;  %v249_v31 = vrot.slane %v152_v21, %v240_v16  ;;  %v237_v32 = vrot.slane %v151_v20, %v236_v13  ;;  %v245_v33 = vrot.slane %v152_v21, %v236_v13  ;;  %p4197_p2 = por %p4196_p1, %p4195_p0 }
  0x20   : > { %v349_v34 = vrot.slane %v329_v26, %v324_v5  ;;  %v357_v35 = vrot.slane %v337_v27, %v324_v5  ;;  %v4347_v36 = vrot.slane %v325_v28, %v324_v5  ;;  %v4349_v37 = vrot.slane %v333_v29, %v324_v5  ;;  %p4191_p13 = pneg %p4190_p12 }
  0x21   : > { %v4351_v38 = vrot.slane %v241_v30, %v236_v13  ;;  %v4353_v39 = vrot.slane %v249_v31, %v236_v13  ;;  %v4355_v40 = vrot.slane %v237_v32, %v236_v13  ;;  %v4357_v41 = vrot.slane %v245_v33, %v236_v13 }
  0x22   : > { %v371_v42 = vsub.f32 %v349_v34, %v319_v14  ;;  %v373_v43 = vsub.f32 %v357_v35, %v319_v14  ;;  %v370_v44 = vsub.f32 %v4347_v36, %v319_v14  ;;  %v372_v45 = vsub.f32 %v4349_v37, %v319_v14  ;;  %p4198_p3 = pnand %p4197_p2, %p4191_p13 }
  0x23   : > { %v367_v46 = vsub.f32 %v349_v34, %v4334_v15  ;;  %v369_v47 = vsub.f32 %v357_v35, %v4334_v15  ;;  %v366_v48 = vsub.f32 %v4347_v36, %v4334_v15  ;;  %v368_v49 = vsub.f32 %v4349_v37, %v4334_v15 }
  0x24   : > { %v387_v50 = vand.u32 2147483647, %v371_v42  ;;  %v389_v51 = vand.u32 2147483647, %v373_v43  ;;  %v386_v52 = vand.u32 2147483647, %v370_v44  ;;  %v363_v53 = vsub.f32 %v349_v34, %v4340_v22 }
  0x25   : > { %v388_v54 = vand.u32 2147483647, %v372_v45  ;;  %v383_v55 = vand.u32 2147483647, %v367_v46  ;;  %v385_v56 = vand.u32 2147483647, %v369_v47  ;;  %v365_v57 = vsub.f32 %v357_v35, %v4340_v22 }
  0x26   : > { %v403_v58 = vsub.f32 1.0, %v387_v50  ;;  %v405_v59 = vsub.f32 1.0, %v389_v51  ;;  %v402_v60 = vsub.f32 1.0, %v386_v52  ;;  %v382_v61 = vand.u32 2147483647, %v366_v48 }
  0x27   : > { %v404_v62 = vsub.f32 1.0, %v388_v54  ;;  %v399_v63 = vsub.f32 1.0, %v383_v55  ;;  %v401_v3 = vsub.f32 1.0, %v385_v56  ;;  %v384_v4 = vand.u32 2147483647, %v368_v49 }
  0x28   : > { %v4369_v5 = vmax.f32 %v403_v58, 0.0  ;;  %v4371_v6 = vmax.f32 %v405_v59, 0.0  ;;  %v4373_v7 = vmax.f32 %v402_v60, 0.0  ;;  %v398_v8 = vsub.f32 1.0, %v382_v61 }
  0x29   : > { %v4375_v9 = vmax.f32 %v404_v62, 0.0  ;;  %v4377_v10 = vmax.f32 %v399_v63, 0.0  ;;  %v4379_v11 = vmax.f32 %v401_v3, 0.0  ;;  %v400_v13 = vsub.f32 1.0, %v384_v4 }
  0x2a   : > { %801 = vmatprep.subr.mxu0 %v4369_v5  ;;  %1412 = vmatprep.subr.mxu1 %v4371_v6  ;;  %v4383_v14 = vmax.f32 %v398_v8, 0.0  ;;  %v379_v16 = vand.u32 2147483647, %v363_v53  ;;  %v381_v18 = vand.u32 2147483647, %v365_v57  ;;  %v362_v19 = vsub.f32 %v4347_v36, %v4340_v22 }
  0x2b   : > { %802 = vmatpush1.msra.mxu0 %v4373_v7  ;;  %1413 = vmatpush1.msra.mxu1 %v4375_v9  ;;  %v4389_v20 = vmax.f32 %v400_v13, 0.0  ;;  %v364_v21 = vsub.f32 %v4349_v37, %v4340_v22  ;;  %v359_v26 = vsub.f32 %v349_v34, %v4331_v12  ;;  %v361_v27 = vsub.f32 %v357_v35, %v4331_v12 }
  0x2c   : > { %803 = vmatprep.subr.mxu0 %v4377_v10  ;;  %1414 = vmatprep.subr.mxu1 %v4379_v11  ;;  %v395_v28 = vsub.f32 1.0, %v379_v16  ;;  %v397_v29 = vsub.f32 1.0, %v381_v18  ;;  %v378_v30 = vand.u32 2147483647, %v362_v19  ;;  %v358_v31 = vsub.f32 %v4347_v36, %v4331_v12 }
  0x2d   : > { %804 = vmatpush1.msra.mxu0 %v4383_v14  ;;  %1415 = vmatpush1.msra.mxu1 %v4389_v20  ;;  %v380_v32 = vand.u32 2147483647, %v364_v21  ;;  %v375_v33 = vand.u32 2147483647, %v359_v26  ;;  %v377_v42 = vand.u32 2147483647, %v361_v27  ;;  %v360_v34 = vsub.f32 %v4349_v37, %v4331_v12 }
  0x2e   : > { %v4403_v35 = vmax.f32 %v395_v28, 0.0  ;;  %v4405_v43 = vmax.f32 %v397_v29, 0.0  ;;  %v394_v44 = vsub.f32 1.0, %v378_v30  ;;  %v374_v45 = vand.u32 2147483647, %v358_v31 }
  0x2f   : > { %v396_v46 = vsub.f32 1.0, %v380_v32  ;;  %v391_v47 = vsub.f32 1.0, %v375_v33  ;;  %v393_v48 = vsub.f32 1.0, %v377_v42  ;;  %v376_v36 = vand.u32 2147483647, %v360_v34 }
  0x30   : > { %805 = vmatprep.subr.mxu0 %v4403_v35  ;;  %1416 = vmatprep.subr.mxu1 %v4405_v43  ;;  %v4409_v49 = vmax.f32 %v394_v44, 0.0  ;;  %v390_v50 = vsub.f32 1.0, %v374_v45  ;;  %v279_v37 = vsub.f32 %v4351_v38, %v4334_v15  ;;  %v281_v51 = vsub.f32 %v4353_v39, %v4334_v15 }
  0x31   : > { %v4415_v52 = vmax.f32 %v396_v46, 0.0  ;;  %v4417_v53 = vmax.f32 %v391_v47, 0.0  ;;  %v4419_v54 = vmax.f32 %v393_v48, 0.0  ;;  %v392_v55 = vsub.f32 1.0, %v376_v36 }
  0x32   : > { %806 = vmatpush1.msra.mxu0 %v4409_v49  ;;  %v4422_v56 = vmax.f32 %v390_v50, 0.0  ;;  %v291_v57 = vand.u32 2147483647, %v279_v37  ;;  %v293_v58 = vand.u32 2147483647, %v281_v51  ;;  %v278_v59 = vsub.f32 %v4355_v40, %v4334_v15 }
  0x33   : > { %1417 = vmatpush1.msra.mxu1 %v4415_v52  ;;  %807 = vmatprep.subr.mxu0 %v4417_v53  ;;  %v4428_v60 = vmax.f32 %v392_v55, 0.0  ;;  %v280_v61 = vsub.f32 %v4357_v41, %v4334_v15  ;;  %v275_v62 = vsub.f32 %v4351_v38, %v4340_v22  ;;  %v277_v63 = vsub.f32 %v4353_v39, %v4340_v22 }
  0x34   : > { %1418 = vmatprep.subr.mxu1 %v4419_v54  ;;  %808 = vmatpush1.msra.mxu0 %v4422_v56  ;;  %v303_v3 = vsub.f32 1.0, %v291_v57  ;;  %v305_v4 = vsub.f32 1.0, %v293_v58  ;;  %v290_v8 = vand.u32 2147483647, %v278_v59  ;;  %v274_v13 = vsub.f32 %v4355_v40, %v4340_v22 }
  0x35   : > { %1419 = vmatpush1.msra.mxu1 %v4428_v60  ;;  %v292_v16 = vand.u32 2147483647, %v280_v61  ;;  %v287_v15 = vand.u32 2147483647, %v275_v62  ;;  %v289_v18 = vand.u32 2147483647, %v277_v63  ;;  %v276_v19 = vsub.f32 %v4357_v41, %v4340_v22 }
  0x36   : > { %v4443_v21 = vmax.f32 %v303_v3, 0.0  ;;  %v4445_v26 = vmax.f32 %v305_v4, 0.0  ;;  %v302_v27 = vsub.f32 1.0, %v290_v8  ;;  %v286_v28 = vand.u32 2147483647, %v274_v13 }
  0x37   : > { %v304_v29 = vsub.f32 1.0, %v292_v16  ;;  %v299_v30 = vsub.f32 1.0, %v287_v15  ;;  %v301_v31 = vsub.f32 1.0, %v289_v18  ;;  %v288_v32 = vand.u32 2147483647, %v276_v19 }
  0x38   : > { %809 = vmatprep.subr.mxu0 %v4443_v21  ;;  %1420 = vmatprep.subr.mxu1 %v4445_v26  ;;  %v4449_v33 = vmax.f32 %v302_v27, 0.0  ;;  %v298_v42 = vsub.f32 1.0, %v286_v28  ;;  %v271_v34 = vsub.f32 %v4351_v38, %v4331_v12  ;;  %v273_v44 = vsub.f32 %v4353_v39, %v4331_v12 }
  0x39   : > { %v4455_v45 = vmax.f32 %v304_v29, 0.0  ;;  %v4457_v46 = vmax.f32 %v299_v30, 0.0  ;;  %v4459_v47 = vmax.f32 %v301_v31, 0.0  ;;  %v300_v48 = vsub.f32 1.0, %v288_v32 }
  0x3a   : > { %810 = vmatpush1.msra.mxu0 %v4449_v33  ;;  %v4462_v36 = vmax.f32 %v298_v42, 0.0  ;;  %v283_v50 = vand.u32 2147483647, %v271_v34  ;;  %v285_v37 = vand.u32 2147483647, %v273_v44  ;;  %v270_v51 = vsub.f32 %v4355_v40, %v4331_v12 }
  0x3b   : > { %1421 = vmatpush1.msra.mxu1 %v4455_v45  ;;  %811 = vmatprep.subr.mxu0 %v4457_v46  ;;  %v4468_v38 = vmax.f32 %v300_v48, 0.0  ;;  %v272_v39 = vsub.f32 %v4357_v41, %v4331_v12  ;;  %v169_v55 = vrot.slane %v4342_v23, %v168_v24  ;;  %v177_v57 = vrot.slane %v4345_v25, %v168_v24 }
  0x3c   : > { %1422 = vmatprep.subr.mxu1 %v4459_v47  ;;  %812 = vmatpush1.msra.mxu0 %v4462_v36  ;;  %v295_v40 = vsub.f32 1.0, %v283_v50  ;;  %v297_v58 = vsub.f32 1.0, %v285_v37  ;;  %v282_v59 = vand.u32 2147483647, %v270_v51  ;;  %v165_v61 = vrot.slane %v4342_v23, %v4338_v17 }
  0x3d   : > { %1423 = vmatpush1.msra.mxu1 %v4468_v38  ;;  %v284_v41 = vand.u32 2147483647, %v272_v39  ;;  %v189_v62 = vrot.slane %v169_v55, %v4338_v17  ;;  %v197_v63 = vrot.slane %v177_v57, %v4338_v17  ;;  %v173_v24 = vrot.slane %v4345_v25, %v4338_v17 }
  0x3e   : > { %v4487_v3 = vmax.f32 %v295_v40, 0.0  ;;  %v4489_v4 = vmax.f32 %v297_v58, 0.0  ;;  %v294_v8 = vsub.f32 1.0, %v282_v59  ;;  %v185_v13 = vrot.slane %v165_v61, %v4338_v17 }
  0x3f   : > { %v296_v16 = vsub.f32 1.0, %v284_v41  ;;  %v203_v23 = vsub.f32 %v189_v62, %v4340_v22  ;;  %v205_v15 = vsub.f32 %v197_v63, %v4340_v22  ;;  %v193_v18 = vrot.slane %v173_v24, %v4338_v17 }
  0x40   : > { %813 = vmatprep.subr.mxu0 %v4487_v3  ;;  %1424 = vmatprep.subr.mxu1 %v4489_v4  ;;  %v4497_v19 = vmax.f32 %v294_v8, 0.0  ;;  %v202_v25 = vsub.f32 %v185_v13, %v4340_v22  ;;  %v199_v27 = vsub.f32 %v189_v62, %v4331_v12  ;;  %v201_v28 = vsub.f32 %v197_v63, %v4331_v12 }
  0x41   : > { %v4502_v29 = vmax.f32 %v296_v16, 0.0  ;;  %v211_v30 = vand.u32 2147483647, %v203_v23  ;;  %v213_v31 = vand.u32 2147483647, %v205_v15  ;;  %v204_v32 = vsub.f32 %v193_v18, %v4340_v22  ;;  %v423_v15 = vld [vmem:[%s6601_s1 + $0x8] sm:$0xff] }
  0x42   : > { %814 = vmatpush1.msra.mxu0 %v4497_v19  ;;  %v210_v17 = vand.u32 2147483647, %v202_v25  ;;  %v207_v42 = vand.u32 2147483647, %v199_v27  ;;  %v209_v34 = vand.u32 2147483647, %v201_v28  ;;  %v198_v44 = vsub.f32 %v185_v13, %v4331_v12 }
  0x43   : > { %1425 = vmatpush1.msra.mxu1 %v4502_v29  ;;  %v219_v48 = vsub.f32 1.0, %v211_v30  ;;  %v221_v50 = vsub.f32 1.0, %v213_v31  ;;  %v212_v37 = vand.u32 2147483647, %v204_v32  ;;  %v200_v51 = vsub.f32 %v193_v18, %v4331_v12  ;;  %v422_v12 = vld [vmem:[%s6601_s1] sm:$0xff]  ;;  %v424_v18 = vld [vmem:[%s6601_s1 + $0x10] sm:$0xff] }
  0x44   : > { %v218_v39 = vsub.f32 1.0, %v210_v17  ;;  %v215_v55 = vsub.f32 1.0, %v207_v42  ;;  %v217_v57 = vsub.f32 1.0, %v209_v34  ;;  %v206_v40 = vand.u32 2147483647, %v198_v44  ;;  %v425_v25 = vld [vmem:[%s6601_s1 + $0x18] sm:$0xff] }
  0x45   : > { %v227_v58 = vmax.f32 %v219_v48, 0.0  ;;  %v229_v22 = vmax.f32 %v221_v50, 0.0  ;;  %v220_v59 = vsub.f32 1.0, %v212_v37  ;;  %v208_v61 = vand.u32 2147483647, %v200_v51  ;;  %v426_v27 = vld [vmem:[%s6601_s1 + $0x20] sm:$0xff] }
  0x46   : > { %v226_v41 = vmax.f32 %v218_v39, 0.0  ;;  %v223_v62 = vmax.f32 %v215_v55, 0.0  ;;  %v225_v63 = vmax.f32 %v217_v57, 0.0  ;;  %v214_v24 = vsub.f32 1.0, %v206_v40  ;;  %v427_v28 = vld [vmem:[%s6601_s1 + $0x28] sm:$0xff]  ;;  %v428_v30 = vld [vmem:[%s6601_s1 + $0x30] sm:$0xff] }
  0x47   : > { %815 = vmatprep.subr.mxu0 %v227_v58  ;;  %1426 = vmatprep.subr.mxu1 %v229_v22  ;;  %v228_v8 = vmax.f32 %v220_v59, 0.0  ;;  %v216_v13 = vsub.f32 1.0, %v208_v61  ;;  %v429_v31 = vld [vmem:[%s6601_s1 + $0x38] sm:$0xff]  ;;  %v430_v32 = vld [vmem:[%s6601_s1 + $0x40] sm:$0xff]  ;;  %v431_v17 = vld [vmem:[%s6601_s1 + $0x48] sm:$0xff] }
  0x48   : > { %816 = vmatpush1.msra.mxu0 %v226_v41  ;;  %v222_v16 = vmax.f32 %v214_v24, 0.0  ;;  %v432_v42 = vld [vmem:[%s6601_s1 + $0x50] sm:$0xff]  ;;  %v433_v34 = vld [vmem:[%s6601_s1 + $0x58] sm:$0xff]  ;;  %v434_v44 = vld [vmem:[%s6601_s1 + $0x60] sm:$0xff] }
  0x49   : > { %1427 = vmatpush1.msra.mxu1 %v228_v8  ;;  %817 = vmatprep.subr.mxu0 %v223_v62  ;;  %v224_v23 = vmax.f32 %v216_v13, 0.0  ;;  %v435_v48 = vld [vmem:[%s6601_s1 + $0x68] sm:$0xff]  ;;  %v436_v50 = vld [vmem:[%s6601_s1 + $0x70] sm:$0xff]  ;;  %v437_v37 = vld [vmem:[%s6601_s1 + $0x78] sm:$0xff] }
  0x4a   : > { %1428 = vmatprep.subr.mxu1 %v225_v63  ;;  %818 = vmatpush1.msra.mxu0 %v222_v16  ;;  %v438_v51 = vld [vmem:[%s6601_s1 + $0x80] sm:$0xff]  ;;  %v439_v39 = vld [vmem:[%s6601_s1 + $0x88] sm:$0xff]  ;;  %v440_v55 = vld [vmem:[%s6601_s1 + $0x90] sm:$0xff] }
  0x4b   : > { %1429 = vmatpush1.msra.mxu1 %v224_v23  ;;  %3959 = vmatmul.mubr.msk.f32.vlgmr.msra.gmra.mxu0 %vm513_vm0, %v422_v12  ;;  %v441_v57 = vld [vmem:[%s6601_s1 + $0x98] sm:$0xff]  ;;  %v442_v40 = vld [vmem:[%s6601_s1 + $0xa0] sm:$0xff]  ;;  %v443_v58 = vld [vmem:[%s6601_s1 + $0xa8] sm:$0xff] }
  0x4c   : > { %4050 = vmatmul.mubr.msk.f32.vlgmr.msra.gmra.mxu1 %vm513_vm0, %v422_v12  ;;  %857 = vmatprep.mubr.f32.mxu0 %v6615_v1  ;;  %v444_v22 = vld [vmem:[%s6601_s1 + $0xb0] sm:$0xff]  ;;  %v445_v59 = vld [vmem:[%s6601_s1 + $0xb8] sm:$0xff]  ;;  %v446_v61 = vld [vmem:[%s6601_s1 + $0xc0] sm:$0xff] }
  0x4d   : > { %1468 = vmatprep.mubr.f32.mxu1 %v6615_v1  ;;  %v447_v41 = vld [vmem:[%s6601_s1 + $0xc8] sm:$0xff]  ;;  %v448_v62 = vld [vmem:[%s6601_s1 + $0xd0] sm:$0xff]  ;;  %v449_v63 = vld [vmem:[%s6601_s1 + $0xd8] sm:$0xff] }
  0x4e   : > { %v450_v24 = vld [vmem:[%s6601_s1 + $0xe0] sm:$0xff]  ;;  %v451_v8 = vld [vmem:[%s6601_s1 + $0xe8] sm:$0xff]  ;;  %v452_v13 = vld [vmem:[%s6601_s1 + $0xf0] sm:$0xff] }
  0x4f   : > { %3960 = vmatmul.mubr.msk.f32.gmra.mxu0 %vm513_vm0, %v423_v15  ;;  %v453_v16 = vld [vmem:[%s6601_s1 + $0xf8] sm:$0xff]  ;;  %v454_v12 = vld [vmem:[%s6601_s1 + $0x100] sm:$0xff]  ;;  %v455_v23 = vld [vmem:[%s6601_s1 + $0x108] sm:$0xff] }
  0x50   : > { %4051 = vmatmul.mubr.msk.f32.gmra.mxu1 %vm513_vm0, %v423_v15  ;;  %863 = vmatprep.mubr.f32.mxu0 %v6615_v1  ;;  %v456_v15 = vld [vmem:[%s6601_s1 + $0x110] sm:$0xff] }
  0x51   : > { %1474 = vmatprep.mubr.f32.mxu1 %v6615_v1 }
  0x53   : > { %3961 = vmatmul.mubr.msk.f32.gmra.mxu0 %vm513_vm0, %v424_v18 }
  0x54   : > { %4052 = vmatmul.mubr.msk.f32.gmra.mxu1 %vm513_vm0, %v424_v18  ;;  %869 = vmatprep.mubr.f32.mxu0 %v6615_v1  ;;  %v457_v18 = vld [vmem:[%s6601_s1 + $0x118] sm:$0xff] }
  0x55   : > { %1480 = vmatprep.mubr.f32.mxu1 %v6615_v1 }
  0x57   : > { %3962 = vmatmul.mubr.msk.f32.gmra.mxu0 %vm513_vm0, %v425_v25 }
  0x58   : > { %4053 = vmatmul.mubr.msk.f32.gmra.mxu1 %vm513_vm0, %v425_v25  ;;  %875 = vmatprep.mubr.f32.mxu0 %v6615_v1  ;;  %v458_v25 = vld [vmem:[%s6601_s1 + $0x120] sm:$0xff] }
  0x59   : > { %1486 = vmatprep.mubr.f32.mxu1 %v6615_v1 }
  0x5b   : > { %3963 = vmatmul.mubr.msk.f32.gmra.mxu0 %vm513_vm0, %v426_v27 }
  0x5c   : > { %4054 = vmatmul.mubr.msk.f32.gmra.mxu1 %vm513_vm0, %v426_v27  ;;  %881 = vmatprep.mubr.f32.mxu0 %v6615_v1  ;;  %v459_v27 = vld [vmem:[%s6601_s1 + $0x128] sm:$0xff] }
  0x5d   : > { %1492 = vmatprep.mubr.f32.mxu1 %v6615_v1 }
  0x5f   : > { %3964 = vmatmul.mubr.msk.f32.gmra.mxu0 %vm513_vm0, %v427_v28 }
  0x60   : > { %4055 = vmatmul.mubr.msk.f32.gmra.mxu1 %vm513_vm0, %v427_v28  ;;  %887 = vmatprep.mubr.f32.mxu0 %v6615_v1  ;;  %v460_v28 = vld [vmem:[%s6601_s1 + $0x130] sm:$0xff] }
  0x61   : > { %1498 = vmatprep.mubr.f32.mxu1 %v6615_v1 }
  0x63   : > { %3965 = vmatmul.mubr.msk.f32.gmra.mxu0 %vm513_vm0, %v428_v30 }
  0x64   : > { %4056 = vmatmul.mubr.msk.f32.gmra.mxu1 %vm513_vm0, %v428_v30  ;;  %893 = vmatprep.mubr.f32.mxu0 %v6615_v1  ;;  %v461_v30 = vld [vmem:[%s6601_s1 + $0x138] sm:$0xff] }
  0x65   : > { %1504 = vmatprep.mubr.f32.mxu1 %v6615_v1 }
  0x67   : > { %3966 = vmatmul.mubr.msk.f32.gmra.mxu0 %vm513_vm0, %v429_v31 }
  0x68   : > { %4057 = vmatmul.mubr.msk.f32.gmra.mxu1 %vm513_vm0, %v429_v31  ;;  %899 = vmatprep.mubr.f32.mxu0 %v6615_v1  ;;  %v462_v31 = vld [vmem:[%s6601_s1 + $0x140] sm:$0xff] }
  0x69   : > { %1510 = vmatprep.mubr.f32.mxu1 %v6615_v1 }
  0x6b   : > { %3967 = vmatmul.mubr.msk.f32.gmra.mxu0 %vm513_vm0, %v430_v32 }
  0x6c   : > { %4058 = vmatmul.mubr.msk.f32.gmra.mxu1 %vm513_vm0, %v430_v32  ;;  %905 = vmatprep.mubr.f32.mxu0 %v6615_v1  ;;  %v463_v32 = vld [vmem:[%s6601_s1 + $0x148] sm:$0xff] }
  0x6d   : > { %1516 = vmatprep.mubr.f32.mxu1 %v6615_v1 }
  0x6f   : > { %3968 = vmatmul.mubr.msk.f32.gmra.mxu0 %vm513_vm0, %v431_v17 }
  0x70   : > { %4059 = vmatmul.mubr.msk.f32.gmra.mxu1 %vm513_vm0, %v431_v17  ;;  %911 = vmatprep.mubr.f32.mxu0 %v6615_v1  ;;  %v464_v17 = vld [vmem:[%s6601_s1 + $0x150] sm:$0xff] }
  0x71   : > { %1522 = vmatprep.mubr.f32.mxu1 %v6615_v1 }
  0x73   : > { %3969 = vmatmul.mubr.msk.f32.gmra.mxu0 %vm513_vm0, %v432_v42 }
  0x74   : > { %4060 = vmatmul.mubr.msk.f32.gmra.mxu1 %vm513_vm0, %v432_v42  ;;  %917 = vmatprep.mubr.f32.mxu0 %v6615_v1  ;;  %v465_v42 = vld [vmem:[%s6601_s1 + $0x158] sm:$0xff] }
  0x75   : > { %1528 = vmatprep.mubr.f32.mxu1 %v6615_v1 }
  0x77   : > { %3970 = vmatmul.mubr.msk.f32.gmra.mxu0 %vm513_vm0, %v433_v34 }
  0x78   : > { %4061 = vmatmul.mubr.msk.f32.gmra.mxu1 %vm513_vm0, %v433_v34  ;;  %923 = vmatprep.mubr.f32.mxu0 %v6615_v1  ;;  %v466_v34 = vld [vmem:[%s6601_s1 + $0x160] sm:$0xff] }
  0x79   : > { %1534 = vmatprep.mubr.f32.mxu1 %v6615_v1 }
  0x7b   : > { %3971 = vmatmul.mubr.msk.f32.gmra.mxu0 %vm513_vm0, %v434_v44 }
  0x7c   : > { %4062 = vmatmul.mubr.msk.f32.gmra.mxu1 %vm513_vm0, %v434_v44  ;;  %929 = vmatprep.mubr.f32.mxu0 %v6615_v1  ;;  %v467_v44 = vld [vmem:[%s6601_s1 + $0x168] sm:$0xff] }
  0x7d   : > { %1540 = vmatprep.mubr.f32.mxu1 %v6615_v1 }
  0x7f   : > { %3972 = vmatmul.mubr.msk.f32.gmra.mxu0 %vm513_vm0, %v435_v48 }
  0x80   : > { %4063 = vmatmul.mubr.msk.f32.gmra.mxu1 %vm513_vm0, %v435_v48  ;;  %935 = vmatprep.mubr.f32.mxu0 %v6615_v1  ;;  %v468_v48 = vld [vmem:[%s6601_s1 + $0x170] sm:$0xff] }
  0x81   : > { %1546 = vmatprep.mubr.f32.mxu1 %v6615_v1 }
  0x83   : > { %3973 = vmatmul.mubr.msk.f32.gmra.mxu0 %vm513_vm0, %v436_v50 }
  0x84   : > { %4064 = vmatmul.mubr.msk.f32.gmra.mxu1 %vm513_vm0, %v436_v50  ;;  %941 = vmatprep.mubr.f32.mxu0 %v6615_v1  ;;  %v469_v50 = vld [vmem:[%s6601_s1 + $0x178] sm:$0xff] }
  0x85   : > { %1552 = vmatprep.mubr.f32.mxu1 %v6615_v1 }
  0x87   : > { %3974 = vmatmul.mubr.msk.f32.gmra.mxu0 %vm513_vm0, %v437_v37 }
  0x88   : > { %4065 = vmatmul.mubr.msk.f32.gmra.mxu1 %vm513_vm0, %v437_v37  ;;  %947 = vmatprep.mubr.f32.mxu0 %v6615_v1  ;;  %v470_v37 = vld [vmem:[%s6601_s1 + $0x180] sm:$0xff] }
  0x89   : > { %1558 = vmatprep.mubr.f32.mxu1 %v6615_v1 }
  0x8b   : > { %3975 = vmatmul.mubr.msk.f32.gmra.mxu0 %vm513_vm0, %v438_v51 }
  0x8c   : > { %4066 = vmatmul.mubr.msk.f32.gmra.mxu1 %vm513_vm0, %v438_v51  ;;  %953 = vmatprep.mubr.f32.mxu0 %v6615_v1 }
  0x8d   : > { %1564 = vmatprep.mubr.f32.mxu1 %v6615_v1 }
  0x8f   : > { %3976 = vmatmul.mubr.msk.f32.gmra.mxu0 %vm513_vm0, %v439_v39 }
  0x90   : > { %4067 = vmatmul.mubr.msk.f32.gmra.mxu1 %vm513_vm0, %v439_v39  ;;  %959 = vmatprep.mubr.f32.mxu0 %v6615_v1 }
  0x91   : > { %1570 = vmatprep.mubr.f32.mxu1 %v6615_v1 }
  0x93   : > { %3977 = vmatmul.mubr.msk.f32.gmra.mxu0 %vm513_vm0, %v440_v55 }
  0x94   : > { %4068 = vmatmul.mubr.msk.f32.gmra.mxu1 %vm513_vm0, %v440_v55  ;;  %965 = vmatprep.mubr.f32.mxu0 %v6615_v1  ;;  %v471_v55 = vld [vmem:[%s6601_s1 + $0x188] sm:$0xff] }
  0x95   : > { %1576 = vmatprep.mubr.f32.mxu1 %v6615_v1 }
  0x97   : > { %3978 = vmatmul.mubr.msk.f32.gmra.mxu0 %vm513_vm0, %v441_v57 }
  0x98   : > { %4069 = vmatmul.mubr.msk.f32.gmra.mxu1 %vm513_vm0, %v441_v57  ;;  %971 = vmatprep.mubr.f32.mxu0 %v6615_v1 }
  0x99   : > { %1582 = vmatprep.mubr.f32.mxu1 %v6615_v1 }
  0x9b   : > { %3979 = vmatmul.mubr.msk.f32.gmra.mxu0 %vm513_vm0, %v442_v40 }
  0x9c   : > { %4070 = vmatmul.mubr.msk.f32.gmra.mxu1 %vm513_vm0, %v442_v40  ;;  %977 = vmatprep.mubr.f32.mxu0 %v6615_v1 }
  0x9d   : > { %1588 = vmatprep.mubr.f32.mxu1 %v6615_v1 }
  0x9f   : > { %3980 = vmatmul.mubr.msk.f32.gmra.mxu0 %vm513_vm0, %v443_v58 }
  0xa0   : > { %4071 = vmatmul.mubr.msk.f32.gmra.mxu1 %vm513_vm0, %v443_v58  ;;  %983 = vmatprep.mubr.f32.mxu0 %v6615_v1 }
  0xa1   : > { %1594 = vmatprep.mubr.f32.mxu1 %v6615_v1 }
  0xa3   : > { %3981 = vmatmul.mubr.msk.f32.gmra.mxu0 %vm513_vm0, %v444_v22 }
  0xa4   : > { %4072 = vmatmul.mubr.msk.f32.gmra.mxu1 %vm513_vm0, %v444_v22  ;;  %989 = vmatprep.mubr.f32.mxu0 %v6615_v1 }
  0xa5   : > { %1600 = vmatprep.mubr.f32.mxu1 %v6615_v1 }
  0xa7   : > { %3982 = vmatmul.mubr.msk.f32.gmra.mxu0 %vm513_vm0, %v445_v59 }
  0xa8   : > { %4073 = vmatmul.mubr.msk.f32.gmra.mxu1 %vm513_vm0, %v445_v59  ;;  %995 = vmatprep.mubr.f32.mxu0 %v6615_v1 }
  0xa9   : > { %1606 = vmatprep.mubr.f32.mxu1 %v6615_v1 }
  0xab   : > { %3983 = vmatmul.mubr.msk.f32.gmra.mxu0 %vm513_vm0, %v446_v61 }
  0xac   : > { %4074 = vmatmul.mubr.msk.f32.gmra.mxu1 %vm513_vm0, %v446_v61  ;;  %1001 = vmatprep.mubr.f32.mxu0 %v6615_v1 }
  0xad   : > { %1612 = vmatprep.mubr.f32.mxu1 %v6615_v1 }
  0xaf   : > { %3984 = vmatmul.mubr.msk.f32.gmra.mxu0 %vm513_vm0, %v447_v41 }
  0xb0   : > { %4075 = vmatmul.mubr.msk.f32.gmra.mxu1 %vm513_vm0, %v447_v41  ;;  %1007 = vmatprep.mubr.f32.mxu0 %v6615_v1  ;;  %v472_v41 = vld [vmem:[%s6601_s1 + $0x190] sm:$0xff] }
  0xb1   : > { %1618 = vmatprep.mubr.f32.mxu1 %v6615_v1 }
  0xb3   : > { %3985 = vmatmul.mubr.msk.f32.gmra.mxu0 %vm513_vm0, %v448_v62 }
  0xb4   : > { %4076 = vmatmul.mubr.msk.f32.gmra.mxu1 %vm513_vm0, %v448_v62  ;;  %1013 = vmatprep.mubr.f32.mxu0 %v6615_v1 }
  0xb5   : > { %1624 = vmatprep.mubr.f32.mxu1 %v6615_v1 }
  0xb7   : > { %3986 = vmatmul.mubr.msk.f32.gmra.mxu0 %vm513_vm0, %v449_v63 }
  0xb8   : > { %4077 = vmatmul.mubr.msk.f32.gmra.mxu1 %vm513_vm0, %v449_v63  ;;  %1019 = vmatprep.mubr.f32.mxu0 %v6615_v1 }
  0xb9   : > { %1630 = vmatprep.mubr.f32.mxu1 %v6615_v1 }
  0xbb   : > { %3987 = vmatmul.mubr.msk.f32.gmra.mxu0 %vm513_vm0, %v450_v24 }
  0xbc   : > { %4078 = vmatmul.mubr.msk.f32.gmra.mxu1 %vm513_vm0, %v450_v24  ;;  %1025 = vmatprep.mubr.f32.mxu0 %v6615_v1 }
  0xbd   : > { %1636 = vmatprep.mubr.f32.mxu1 %v6615_v1 }
  0xbf   : > { %3988 = vmatmul.mubr.msk.f32.gmra.mxu0 %vm513_vm0, %v451_v8 }
  0xc0   : > { %4079 = vmatmul.mubr.msk.f32.gmra.mxu1 %vm513_vm0, %v451_v8  ;;  %1031 = vmatprep.mubr.f32.mxu0 %v6615_v1 }
  0xc1   : > { %1642 = vmatprep.mubr.f32.mxu1 %v6615_v1 }
  0xc3   : > { %3989 = vmatmul.mubr.msk.f32.gmra.mxu0 %vm513_vm0, %v452_v13 }
  0xc4   : > { %4080 = vmatmul.mubr.msk.f32.gmra.mxu1 %vm513_vm0, %v452_v13  ;;  %1037 = vmatprep.mubr.f32.mxu0 %v6615_v1 }
  0xc5   : > { %1648 = vmatprep.mubr.f32.mxu1 %v6615_v1 }
  0xc7   : > { %3990 = vmatmul.mubr.msk.f32.gmra.mxu0 %vm513_vm0, %v453_v16 }
  0xc8   : > { %4081 = vmatmul.mubr.msk.f32.gmra.mxu1 %vm513_vm0, %v453_v16  ;;  %1043 = vmatprep.mubr.f32.mxu0 %v6615_v1 }
  0xc9   : > { %1654 = vmatprep.mubr.f32.mxu1 %v6615_v1 }
  0xcb   : > { %3991 = vmatmul.mubr.msk.f32.gmra.mxu0 %vm513_vm0, %v454_v12 }
  0xcc   : > { %4082 = vmatmul.mubr.msk.f32.gmra.mxu1 %vm513_vm0, %v454_v12  ;;  %1049 = vmatprep.mubr.f32.mxu0 %v6615_v1 }
  0xcd   : > { %1660 = vmatprep.mubr.f32.mxu1 %v6615_v1 }
  0xcf   : > { %3992 = vmatmul.mubr.msk.f32.gmra.mxu0 %vm513_vm0, %v455_v23 }
  0xd0   : > { %4083 = vmatmul.mubr.msk.f32.gmra.mxu1 %vm513_vm0, %v455_v23  ;;  %1055 = vmatprep.mubr.f32.mxu0 %v6615_v1 }
  0xd1   : > { %1666 = vmatprep.mubr.f32.mxu1 %v6615_v1 }
  0xd3   : > { %3993 = vmatmul.mubr.msk.f32.gmra.mxu0 %vm513_vm0, %v456_v15 }
  0xd4   : > { %4084 = vmatmul.mubr.msk.f32.gmra.mxu1 %vm513_vm0, %v456_v15  ;;  %1061 = vmatprep.mubr.f32.mxu0 %v6615_v1 }
  0xd5   : > { %1672 = vmatprep.mubr.f32.mxu1 %v6615_v1 }
  0xd7   : > { %3994 = vmatmul.mubr.msk.f32.gmra.mxu0 %vm513_vm0, %v457_v18 }
  0xd8   : > { %4085 = vmatmul.mubr.msk.f32.gmra.mxu1 %vm513_vm0, %v457_v18  ;;  %1067 = vmatprep.mubr.f32.mxu0 %v6615_v1 }
  0xd9   : > { %1678 = vmatprep.mubr.f32.mxu1 %v6615_v1 }
  0xdb   : > { %3995 = vmatmul.mubr.msk.f32.gmra.mxu0 %vm513_vm0, %v458_v25 }
  0xdc   : > { %4086 = vmatmul.mubr.msk.f32.gmra.mxu1 %vm513_vm0, %v458_v25  ;;  %1073 = vmatprep.mubr.f32.mxu0 %v6615_v1 }
  0xdd   : > { %1684 = vmatprep.mubr.f32.mxu1 %v6615_v1 }
  0xdf   : > { %3996 = vmatmul.mubr.msk.f32.gmra.mxu0 %vm513_vm0, %v459_v27 }
  0xe0   : > { %4087 = vmatmul.mubr.msk.f32.gmra.mxu1 %vm513_vm0, %v459_v27  ;;  %1079 = vmatprep.mubr.f32.mxu0 %v6615_v1 }
  0xe1   : > { %1690 = vmatprep.mubr.f32.mxu1 %v6615_v1 }
  0xe3   : > { %3997 = vmatmul.mubr.msk.f32.gmra.mxu0 %vm513_vm0, %v460_v28 }
  0xe4   : > { %4088 = vmatmul.mubr.msk.f32.gmra.mxu1 %vm513_vm0, %v460_v28  ;;  %1085 = vmatprep.mubr.f32.mxu0 %v6615_v1 }
  0xe5   : > { %1696 = vmatprep.mubr.f32.mxu1 %v6615_v1 }
  0xe7   : > { %3998 = vmatmul.mubr.msk.f32.gmra.mxu0 %vm513_vm0, %v461_v30 }
  0xe8   : > { %4089 = vmatmul.mubr.msk.f32.gmra.mxu1 %vm513_vm0, %v461_v30  ;;  %1091 = vmatprep.mubr.f32.mxu0 %v6615_v1 }
  0xe9   : > { %1702 = vmatprep.mubr.f32.mxu1 %v6615_v1 }
  0xeb   : > { %3999 = vmatmul.mubr.msk.f32.gmra.mxu0 %vm513_vm0, %v462_v31 }
  0xec   : > { %4090 = vmatmul.mubr.msk.f32.gmra.mxu1 %vm513_vm0, %v462_v31  ;;  %1097 = vmatprep.mubr.f32.mxu0 %v6615_v1  ;;  %v473_v31 = vld [vmem:[%s6601_s1 + $0x198] sm:$0xff] }
  0xed   : > { %1708 = vmatprep.mubr.f32.mxu1 %v6615_v1 }
  0xef   : > { %4000 = vmatmul.mubr.msk.f32.gmra.mxu0 %vm513_vm0, %v463_v32 }
  0xf0   : > { %4091 = vmatmul.mubr.msk.f32.gmra.mxu1 %vm513_vm0, %v463_v32  ;;  %1103 = vmatprep.mubr.f32.mxu0 %v6615_v1 }
  0xf1   : > { %1714 = vmatprep.mubr.f32.mxu1 %v6615_v1 }
  0xf3   : > { %4001 = vmatmul.mubr.msk.f32.gmra.mxu0 %vm513_vm0, %v464_v17 }
  0xf4   : > { %4092 = vmatmul.mubr.msk.f32.gmra.mxu1 %vm513_vm0, %v464_v17  ;;  %1109 = vmatprep.mubr.f32.mxu0 %v6615_v1 }
  0xf5   : > { %1720 = vmatprep.mubr.f32.mxu1 %v6615_v1 }
  0xf7   : > { %4002 = vmatmul.mubr.msk.f32.gmra.mxu0 %vm513_vm0, %v465_v42 }
  0xf8   : > { %4093 = vmatmul.mubr.msk.f32.gmra.mxu1 %vm513_vm0, %v465_v42  ;;  %1115 = vmatprep.mubr.f32.mxu0 %v6615_v1 }
  0xf9   : > { %1726 = vmatprep.mubr.f32.mxu1 %v6615_v1 }
  0xfb   : > { %4003 = vmatmul.mubr.msk.f32.gmra.mxu0 %vm513_vm0, %v466_v34 }
  0xfc   : > { %4094 = vmatmul.mubr.msk.f32.gmra.mxu1 %vm513_vm0, %v466_v34  ;;  %1121 = vmatprep.mubr.f32.mxu0 %v6615_v1 }
  0xfd   : > { %1732 = vmatprep.mubr.f32.mxu1 %v6615_v1 }
  0xff   : > { %4004 = vmatmul.mubr.msk.f32.gmra.mxu0 %vm513_vm0, %v467_v44 }
 0x100   : > { %4095 = vmatmul.mubr.msk.f32.gmra.mxu1 %vm513_vm0, %v467_v44  ;;  %1127 = vmatprep.mubr.f32.mxu0 %v6615_v1 }
 0x101   : > { %1738 = vmatprep.mubr.f32.mxu1 %v6615_v1 }
 0x103   : > { %4005 = vmatmul.mubr.msk.f32.gmra.mxu0 %vm513_vm0, %v468_v48 }
 0x104   : > { %4096 = vmatmul.mubr.msk.f32.gmra.mxu1 %vm513_vm0, %v468_v48  ;;  %1133 = vmatprep.mubr.f32.mxu0 %v6615_v1 }
 0x105   : > { %1744 = vmatprep.mubr.f32.mxu1 %v6615_v1 }
 0x107   : > { %4006 = vmatmul.mubr.msk.f32.gmra.mxu0 %vm513_vm0, %v469_v50 }
 0x108   : > { %4097 = vmatmul.mubr.msk.f32.gmra.mxu1 %vm513_vm0, %v469_v50  ;;  %1139 = vmatprep.mubr.f32.mxu0 %v6615_v1 }
 0x109   : > { %1750 = vmatprep.mubr.f32.mxu1 %v6615_v1 }
 0x10b   : > { %v853_v51 = vpop.f32.mrf.mxu0  ;;  %4007 = vmatmul.mubr.msk.f32.gmra.mxu0 %vm513_vm0, %v470_v37 }
 0x10c   : > { %v1464_v39 = vpop.f32.mrf.mxu1  ;;  %4098 = vmatmul.mubr.msk.f32.gmra.mxu1 %vm513_vm0, %v470_v37  ;;  %1145 = vmatprep.mubr.f32.mxu0 %v6615_v1  ;;  %v2009_v22 = vmul.f32 %v853_v51, %v4497_v19 }
 0x10d   : > { %v855_v57 = vpop.f32.mrf.mxu0  ;;  %1756 = vmatprep.mubr.f32.mxu1 %v6615_v1  ;;  %v2011_v62 = vmul.f32 %v1464_v39, %v4502_v29 }
 0x10e   : > { %v1466_v40 = vpop.f32.mrf.mxu1  ;;  %v2010_v8 = vmul.f32 %v855_v57, %v4487_v3  ;;  %v474_v57 = vld [vmem:[%s6601_s1 + $0x1a0] sm:$0xff] }
 0x10f   : > { %v859_v58 = vpop.f32.mrf.mxu0  ;;  %4008 = vmatmul.mubr.msk.f32.gmra.mxu0 %vm513_vm0, %v471_v55  ;;  %v2012_v23 = vmul.f32 %v1466_v40, %v4489_v4 }
 0x110   : > { %v2013_v59 = vmul.f32 %v859_v58, %v4462_v36  ;;  %v1470_v61 = vpop.f32.mrf.mxu1  ;;  %4099 = vmatmul.mubr.msk.f32.gmra.mxu1 %vm513_vm0, %v471_v55  ;;  %1151 = vmatprep.mubr.f32.mxu0 %v6615_v1 }
 0x111   : > { %v2015_v63 = vmul.f32 %v1470_v61, %v4468_v38  ;;  %v861_v24 = vpop.f32.mrf.mxu0  ;;  %1762 = vmatprep.mubr.f32.mxu1 %v6615_v1 }
 0x112   : > { %v2105_v13 = vadd.f32 %v2013_v59, %v2009_v22  ;;  %v2014_v16 = vmul.f32 %v861_v24, %v4457_v46  ;;  %v1472_v12 = vpop.f32.mrf.mxu1 }
 0x113   : > { %v2121_v15 = vadd.f32 %v2015_v63, %v2011_v62  ;;  %v2016_v18 = vmul.f32 %v1472_v12, %v4459_v47  ;;  %v865_v25 = vpop.f32.mrf.mxu0  ;;  %4009 = vmatmul.mubr.msk.f32.gmra.mxu0 %vm513_vm0, %v472_v41  ;;  %v475_v63 = vld [vmem:[%s6601_s1 + $0x1a8] sm:$0xff] }
 0x114   : > { %v2113_v27 = vadd.f32 %v2014_v16, %v2010_v8  ;;  %v2017_v28 = vmul.f32 %v865_v25, %v4449_v33  ;;  %v1476_v30 = vpop.f32.mrf.mxu1  ;;  %4100 = vmatmul.mubr.msk.f32.gmra.mxu1 %vm513_vm0, %v472_v41  ;;  %1157 = vmatprep.mubr.f32.mxu0 %v6615_v1 }
 0x115   : > { %v2129_v32 = vadd.f32 %v2016_v18, %v2012_v23  ;;  %v2019_v17 = vmul.f32 %v1476_v30, %v4455_v45  ;;  %v867_v42 = vpop.f32.mrf.mxu0  ;;  %1768 = vmatprep.mubr.f32.mxu1 %v6615_v1 }
 0x116   : > { %v4879_v34 = vadd.f32 %v2105_v13, %v2017_v28  ;;  %v2018_v44 = vmul.f32 %v867_v42, %v4443_v21  ;;  %v1478_v48 = vpop.f32.mrf.mxu1 }
 0x117   : > { %v4882_v50 = vadd.f32 %v2121_v15, %v2019_v17  ;;  %v2020_v37 = vmul.f32 %v1478_v48, %v4445_v26  ;;  %v871_v51 = vpop.f32.mrf.mxu0  ;;  %4010 = vmatmul.mubr.msk.f32.gmra.mxu0 %vm513_vm0, %v473_v31  ;;  %v476_v17 = vld [vmem:[%s6601_s1 + $0x1b0] sm:$0xff] }
 0x118   : > { %v4886_v39 = vadd.f32 %v2113_v27, %v2018_v44  ;;  %v1482_v55 = vpop.f32.mrf.mxu1  ;;  %4101 = vmatmul.mubr.msk.f32.gmra.mxu1 %vm513_vm0, %v473_v31  ;;  %1163 = vmatprep.mubr.f32.mxu0 %v6615_v1  ;;  %v2021_v61 = vmul.f32 %v871_v51, %v4497_v19 }
 0x119   : > { %v4893_v40 = vadd.f32 %v2129_v32, %v2020_v37  ;;  %v873_v58 = vpop.f32.mrf.mxu0  ;;  %1774 = vmatprep.mubr.f32.mxu1 %v6615_v1  ;;  %v2023_v24 = vmul.f32 %v1482_v55, %v4502_v29 }
 0x11a   : > { %v1484_v22 = vpop.f32.mrf.mxu1  ;;  %v2022_v16 = vmul.f32 %v873_v58, %v4487_v3 }
 0x11b   : > { %v877_v59 = vpop.f32.mrf.mxu0  ;;  %4011 = vmatmul.mubr.msk.f32.gmra.mxu0 %vm513_vm0, %v474_v57  ;;  %v2024_v18 = vmul.f32 %v1484_v22, %v4489_v4 }
 0x11c   : > { %v2025_v41 = vmul.f32 %v877_v59, %v4462_v36  ;;  %v1488_v62 = vpop.f32.mrf.mxu1  ;;  %4102 = vmatmul.mubr.msk.f32.gmra.mxu1 %vm513_vm0, %v474_v57  ;;  %1169 = vmatprep.mubr.f32.mxu0 %v6615_v1 }
 0x11d   : > { %v2027_v8 = vmul.f32 %v1488_v62, %v4468_v38  ;;  %v879_v13 = vpop.f32.mrf.mxu0  ;;  %1780 = vmatprep.mubr.f32.mxu1 %v6615_v1 }
 0x11e   : > { %v2137_v12 = vadd.f32 %v2025_v41, %v2021_v61  ;;  %v2026_v23 = vmul.f32 %v879_v13, %v4457_v46  ;;  %v1490_v15 = vpop.f32.mrf.mxu1  ;;  %v477_v41 = vld [vmem:[%s6601_s1 + $0x1b8] sm:$0xff] }
 0x11f   : > { %v2153_v25 = vadd.f32 %v2027_v8, %v2023_v24  ;;  %v2028_v27 = vmul.f32 %v1490_v15, %v4459_v47  ;;  %v883_v28 = vpop.f32.mrf.mxu0  ;;  %4012 = vmatmul.mubr.msk.f32.gmra.mxu0 %vm513_vm0, %v475_v63 }
 0x120   : > { %v2145_v30 = vadd.f32 %v2026_v23, %v2022_v16  ;;  %v2029_v31 = vmul.f32 %v883_v28, %v4449_v33  ;;  %v1494_v32 = vpop.f32.mrf.mxu1  ;;  %4103 = vmatmul.mubr.msk.f32.gmra.mxu1 %vm513_vm0, %v475_v63  ;;  %1175 = vmatprep.mubr.f32.mxu0 %v6615_v1  ;;  %v478_v23 = vld [vmem:[%s6601_s1 + $0x1c0] sm:$0xff] }
 0x121   : > { %v2161_v42 = vadd.f32 %v2028_v27, %v2024_v18  ;;  %v2031_v44 = vmul.f32 %v1494_v32, %v4455_v45  ;;  %v885_v48 = vpop.f32.mrf.mxu0  ;;  %1786 = vmatprep.mubr.f32.mxu1 %v6615_v1 }
 0x122   : > { %v4920_v37 = vadd.f32 %v2137_v12, %v2029_v31  ;;  %v2030_v51 = vmul.f32 %v885_v48, %v4443_v21  ;;  %v1496_v55 = vpop.f32.mrf.mxu1 }
 0x123   : > { %v4923_v57 = vadd.f32 %v2153_v25, %v2031_v44  ;;  %v2032_v58 = vmul.f32 %v1496_v55, %v4445_v26  ;;  %v889_v22 = vpop.f32.mrf.mxu0  ;;  %4013 = vmatmul.mubr.msk.f32.gmra.mxu0 %vm513_vm0, %v476_v17 }
 0x124   : > { %v4927_v59 = vadd.f32 %v2145_v30, %v2030_v51  ;;  %v1500_v61 = vpop.f32.mrf.mxu1  ;;  %4104 = vmatmul.mubr.msk.f32.gmra.mxu1 %vm513_vm0, %v476_v17  ;;  %1181 = vmatprep.mubr.f32.mxu0 %v6615_v1  ;;  %v2033_v13 = vmul.f32 %v889_v22, %v4497_v19 }
 0x125   : > { %v4934_v62 = vadd.f32 %v2161_v42, %v2032_v58  ;;  %v891_v63 = vpop.f32.mrf.mxu0  ;;  %1792 = vmatprep.mubr.f32.mxu1 %v6615_v1  ;;  %v2035_v15 = vmul.f32 %v1500_v61, %v4502_v29  ;;  %v479_v58 = vld [vmem:[%s6601_s1 + $0x1c8] sm:$0xff] }
 0x126   : > { %v1502_v24 = vpop.f32.mrf.mxu1  ;;  %v2034_v27 = vmul.f32 %v891_v63, %v4487_v3 }
 0x127   : > { %v895_v8 = vpop.f32.mrf.mxu0  ;;  %4014 = vmatmul.mubr.msk.f32.gmra.mxu0 %vm513_vm0, %v477_v41  ;;  %v2036_v32 = vmul.f32 %v1502_v24, %v4489_v4 }
 0x128   : > { %v2037_v16 = vmul.f32 %v895_v8, %v4462_v36  ;;  %v1506_v12 = vpop.f32.mrf.mxu1  ;;  %4105 = vmatmul.mubr.msk.f32.gmra.mxu1 %vm513_vm0, %v477_v41  ;;  %1187 = vmatprep.mubr.f32.mxu0 %v6615_v1 }
 0x129   : > { %v2039_v18 = vmul.f32 %v1506_v12, %v4468_v38  ;;  %v897_v25 = vpop.f32.mrf.mxu0  ;;  %1798 = vmatprep.mubr.f32.mxu1 %v6615_v1 }
 0x12a   : > { %v2169_v28 = vadd.f32 %v2037_v16, %v2033_v13  ;;  %v2038_v30 = vmul.f32 %v897_v25, %v4457_v46  ;;  %v1508_v31 = vpop.f32.mrf.mxu1 }
 0x12b   : > { %v2185_v17 = vadd.f32 %v2039_v18, %v2035_v15  ;;  %v2040_v42 = vmul.f32 %v1508_v31, %v4459_v47  ;;  %v901_v44 = vpop.f32.mrf.mxu0  ;;  %4015 = vmatmul.mubr.msk.f32.gmra.mxu0 %vm513_vm0, %v478_v23  ;;  %v480_v18 = vld [vmem:[%s6601_s1 + $0x1d0] sm:$0xff] }
 0x12c   : > { %v2177_v48 = vadd.f32 %v2038_v30, %v2034_v27  ;;  %v2041_v51 = vmul.f32 %v901_v44, %v4449_v33  ;;  %v1512_v55 = vpop.f32.mrf.mxu1  ;;  %4106 = vmatmul.mubr.msk.f32.gmra.mxu1 %vm513_vm0, %v478_v23  ;;  %1193 = vmatprep.mubr.f32.mxu0 %v6615_v1 }
 0x12d   : > { %v2193_v22 = vadd.f32 %v2040_v42, %v2036_v32  ;;  %v2043_v61 = vmul.f32 %v1512_v55, %v4455_v45  ;;  %v903_v41 = vpop.f32.mrf.mxu0  ;;  %1804 = vmatprep.mubr.f32.mxu1 %v6615_v1  ;;  %v481_v42 = vld [vmem:[%s6601_s1 + $0x1d8] sm:$0xff] }
 0x12e   : > { %v4961_v63 = vadd.f32 %v2169_v28, %v2041_v51  ;;  %v2042_v24 = vmul.f32 %v903_v41, %v4443_v21  ;;  %v1514_v8 = vpop.f32.mrf.mxu1 }
 0x12f   : > { %v4964_v13 = vadd.f32 %v2185_v17, %v2043_v61  ;;  %v2044_v16 = vmul.f32 %v1514_v8, %v4445_v26  ;;  %v907_v12 = vpop.f32.mrf.mxu0  ;;  %4016 = vmatmul.mubr.msk.f32.gmra.mxu0 %vm513_vm0, %v479_v58 }
 0x130   : > { %v4968_v23 = vadd.f32 %v2177_v48, %v2042_v24  ;;  %v1518_v15 = vpop.f32.mrf.mxu1  ;;  %4107 = vmatmul.mubr.msk.f32.gmra.mxu1 %vm513_vm0, %v479_v58  ;;  %1199 = vmatprep.mubr.f32.mxu0 %v6615_v1  ;;  %v2045_v31 = vmul.f32 %v907_v12, %v4497_v19 }
 0x131   : > { %v4975_v25 = vadd.f32 %v2193_v22, %v2044_v16  ;;  %v909_v27 = vpop.f32.mrf.mxu0  ;;  %1810 = vmatprep.mubr.f32.mxu1 %v6615_v1  ;;  %v2047_v44 = vmul.f32 %v1518_v15, %v4502_v29 }
 0x132   : > { %v1520_v28 = vpop.f32.mrf.mxu1  ;;  %v2046_v55 = vmul.f32 %v909_v27, %v4487_v3  ;;  %v482_v27 = vld [vmem:[%s6601_s1 + $0x1e0] sm:$0xff] }
 0x133   : > { %v913_v30 = vpop.f32.mrf.mxu0  ;;  %4017 = vmatmul.mubr.msk.f32.gmra.mxu0 %vm513_vm0, %v480_v18  ;;  %v2048_v41 = vmul.f32 %v1520_v28, %v4489_v4 }
 0x134   : > { %v2049_v32 = vmul.f32 %v913_v30, %v4462_v36  ;;  %v1524_v17 = vpop.f32.mrf.mxu1  ;;  %4108 = vmatmul.mubr.msk.f32.gmra.mxu1 %vm513_vm0, %v480_v18  ;;  %1205 = vmatprep.mubr.f32.mxu0 %v6615_v1 }
 0x135   : > { %v2051_v48 = vmul.f32 %v1524_v17, %v4468_v38  ;;  %v915_v51 = vpop.f32.mrf.mxu0  ;;  %1816 = vmatprep.mubr.f32.mxu1 %v6615_v1 }
 0x136   : > { %v2201_v58 = vadd.f32 %v2049_v32, %v2045_v31  ;;  %v2050_v22 = vmul.f32 %v915_v51, %v4457_v46  ;;  %v1526_v61 = vpop.f32.mrf.mxu1 }
 0x137   : > { %v2217_v24 = vadd.f32 %v2051_v48, %v2047_v44  ;;  %v2052_v8 = vmul.f32 %v1526_v61, %v4459_v47  ;;  %v919_v16 = vpop.f32.mrf.mxu0  ;;  %4018 = vmatmul.mubr.msk.f32.gmra.mxu0 %vm513_vm0, %v481_v42 }
 0x138   : > { %v2209_v12 = vadd.f32 %v2050_v22, %v2046_v55  ;;  %v2053_v15 = vmul.f32 %v919_v16, %v4449_v33  ;;  %v1530_v18 = vpop.f32.mrf.mxu1  ;;  %4109 = vmatmul.mubr.msk.f32.gmra.mxu1 %vm513_vm0, %v481_v42  ;;  %1211 = vmatprep.mubr.f32.mxu0 %v6615_v1 }
 0x139   : > { %v2225_v30 = vadd.f32 %v2052_v8, %v2048_v41  ;;  %v2055_v28 = vmul.f32 %v1530_v18, %v4455_v45  ;;  %v921_v31 = vpop.f32.mrf.mxu0  ;;  %1822 = vmatprep.mubr.f32.mxu1 %v6615_v1  ;;  %v484_v18 = vld [vmem:[%s6601_s1 + $0x1f0] sm:$0xff] }
 0x13a   : > { %v5002_v32 = vadd.f32 %v2201_v58, %v2053_v15  ;;  %v2054_v17 = vmul.f32 %v921_v31, %v4443_v21  ;;  %v1532_v44 = vpop.f32.mrf.mxu1  ;;  %v483_v58 = vld [vmem:[%s6601_s1 + $0x1e8] sm:$0xff] }
 0x13b   : > { %v5005_v48 = vadd.f32 %v2217_v24, %v2055_v28  ;;  %v2056_v42 = vmul.f32 %v1532_v44, %v4445_v26  ;;  %v925_v51 = vpop.f32.mrf.mxu0  ;;  %4019 = vmatmul.mubr.msk.f32.gmra.mxu0 %vm513_vm0, %v482_v27 }
 0x13c   : > { %v5009_v55 = vadd.f32 %v2209_v12, %v2054_v17  ;;  %v1536_v22 = vpop.f32.mrf.mxu1  ;;  %4110 = vmatmul.mubr.msk.f32.gmra.mxu1 %vm513_vm0, %v482_v27  ;;  %1217 = vmatprep.mubr.f32.mxu0 %v6615_v1  ;;  %v2057_v16 = vmul.f32 %v925_v51, %v4497_v19 }
 0x13d   : > { %v5016_v61 = vadd.f32 %v2225_v30, %v2056_v42  ;;  %v927_v41 = vpop.f32.mrf.mxu0  ;;  %1828 = vmatprep.mubr.f32.mxu1 %v6615_v1  ;;  %v2059_v27 = vmul.f32 %v1536_v22, %v4502_v29 }
 0x13e   : > { %v1538_v24 = vpop.f32.mrf.mxu1  ;;  %v2058_v31 = vmul.f32 %v927_v41, %v4487_v3  ;;  %v485_v41 = vld [vmem:[%s6601_s1 + $0x1f8] sm:$0xff] }
 0x13f   : > { %v931_v8 = vpop.f32.mrf.mxu0  ;;  %4020 = vmatmul.mubr.msk.f32.gmra.mxu0 %vm513_vm0, %v483_v58  ;;  %v2060_v51 = vmul.f32 %v1538_v24, %v4489_v4 }
 0x140   : > { %v2061_v12 = vmul.f32 %v931_v8, %v4462_v36  ;;  %v1542_v15 = vpop.f32.mrf.mxu1  ;;  %4111 = vmatmul.mubr.msk.f32.gmra.mxu1 %vm513_vm0, %v483_v58  ;;  %1223 = vmatprep.mubr.f32.mxu0 %v6615_v1 }
 0x141   : > { %v2063_v30 = vmul.f32 %v1542_v15, %v4468_v38  ;;  %v933_v28 = vpop.f32.mrf.mxu0  ;;  %1834 = vmatprep.mubr.f32.mxu1 %v6615_v1 }
 0x142   : > { %v2233_v17 = vadd.f32 %v2061_v12, %v2057_v16  ;;  %v2062_v44 = vmul.f32 %v933_v28, %v4457_v46  ;;  %v1544_v42 = vpop.f32.mrf.mxu1 }
 0x143   : > { %v2249_v58 = vadd.f32 %v2063_v30, %v2059_v27  ;;  %v2064_v8 = vmul.f32 %v1544_v42, %v4459_v47  ;;  %v937_v0 = vpop.f32.mrf.mxu0  ;;  %4021 = vmatmul.mubr.msk.f32.gmra.mxu0 %vm513_vm0, %v484_v18 }
 0x144   : > { %v2241_v22 = vadd.f32 %v2062_v44, %v2058_v31  ;;  %v2065_v15 = vmul.f32 %v937_v0, %v4449_v33  ;;  %v1548_v2 = vpop.f32.mrf.mxu1  ;;  %4112 = vmatmul.mubr.msk.f32.gmra.mxu1 %vm513_vm0, %v484_v18  ;;  %1229 = vmatprep.mubr.f32.mxu0 %v6615_v1 }
 0x145   : > { %v2257_v16 = vadd.f32 %v2064_v8, %v2060_v51  ;;  %v2067_v24 = vmul.f32 %v1548_v2, %v4455_v45  ;;  %v939_v12 = vpop.f32.mrf.mxu0  ;;  %1840 = vmatprep.mubr.f32.mxu1 %v6615_v1  ;;  %v486_v2 = vld [vmem:[%s6601_s1 + $0x200] sm:$0xff] }
 0x146   : > { %v5043_v27 = vadd.f32 %v2233_v17, %v2065_v15  ;;  %v2066_v30 = vmul.f32 %v939_v12, %v4443_v21  ;;  %v1550_v0 = vpop.f32.mrf.mxu1 }
 0x147   : > { %v5046_v28 = vadd.f32 %v2249_v58, %v2067_v24  ;;  %v2068_v18 = vmul.f32 %v1550_v0, %v4445_v26  ;;  %v943_v31 = vpop.f32.mrf.mxu0  ;;  %4022 = vmatmul.mubr.msk.f32.gmra.mxu0 %vm513_vm0, %v485_v41 }
 0x148   : > { %6634 = vst [vmem:[#allocation6_spill] sm:$0xff] %v5043_v27  ;;  %v5050_v44 = vadd.f32 %v2241_v22, %v2066_v30  ;;  %v1554_v42 = vpop.f32.mrf.mxu1  ;;  %4113 = vmatmul.mubr.msk.f32.gmra.mxu1 %vm513_vm0, %v485_v41  ;;  %1235 = vmatprep.mubr.f32.mxu0 %v6615_v1  ;;  %v2069_v22 = vmul.f32 %v943_v31, %v4497_v19 }
 0x149   : > { %6635 = vst [vmem:[#allocation7_spill] sm:$0xff] %v5046_v28  ;;  %v5057_v17 = vadd.f32 %v2257_v16, %v2068_v18  ;;  %v945_v51 = vpop.f32.mrf.mxu0  ;;  %1846 = vmatprep.mubr.f32.mxu1 %v6615_v1  ;;  %v487_v16 = vld [vmem:[%s6601_s1 + $0x208] sm:$0xff]  ;;  %v2071_v24 = vmul.f32 %v1554_v42, %v4502_v29 }
 0x14a   : > { %6636 = vst [vmem:[#allocation8_spill] sm:$0xff] %v5050_v44  ;;  %v1556_v58 = vpop.f32.mrf.mxu1  ;;  %v2070_v0 = vmul.f32 %v945_v51, %v4487_v3  ;;  %v488_v51 = vld [vmem:[%s6601_s1 + $0x210] sm:$0xff] }
 0x14b   : > { %6637 = vst [vmem:[#allocation9_spill] sm:$0xff] %v5057_v17  ;;  %v949_v8 = vpop.f32.mrf.mxu0  ;;  %4023 = vmatmul.mubr.msk.f32.gmra.mxu0 %vm513_vm0, %v486_v2 }
 0x14c   : > { %v2073_v15 = vmul.f32 %v949_v8, %v4462_v36  ;;  %v1560_v41 = vpop.f32.mrf.mxu1  ;;  %4114 = vmatmul.mubr.msk.f32.gmra.mxu1 %vm513_vm0, %v486_v2  ;;  %1241 = vmatprep.mubr.f32.mxu0 %v6615_v1  ;;  %v2072_v2 = vmul.f32 %v1556_v58, %v4489_v4 }
 0x14d   : > { %v2075_v12 = vmul.f32 %v1560_v41, %v4468_v38  ;;  %v951_v30 = vpop.f32.mrf.mxu0  ;;  %1852 = vmatprep.mubr.f32.mxu1 %v6615_v1 }
 0x14e   : > { %v2265_v18 = vadd.f32 %v2073_v15, %v2069_v22  ;;  %v2074_v31 = vmul.f32 %v951_v30, %v4457_v46  ;;  %v1562_v8 = vpop.f32.mrf.mxu1 }
 0x14f   : > { %v2281_v17 = vadd.f32 %v2075_v12, %v2071_v24  ;;  %v2076_v44 = vmul.f32 %v1562_v8, %v4459_v47  ;;  %v955_v28 = vpop.f32.mrf.mxu0  ;;  %4024 = vmatmul.mubr.msk.f32.gmra.mxu0 %vm513_vm0, %v487_v16 }
 0x150   : > { %v2273_v42 = vadd.f32 %v2074_v31, %v2070_v0  ;;  %v2077_v41 = vmul.f32 %v955_v28, %v4449_v33  ;;  %v1566_v27 = vpop.f32.mrf.mxu1  ;;  %4115 = vmatmul.mubr.msk.f32.gmra.mxu1 %vm513_vm0, %v487_v16  ;;  %1247 = vmatprep.mubr.f32.mxu0 %v6615_v1 }
 0x151   : > { %v2289_v22 = vadd.f32 %v2076_v44, %v2072_v2  ;;  %v2079_v58 = vmul.f32 %v1566_v27, %v4455_v45  ;;  %v957_v15 = vpop.f32.mrf.mxu0  ;;  %1858 = vmatprep.mubr.f32.mxu1 %v6615_v1  ;;  %v489_v27 = vld [vmem:[%s6601_s1 + $0x218] sm:$0xff] }
 0x152   : > { %v5084_v24 = vadd.f32 %v2265_v18, %v2077_v41  ;;  %v2078_v12 = vmul.f32 %v957_v15, %v4443_v21  ;;  %v1568_v28 = vpop.f32.mrf.mxu1 }
 0x153   : > { %v5087_v30 = vadd.f32 %v2281_v17, %v2079_v58  ;;  %v2080_v16 = vmul.f32 %v1568_v28, %v4445_v26  ;;  %v961_v0 = vpop.f32.mrf.mxu0  ;;  %4025 = vmatmul.mubr.msk.f32.gmra.mxu0 %vm513_vm0, %v488_v51 }
 0x154   : > { %6638 = vst [vmem:[#allocation10_spill] sm:$0xff] %v5084_v24  ;;  %v5091_v31 = vadd.f32 %v2273_v42, %v2078_v12  ;;  %v1572_v44 = vpop.f32.mrf.mxu1  ;;  %4116 = vmatmul.mubr.msk.f32.gmra.mxu1 %vm513_vm0, %v488_v51  ;;  %1253 = vmatprep.mubr.f32.mxu0 %v6615_v1  ;;  %v2081_v42 = vmul.f32 %v961_v0, %v4497_v19 }
 0x155   : > { %6639 = vst [vmem:[#allocation11_spill] sm:$0xff] %v5087_v30  ;;  %v5098_v18 = vadd.f32 %v2289_v22, %v2080_v16  ;;  %v963_v17 = vpop.f32.mrf.mxu0  ;;  %1864 = vmatprep.mubr.f32.mxu1 %v6615_v1  ;;  %v490_v22 = vld [vmem:[%s6601_s1 + $0x220] sm:$0xff]  ;;  %v2083_v58 = vmul.f32 %v1572_v44, %v4502_v29 }
 0x156   : > { %6640 = vst [vmem:[#allocation12_spill] sm:$0xff] %v5091_v31  ;;  %v1574_v8 = vpop.f32.mrf.mxu1  ;;  %v2082_v28 = vmul.f32 %v963_v17, %v4487_v3  ;;  %v491_v17 = vld [vmem:[%s6601_s1 + $0x228] sm:$0xff] }
 0x157   : > { %6641 = vst [vmem:[#allocation13_spill] sm:$0xff] %v5098_v18  ;;  %v967_v2 = vpop.f32.mrf.mxu0  ;;  %4026 = vmatmul.mubr.msk.f32.gmra.mxu0 %vm513_vm0, %v489_v27 }
 0x158   : > { %v2085_v41 = vmul.f32 %v967_v2, %v4462_v36  ;;  %v1578_v51 = vpop.f32.mrf.mxu1  ;;  %4117 = vmatmul.mubr.msk.f32.gmra.mxu1 %vm513_vm0, %v489_v27  ;;  %1259 = vmatprep.mubr.f32.mxu0 %v6615_v1  ;;  %v2084_v27 = vmul.f32 %v1574_v8, %v4489_v4 }
 0x159   : > { %v2087_v15 = vmul.f32 %v1578_v51, %v4468_v38  ;;  %v969_v12 = vpop.f32.mrf.mxu0  ;;  %1870 = vmatprep.mubr.f32.mxu1 %v6615_v1 }
 0x15a   : > { %v2297_v16 = vadd.f32 %v2085_v41, %v2081_v42  ;;  %v2086_v0 = vmul.f32 %v969_v12, %v4457_v46  ;;  %v1580_v2 = vpop.f32.mrf.mxu1 }
 0x15b   : > { %v2313_v18 = vadd.f32 %v2087_v15, %v2083_v58  ;;  %v2088_v31 = vmul.f32 %v1580_v2, %v4459_v47  ;;  %v973_v30 = vpop.f32.mrf.mxu0  ;;  %4027 = vmatmul.mubr.msk.f32.gmra.mxu0 %vm513_vm0, %v490_v22 }
 0x15c   : > { %v2305_v44 = vadd.f32 %v2086_v0, %v2082_v28  ;;  %v2089_v51 = vmul.f32 %v973_v30, %v4449_v33  ;;  %v1584_v24 = vpop.f32.mrf.mxu1  ;;  %4118 = vmatmul.mubr.msk.f32.gmra.mxu1 %vm513_vm0, %v490_v22  ;;  %1265 = vmatprep.mubr.f32.mxu0 %v6615_v1 }
 0x15d   : > { %v2321_v42 = vadd.f32 %v2088_v31, %v2084_v27  ;;  %v2091_v8 = vmul.f32 %v1584_v24, %v4455_v45  ;;  %v975_v41 = vpop.f32.mrf.mxu0  ;;  %1876 = vmatprep.mubr.f32.mxu1 %v6615_v1  ;;  %v492_v24 = vld [vmem:[%s6601_s1 + $0x230] sm:$0xff] }
 0x15e   : > { %v5125_v58 = vadd.f32 %v2297_v16, %v2089_v51  ;;  %v2090_v15 = vmul.f32 %v975_v41, %v4443_v21  ;;  %v1586_v30 = vpop.f32.mrf.mxu1 }
 0x15f   : > { %v5128_v12 = vadd.f32 %v2313_v18, %v2091_v8  ;;  %v2092_v22 = vmul.f32 %v1586_v30, %v4445_v26  ;;  %v979_v28 = vpop.f32.mrf.mxu0  ;;  %4028 = vmatmul.mubr.msk.f32.gmra.mxu0 %vm513_vm0, %v491_v17 }
 0x160   : > { %v5132_v0 = vadd.f32 %v2305_v44, %v2090_v15  ;;  %v1590_v31 = vpop.f32.mrf.mxu1  ;;  %4119 = vmatmul.mubr.msk.f32.gmra.mxu1 %vm513_vm0, %v491_v17  ;;  %1271 = vmatprep.mubr.f32.mxu0 %v6615_v1  ;;  %v2093_v44 = vmul.f32 %v979_v28, %v4497_v19 }
 0x161   : > { %v5139_v16 = vadd.f32 %v2321_v42, %v2092_v22  ;;  %v981_v18 = vpop.f32.mrf.mxu0  ;;  %1882 = vmatprep.mubr.f32.mxu1 %v6615_v1  ;;  %v493_v42 = vld [vmem:[%s6601_s1 + $0x238] sm:$0xff]  ;;  %v2095_v8 = vmul.f32 %v1590_v31, %v4502_v29 }
 0x162   : > { %v1592_v2 = vpop.f32.mrf.mxu1  ;;  %v2094_v19 = vmul.f32 %v981_v18, %v4487_v3  ;;  %v2107_v3 = vrot.slane %v4879_v34, 4 }
 0x163   : > { %6642 = vst [vmem:[#allocation14_spill] sm:$0xff] %v5139_v16  ;;  %v985_v27 = vpop.f32.mrf.mxu0  ;;  %4029 = vmatmul.mubr.msk.f32.gmra.mxu0 %vm513_vm0, %v492_v24  ;;  %v2096_v28 = vmul.f32 %v1592_v2, %v4489_v4 }
 0x164   : > { %v2097_v51 = vmul.f32 %v985_v27, %v4462_v36  ;;  %v1596_v17 = vpop.f32.mrf.mxu1  ;;  %4120 = vmatmul.mubr.msk.f32.gmra.mxu1 %vm513_vm0, %v492_v24  ;;  %1277 = vmatprep.mubr.f32.mxu0 %v6615_v1 }
 0x165   : > { %v2099_v41 = vmul.f32 %v1596_v17, %v4468_v38  ;;  %v987_v15 = vpop.f32.mrf.mxu0  ;;  %1888 = vmatprep.mubr.f32.mxu1 %v6615_v1 }
 0x166   : > { %v2329_v30 = vadd.f32 %v2097_v51, %v2093_v44  ;;  %v2098_v36 = vmul.f32 %v987_v15, %v4457_v46  ;;  %v1598_v22 = vpop.f32.mrf.mxu1  ;;  %v494_v46 = vld [vmem:[%s6601_s1 + $0x240] sm:$0xff] }
 0x167   : > { %v2345_v24 = vadd.f32 %v2099_v41, %v2095_v8  ;;  %v2100_v27 = vmul.f32 %v1598_v22, %v4459_v47  ;;  %v991_v16 = vpop.f32.mrf.mxu0  ;;  %4030 = vmatmul.mubr.msk.f32.gmra.mxu0 %vm513_vm0, %v493_v42  ;;  %v2108_v41 = vadd.f32 %v2107_v3, %v4879_v34 }
 0x168   : > { %v2337_v29 = vadd.f32 %v2098_v36, %v2094_v19  ;;  %v2101_v38 = vmul.f32 %v991_v16, %v4449_v33  ;;  %v1602_v31 = vpop.f32.mrf.mxu1  ;;  %4121 = vmatmul.mubr.msk.f32.gmra.mxu1 %vm513_vm0, %v493_v42  ;;  %1283 = vmatprep.mubr.f32.mxu0 %v6615_v1  ;;  %v2123_v42 = vrot.slane %v4882_v50, 4  ;;  %v2115_v19 = vrot.slane %v4886_v39, 4 }
 0x169   : > { %v2353_v4 = vadd.f32 %v2100_v27, %v2096_v28  ;;  %v2103_v47 = vmul.f32 %v1602_v31, %v4455_v45  ;;  %v993_v18 = vpop.f32.mrf.mxu0  ;;  %1894 = vmatprep.mubr.f32.mxu1 %v6615_v1  ;;  %v2131_v36 = vrot.slane %v4893_v40, 4 }
 0x16a   : > { %v5167_v2 = vadd.f32 %v2329_v30, %v2101_v38  ;;  %v2102_v33 = vmul.f32 %v993_v18, %v4443_v21  ;;  %v1604_v16 = vpop.f32.mrf.mxu1  ;;  %v495_v21 = vld [vmem:[%s6601_s1 + $0x248] sm:$0xff]  ;;  %v2124_v28 = vadd.f32 %v2123_v42, %v4882_v50  ;;  %v2109_v38 = vrot.slane %v2108_v41, 2 }
 0x16b   : > { %v5170_v44 = vadd.f32 %v2345_v24, %v2103_v47  ;;  %v2104_v51 = vmul.f32 %v1604_v16, %v4445_v26  ;;  %v997_v17 = vpop.f32.mrf.mxu0  ;;  %4031 = vmatmul.mubr.msk.f32.gmra.mxu0 %vm513_vm0, %v494_v46  ;;  %v2116_v50 = vadd.f32 %v2115_v19, %v4886_v39  ;;  %v2132_v16 = vadd.f32 %v2131_v36, %v4893_v40  ;;  %v497_v40 = vld [vmem:[%s6601_s1 + $0x258] sm:$0xff] }
 0x16c   : > { %v5175_v8 = vadd.f32 %v2337_v29, %v2102_v33  ;;  %v1608_v45 = vpop.f32.mrf.mxu1  ;;  %4122 = vmatmul.mubr.msk.f32.gmra.mxu1 %vm513_vm0, %v494_v46  ;;  %1289 = vmatprep.mubr.f32.mxu0 %v6615_v1  ;;  %v2361_v24 = vmul.f32 %v997_v17, %v4422_v56  ;;  %v496_v29 = vld [vmem:[%s6601_s1 + $0x250] sm:$0xff] }
 0x16d   : > { %v5183_v15 = vadd.f32 %v2353_v4, %v2104_v51  ;;  %v999_v26 = vpop.f32.mrf.mxu0  ;;  %1900 = vmatprep.mubr.f32.mxu1 %v6615_v1  ;;  %v2363_v31 = vmul.f32 %v1608_v45, %v4428_v60 }
 0x16e   : > { %v1610_v30 = vpop.f32.mrf.mxu1  ;;  %v2362_v4 = vmul.f32 %v999_v26, %v4417_v53  ;;  %v2139_v26 = vrot.slane %v4920_v37, 4 }
 0x16f   : > { %v1003_v22 = vpop.f32.mrf.mxu0  ;;  %4032 = vmatmul.mubr.msk.f32.gmra.mxu0 %vm513_vm0, %v495_v21  ;;  %v2364_v51 = vmul.f32 %v1610_v30, %v4419_v54 }
 0x170   : > { %v2365_v27 = vmul.f32 %v1003_v22, %v4409_v49  ;;  %v1614_v34 = vpop.f32.mrf.mxu1  ;;  %4123 = vmatmul.mubr.msk.f32.gmra.mxu1 %vm513_vm0, %v495_v21  ;;  %1295 = vmatprep.mubr.f32.mxu0 %v6615_v1  ;;  %v2125_v21 = vrot.slane %v2124_v28, 2 }
 0x171   : > { %v2367_v46 = vmul.f32 %v1614_v34, %v4415_v52  ;;  %v1005_v3 = vpop.f32.mrf.mxu0  ;;  %1906 = vmatprep.mubr.f32.mxu1 %v6615_v1  ;;  %v2117_v34 = vrot.slane %v2116_v50, 2 }
 0x172   : > { %v2489_v47 = vadd.f32 %v2365_v27, %v2361_v24  ;;  %v2366_v18 = vmul.f32 %v1005_v3, %v4403_v35  ;;  %v1616_v33 = vpop.f32.mrf.mxu1  ;;  %v2110_v27 = vadd.f32 %v2109_v38, %v2108_v41  ;;  %v2133_v3 = vrot.slane %v2132_v16, 2  ;;  %v498_v38 = vld [vmem:[%s6601_s1 + $0x260] sm:$0xff] }
 0x173   : > { %v2507_v17 = vadd.f32 %v2367_v46, %v2363_v31  ;;  %v2368_v42 = vmul.f32 %v1616_v33, %v4405_v43  ;;  %v1009_v45 = vpop.f32.mrf.mxu0  ;;  %4033 = vmatmul.mubr.msk.f32.gmra.mxu0 %vm513_vm0, %v496_v29 }
 0x174   : > { %v2498_v22 = vadd.f32 %v2366_v18, %v2362_v4  ;;  %v2369_v39 = vmul.f32 %v1009_v45, %v4383_v14  ;;  %v1620_v19 = vpop.f32.mrf.mxu1  ;;  %4124 = vmatmul.mubr.msk.f32.gmra.mxu1 %vm513_vm0, %v496_v29  ;;  %1301 = vmatprep.mubr.f32.mxu0 %v6615_v1  ;;  %v2155_v4 = vrot.slane %v4923_v57, 4 }
 0x175   : > { %v2516_v30 = vadd.f32 %v2368_v42, %v2364_v51  ;;  %v2371_v36 = vmul.f32 %v1620_v19, %v4389_v20  ;;  %v1011_v24 = vpop.f32.mrf.mxu0  ;;  %1912 = vmatprep.mubr.f32.mxu1 %v6615_v1  ;;  %v5220_v51 = vadd.f32 %v2125_v21, %v2124_v28 }
 0x176   : > { %v2490_v31 = vadd.f32 %v2489_v47, %v2369_v39  ;;  %v2370_v46 = vmul.f32 %v1011_v24, %v4377_v10  ;;  %v1622_v29 = vpop.f32.mrf.mxu1  ;;  %v2140_v47 = vadd.f32 %v2139_v26, %v4920_v37  ;;  %v2156_v37 = vadd.f32 %v2155_v4, %v4923_v57  ;;  %v499_v57 = vld [vmem:[%s6601_s1 + $0x268] sm:$0xff] }
 0x177   : > { %v2508_v18 = vadd.f32 %v2507_v17, %v2371_v36  ;;  %v2372_v33 = vmul.f32 %v1622_v29, %v4379_v11  ;;  %v1015_v45 = vpop.f32.mrf.mxu0  ;;  %4034 = vmatmul.mubr.msk.f32.gmra.mxu0 %vm513_vm0, %v497_v40  ;;  %v2147_v17 = vrot.slane %v4927_v59, 4  ;;  %v5232_v36 = vadd.f32 %v2117_v34, %v2116_v50 }
 0x178   : > { %v2499_v42 = vadd.f32 %v2498_v22, %v2370_v46  ;;  %v2373_v19 = vmul.f32 %v1015_v45, %v4373_v7  ;;  %v1626_v41 = vpop.f32.mrf.mxu1  ;;  %4125 = vmatmul.mubr.msk.f32.gmra.mxu1 %vm513_vm0, %v497_v40  ;;  %1307 = vmatprep.mubr.f32.mxu0 %v6615_v1  ;;  %v2111_v22 = vrot.slane %v2110_v27, 1  ;;  %v5237_v29 = vadd.f32 %v2133_v3, %v2132_v16 }
 0x179   : > { %v2517_v39 = vadd.f32 %v2516_v30, %v2372_v33  ;;  %v2375_v28 = vmul.f32 %v1626_v41, %v4375_v9  ;;  %v1017_v21 = vpop.f32.mrf.mxu0  ;;  %1918 = vmatprep.mubr.f32.mxu1 %v6615_v1  ;;  %v2163_v45 = vrot.slane %v4934_v62, 4  ;;  %v2141_v16 = vrot.slane %v2140_v47, 2 }
 0x17a   : > { %v5234_v40 = vadd.f32 %v2490_v31, %v2373_v19  ;;  %v2374_v24 = vmul.f32 %v1017_v21, %v4369_v5  ;;  %v1628_v46 = vpop.f32.mrf.mxu1  ;;  %v2148_v31 = vadd.f32 %v2147_v17, %v4927_v59  ;;  %v5257_v19 = vadd.f32 %v2111_v22, %v2110_v27  ;;  %v500_v27 = vld [vmem:[%s6601_s1 + $0x270] sm:$0xff] }
 0x17b   : > { %v5240_v26 = vadd.f32 %v2508_v18, %v2375_v28  ;;  %v2376_v30 = vmul.f32 %v1628_v46, %v4371_v6  ;;  %v1021_v33 = vpop.f32.mrf.mxu0  ;;  %4035 = vmatmul.mubr.msk.f32.gmra.mxu0 %vm513_vm0, %v498_v38  ;;  %v2157_v28 = vrot.slane %v2156_v37, 2  ;;  %v2164_v59 = vadd.f32 %v2163_v45, %v4934_v62 }
 0x17c   : > { %6643 = vst [vmem:[#allocation15_spill] sm:$0xff] %v5234_v40  ;;  %v5245_v50 = vadd.f32 %v2499_v42, %v2374_v24  ;;  %v1632_v34 = vpop.f32.mrf.mxu1  ;;  %4126 = vmatmul.mubr.msk.f32.gmra.mxu1 %vm513_vm0, %v498_v38  ;;  %1313 = vmatprep.mubr.f32.mxu0 %v6615_v1  ;;  %6647 = vst [vmem:[#allocation19_spill] sm:$0xff] %v5257_v19  ;;  %v2171_v17 = vrot.slane %v4961_v63, 4  ;;  %v5271_v22 = vadd.f32 %v2141_v16, %v2140_v47 }
 0x17d   : > { %6644 = vst [vmem:[#allocation16_spill] sm:$0xff] %v5240_v26  ;;  %v5253_v3 = vadd.f32 %v2517_v39, %v2376_v30  ;;  %v1023_v4 = vpop.f32.mrf.mxu0  ;;  %1924 = vmatprep.mubr.f32.mxu1 %v6615_v1  ;;  %v2377_v39 = vmul.f32 %v1021_v33, %v4422_v56  ;;  %v2149_v30 = vrot.slane %v2148_v31, 2  ;;  %v2379_v62 = vmul.f32 %v1632_v34, %v4428_v60 }
 0x17e   : > { %6645 = vst [vmem:[#allocation17_spill] sm:$0xff] %v5245_v50  ;;  %v1634_v42 = vpop.f32.mrf.mxu1  ;;  %v2187_v33 = vrot.slane %v4964_v13, 4  ;;  %v5279_v19 = vadd.f32 %v2157_v28, %v2156_v37  ;;  %v6648_v37 = vmov 0.0  }
 0x17f   : > { %6646 = vst [vmem:[#allocation18_spill] sm:$0xff] %v5253_v3  ;;  %v1027_v21 = vpop.f32.mrf.mxu0  ;;  %4036 = vmatmul.mubr.msk.f32.gmra.mxu0 %vm513_vm0, %v499_v57  ;;  %v2380_v47 = vmul.f32 %v1634_v42, %v4419_v54  ;;  %v501_v42 = vld [vmem:[%s6601_s1 + $0x278] sm:$0xff] }
 0x180   : > { %v2381_v24 = vmul.f32 %v1027_v21, %v4409_v49  ;;  %v1638_v46 = vpop.f32.mrf.mxu1  ;;  %4127 = vmatmul.mubr.msk.f32.gmra.mxu1 %vm513_vm0, %v499_v57  ;;  %1319 = vmatprep.mubr.f32.mxu0 %v6615_v1  ;;  %v2378_v57 = vmul.f32 %v1023_v4, %v4417_v53 }
 0x181   : > { %v2383_v45 = vmul.f32 %v1638_v46, %v4415_v52  ;;  %v1029_v38 = vpop.f32.mrf.mxu0  ;;  %1930 = vmatprep.mubr.f32.mxu1 %v6615_v1  ;;  %v2172_v46 = vadd.f32 %v2171_v17, %v4961_v63  ;;  %v2179_v1 = vrot.slane %v4968_v23, 4 }
 0x182   : > { %v2525_v21 = vadd.f32 %v2381_v24, %v2377_v39  ;;  %v2382_v41 = vmul.f32 %v1029_v38, %v4403_v35  ;;  %v1640_v18 = vpop.f32.mrf.mxu1  ;;  %v2165_v38 = vrot.slane %v2164_v59, 2 }
 0x183   : > { %v2543_v16 = vadd.f32 %v2383_v45, %v2379_v62  ;;  %v2384_v34 = vmul.f32 %v1640_v18, %v4405_v43  ;;  %v1033_v3 = vpop.f32.mrf.mxu0  ;;  %4037 = vmatmul.mubr.msk.f32.gmra.mxu0 %vm513_vm0, %v500_v27  ;;  %v2143_v18 = vrot.slane %v5271_v22, 1  ;;  %v2159_v45 = vrot.slane %v5279_v19, 1 }
 0x184   : > { %v2534_v50 = vadd.f32 %v2382_v41, %v2378_v57  ;;  %v2385_v4 = vmul.f32 %v1033_v3, %v4383_v14  ;;  %v1644_v39 = vpop.f32.mrf.mxu1  ;;  %4128 = vmatmul.mubr.msk.f32.gmra.mxu1 %vm513_vm0, %v500_v27  ;;  %1325 = vmatprep.mubr.f32.mxu0 %v6648_v37  ;;  %v2150_v41 = vadd.f32 %v2149_v30, %v2148_v31  ;;  %v2195_v57 = vrot.slane %v4975_v25, 4 }
 0x185   : > { %v2552_v28 = vadd.f32 %v2384_v34, %v2380_v47  ;;  %v2387_v63 = vmul.f32 %v1644_v39, %v4389_v20  ;;  %v1035_v17 = vpop.f32.mrf.mxu0  ;;  %1936 = vmatprep.mubr.f32.mxu1 %v6648_v37  ;;  %v2188_v3 = vadd.f32 %v2187_v33, %v4964_v13  ;;  %v2173_v34 = vrot.slane %v2172_v46, 2  ;;  %v502_v33 = vld [vmem:[%s6601_s1 + $0x280] sm:$0xff] }
 0x186   : > { %v2526_v24 = vadd.f32 %v2525_v21, %v2385_v4  ;;  %v2386_v27 = vmul.f32 %v1035_v17, %v4377_v10  ;;  %v1646_v62 = vpop.f32.mrf.mxu1  ;;  %v2180_v39 = vadd.f32 %v2179_v1, %v4968_v23  ;;  %v5308_v21 = vadd.f32 %v2165_v38, %v2164_v59 }
 0x187   : > { %v2544_v26 = vadd.f32 %v2543_v16, %v2387_v63  ;;  %v2388_v40 = vmul.f32 %v1646_v62, %v4379_v11  ;;  %v1039_v47 = vpop.f32.mrf.mxu0  ;;  %4038 = vmatmul.mubr.msk.f32.gmra.mxu0 %vm513_vm0, %v501_v42  ;;  %v2203_v16 = vrot.slane %v5002_v32, 4  ;;  %v2151_v23 = vrot.slane %v2150_v41, 1 }
 0x188   : > { %v2535_v31 = vadd.f32 %v2534_v50, %v2386_v27  ;;  %v2389_v13 = vmul.f32 %v1039_v47, %v4373_v7  ;;  %v1650_v30 = vpop.f32.mrf.mxu1  ;;  %4129 = vmatmul.mubr.msk.f32.gmra.mxu1 %vm513_vm0, %v501_v42  ;;  %1331 = vmatprep.mubr.f32.mxu0 %v6648_v37  ;;  %v2189_v50 = vrot.slane %v2188_v3, 2  ;;  %v2196_v62 = vadd.f32 %v2195_v57, %v4975_v25 }
 0x189   : > { %v2553_v4 = vadd.f32 %v2552_v28, %v2388_v40  ;;  %v2391_v63 = vmul.f32 %v1650_v30, %v4375_v9  ;;  %v1041_v1 = vpop.f32.mrf.mxu0  ;;  %1942 = vmatprep.mubr.f32.mxu1 %v6648_v37  ;;  %v2219_v59 = vrot.slane %v5005_v48, 4  ;;  %v6649_v47 = vrot.slane %v5220_v51, 1 }
 0x18a   : > { %v5313_v17 = vadd.f32 %v2526_v24, %v2389_v13  ;;  %v2390_v42 = vmul.f32 %v1041_v1, %v4369_v5  ;;  %v1652_v27 = vpop.f32.mrf.mxu1  ;;  %v5327_v24 = vadd.f32 %v2173_v34, %v2172_v46  ;;  %v2181_v13 = vrot.slane %v2180_v39, 2 }
 0x18b   : > { %v5318_v38 = vadd.f32 %v2544_v26, %v2391_v63  ;;  %v2392_v40 = vmul.f32 %v1652_v27, %v4371_v6  ;;  %v1045_v28 = vpop.f32.mrf.mxu0  ;;  %4039 = vmatmul.mubr.msk.f32.gmra.mxu0 %vm513_vm0, %v502_v33  ;;  %v5325_v30 = vadd.f32 %v6649_v47, %v5220_v51  ;;  %v503_v26 = vld [vmem:[%s6601_s1 + $0x288] sm:$0xff]  ;;  %v6652_v57 = vrot.slane %v5232_v36, 1 }
 0x18c   : > { %v5329_v1 = vadd.f32 %v2535_v31, %v2390_v42  ;;  %v1656_v25 = vpop.f32.mrf.mxu1  ;;  %4130 = vmatmul.mubr.msk.f32.gmra.mxu1 %vm513_vm0, %v502_v33  ;;  %1337 = vmatprep.mubr.f32.mxu0 %v6648_v37  ;;  %v6654_v51 = vrot.slane %v5237_v29, 1  ;;  %v2204_v34 = vadd.f32 %v2203_v16, %v5002_v32  ;;  %v5351_v42 = vadd.f32 %v2143_v18, %v5271_v22 }
 0x18d   : > { %6650 = vst [vmem:[#allocation20_spill] sm:$0xff] %v5325_v30  ;;  %v5339_v63 = vadd.f32 %v6652_v57, %v5232_v36  ;;  %v5347_v31 = vadd.f32 %v2553_v4, %v2392_v40  ;;  %v1047_v33 = vpop.f32.mrf.mxu0  ;;  %1948 = vmatprep.mubr.f32.mxu1 %v6648_v37  ;;  %v5354_v27 = vadd.f32 %v2159_v45, %v5279_v19  ;;  %v2211_v47 = vrot.slane %v5009_v55, 4 }
 0x18e   : > { %6651 = vst [vmem:[#allocation21_spill] sm:$0xff] %v5329_v1  ;;  %v5344_v46 = vadd.f32 %v6654_v51, %v5237_v29  ;;  %6657 = vst [vmem:[#allocation25_spill] sm:$0xff] %v5351_v42  ;;  %v1658_v57 = vpop.f32.mrf.mxu1  ;;  %v5358_v29 = vadd.f32 %v2151_v23, %v2150_v41  ;;  %v5360_v51 = vadd.f32 %v2189_v50, %v2188_v3  ;;  %v2197_v32 = vrot.slane %v2196_v62, 2 }
 0x18f   : > { %6653 = vst [vmem:[#allocation22_spill] sm:$0xff] %v5339_v63  ;;  %6656 = vst [vmem:[#allocation24_spill] sm:$0xff] %v5347_v31  ;;  %v2220_v16 = vadd.f32 %v2219_v59, %v5005_v48  ;;  %v1051_v4 = vpop.f32.mrf.mxu0  ;;  %4040 = vmatmul.mubr.msk.f32.gmra.mxu0 %vm513_vm0, %v503_v26  ;;  %v5365_v18 = vadd.f32 %v2181_v13, %v2180_v39  ;;  %v2393_v19 = vmul.f32 %v1045_v28, %v4422_v56  ;;  %v504_v48 = vld [vmem:[%s6601_s1 + $0x290] sm:$0xff] }
 0x190   : > { %6655 = vst [vmem:[#allocation23_spill] sm:$0xff] %v5344_v46  ;;  %6658 = vst [vmem:[#allocation26_spill] sm:$0xff] %v5354_v27  ;;  %v2397_v45 = vmul.f32 %v1051_v4, %v4409_v49  ;;  %v1662_v40 = vpop.f32.mrf.mxu1  ;;  %4131 = vmatmul.mubr.msk.f32.gmra.mxu1 %vm513_vm0, %v503_v26  ;;  %1343 = vmatprep.mubr.f32.mxu0 %v6648_v37  ;;  %v2205_v41 = vrot.slane %v2204_v34, 2  ;;  %v2227_v3 = vrot.slane %v5016_v61, 4 }
 0x191   : > { %6659 = vst [vmem:[#allocation27_spill] sm:$0xff] %v5358_v29  ;;  %v2395_v23 = vmul.f32 %v1656_v25, %v4428_v60  ;;  %v2399_v39 = vmul.f32 %v1662_v40, %v4415_v52  ;;  %v1053_v50 = vpop.f32.mrf.mxu0  ;;  %1954 = vmatprep.mubr.f32.mxu1 %v6648_v37  ;;  %v2212_v59 = vadd.f32 %v2211_v47, %v5009_v55  ;;  %v2221_v22 = vrot.slane %v2220_v16, 2 }
 0x192   : > { %v2394_v28 = vmul.f32 %v1047_v33, %v4417_v53  ;;  %v2561_v13 = vadd.f32 %v2397_v45, %v2393_v19  ;;  %v2398_v26 = vmul.f32 %v1053_v50, %v4403_v35  ;;  %v1664_v4 = vpop.f32.mrf.mxu1  ;;  %v2396_v36 = vmul.f32 %v1658_v57, %v4419_v54  ;;  %v505_v57 = vld [vmem:[%s6601_s1 + $0x298] sm:$0xff]  ;;  %v6660_v45 = vld [vmem:[#allocation6_spill] sm:$0xff] }
 0x193   : > { %v2579_v46 = vadd.f32 %v2399_v39, %v2395_v23  ;;  %v2400_v29 = vmul.f32 %v1664_v4, %v4405_v43  ;;  %v1057_v25 = vpop.f32.mrf.mxu0  ;;  %4041 = vmatmul.mubr.msk.f32.gmra.mxu0 %vm513_vm0, %v504_v48  ;;  %v5385_v63 = vadd.f32 %v2197_v32, %v2196_v62  ;;  %v5394_v19 = vadd.f32 %v2227_v3, %v5016_v61 }
 0x194   : > { %v2570_v55 = vadd.f32 %v2398_v26, %v2394_v28  ;;  %v2401_v33 = vmul.f32 %v1057_v25, %v4383_v14  ;;  %v1668_v47 = vpop.f32.mrf.mxu1  ;;  %4132 = vmatmul.mubr.msk.f32.gmra.mxu1 %vm513_vm0, %v504_v48  ;;  %1349 = vmatprep.mubr.f32.mxu0 %v6648_v37  ;;  %v2235_v23 = vrot.slane %v6660_v45, 4  ;;  %v2183_v50 = vrot.slane %v5365_v18, 1 }
 0x195   : > { %v2588_v39 = vadd.f32 %v2400_v29, %v2396_v36  ;;  %v2403_v62 = vmul.f32 %v1668_v47, %v4389_v20  ;;  %v1059_v32 = vpop.f32.mrf.mxu0  ;;  %1960 = vmatprep.mubr.f32.mxu1 %v6648_v37  ;;  %v2206_v48 = vadd.f32 %v2205_v41, %v2204_v34  ;;  %v2222_v25 = vadd.f32 %v2221_v22, %v2220_v16  ;;  %v6661_v29 = vld [vmem:[#allocation7_spill] sm:$0xff] }
 0x196   : > { %v2562_v28 = vadd.f32 %v2561_v13, %v2401_v33  ;;  %v2402_v26 = vmul.f32 %v1059_v32, %v4377_v10  ;;  %v1670_v4 = vpop.f32.mrf.mxu1  ;;  %v2213_v40 = vrot.slane %v2212_v59, 2  ;;  %v2199_v36 = vrot.slane %v5385_v63, 1 }
 0x197   : > { %v2580_v27 = vadd.f32 %v2579_v46, %v2403_v62  ;;  %v2404_v61 = vmul.f32 %v1670_v4, %v4379_v11  ;;  %v1063_v3 = vpop.f32.mrf.mxu0  ;;  %4042 = vmatmul.mubr.msk.f32.gmra.mxu0 %vm513_vm0, %v505_v57  ;;  %v2251_v47 = vrot.slane %v6661_v29, 4  ;;  %v506_v46 = vld [vmem:[%s6601_s1 + $0x2a0] sm:$0xff]  ;;  %v2229_v16 = vrot.slane %v5394_v19, 2 }
 0x198   : > { %v2571_v30 = vadd.f32 %v2570_v55, %v2402_v26  ;;  %v2405_v42 = vmul.f32 %v1063_v3, %v4373_v7  ;;  %v1674_v34 = vpop.f32.mrf.mxu1  ;;  %4133 = vmatmul.mubr.msk.f32.gmra.mxu1 %vm513_vm0, %v505_v57  ;;  %1355 = vmatprep.mubr.f32.mxu0 %v6648_v37  ;;  %v2236_v22 = vadd.f32 %v2235_v23, %v6660_v45  ;;  %v2207_v55 = vrot.slane %v2206_v48, 1  ;;  %v6662_v62 = vld [vmem:[#allocation8_spill] sm:$0xff] }
 0x199   : > { %v2589_v41 = vadd.f32 %v2588_v39, %v2404_v61  ;;  %v2407_v13 = vmul.f32 %v1674_v34, %v4375_v9  ;;  %v1065_v33 = vpop.f32.mrf.mxu0  ;;  %1966 = vmatprep.mubr.f32.mxu1 %v6648_v37  ;;  %v2243_v32 = vrot.slane %v6662_v62, 4  ;;  %v2223_v3 = vrot.slane %v2222_v25, 1 }
 0x19a   : > { %v5416_v57 = vadd.f32 %v2562_v28, %v2405_v42  ;;  %v2406_v26 = vmul.f32 %v1065_v33, %v4369_v5  ;;  %v1676_v4 = vpop.f32.mrf.mxu1  ;;  %v5419_v31 = vadd.f32 %v2213_v40, %v2212_v59  ;;  %v6664_v39 = vrot.slane %v5308_v21, 1 }
 0x19b   : > { %v5421_v1 = vadd.f32 %v2580_v27, %v2407_v13  ;;  %v2408_v45 = vmul.f32 %v1676_v4, %v4371_v6  ;;  %v1069_v23 = vpop.f32.mrf.mxu0  ;;  %4043 = vmatmul.mubr.msk.f32.gmra.mxu0 %vm513_vm0, %v506_v46  ;;  %v2252_v42 = vadd.f32 %v2251_v47, %v6661_v29  ;;  %v507_v27 = vld [vmem:[%s6601_s1 + $0x2a8] sm:$0xff]  ;;  %v6667_v59 = vrot.slane %v5327_v24, 1 }
 0x19c   : > { %v5428_v61 = vadd.f32 %v6664_v39, %v5308_v21  ;;  %v5431_v28 = vadd.f32 %v2571_v30, %v2406_v26  ;;  %v1680_v34 = vpop.f32.mrf.mxu1  ;;  %4134 = vmatmul.mubr.msk.f32.gmra.mxu1 %vm513_vm0, %v506_v46  ;;  %1361 = vmatprep.mubr.f32.mxu0 %v6648_v37  ;;  %v2237_v21 = vrot.slane %v2236_v22, 2  ;;  %v6669_v13 = vld [vmem:[#allocation9_spill] sm:$0xff]  ;;  %v6671_v47 = vrot.slane %v5360_v51, 1 }
 0x19d   : > { %6663 = vst [vmem:[#allocation6_spill] sm:$0xff] %v5421_v1  ;;  %v5441_v40 = vadd.f32 %v6667_v59, %v5327_v24  ;;  %v2259_v33 = vrot.slane %v6669_v13, 4  ;;  %v5444_v29 = vadd.f32 %v2589_v41, %v2408_v45  ;;  %v1071_v30 = vpop.f32.mrf.mxu0  ;;  %1972 = vmatprep.mubr.f32.mxu1 %v6648_v37  ;;  %v5453_v26 = vadd.f32 %v2183_v50, %v5365_v18  ;;  %v6677_v50 = vld [vmem:[#allocation10_spill] sm:$0xff] }
 0x19e   : > { %6665 = vst [vmem:[#allocation7_spill] sm:$0xff] %v5428_v61  ;;  %6666 = vst [vmem:[#allocation8_spill] sm:$0xff] %v5431_v28  ;;  %v5450_v46 = vadd.f32 %v6671_v47, %v5360_v51  ;;  %v5456_v4 = vadd.f32 %v2199_v36, %v5385_v63  ;;  %v2244_v24 = vadd.f32 %v2243_v32, %v6662_v62  ;;  %v1682_v39 = vpop.f32.mrf.mxu1  ;;  %v2253_v18 = vrot.slane %v2252_v42, 2 }
 0x19f   : > { %6668 = vst [vmem:[#allocation28_spill] sm:$0xff] %v5441_v40  ;;  %6670 = vst [vmem:[#allocation9_spill] sm:$0xff] %v5444_v29  ;;  %v5459_v59 = vadd.f32 %v2207_v55, %v2206_v48  ;;  %v5461_v41 = vadd.f32 %v2223_v3, %v2222_v25  ;;  %v5465_v61 = vadd.f32 %v2229_v16, %v5394_v19  ;;  %v1075_v51 = vpop.f32.mrf.mxu0  ;;  %4044 = vmatmul.mubr.msk.f32.gmra.mxu0 %vm513_vm0, %v507_v27  ;;  %v508_v19 = vld [vmem:[%s6601_s1 + $0x2b0] sm:$0xff] }
 0x1a0   : > { %6672 = vst [vmem:[#allocation29_spill] sm:$0xff] %v5450_v46  ;;  %6673 = vst [vmem:[#allocation30_spill] sm:$0xff] %v5453_v26  ;;  %v2267_v47 = vrot.slane %v6677_v50, 4  ;;  %v2409_v63 = vmul.f32 %v1069_v23, %v4422_v56  ;;  %v2413_v36 = vmul.f32 %v1075_v51, %v4409_v49  ;;  %v1686_v62 = vpop.f32.mrf.mxu1  ;;  %4135 = vmatmul.mubr.msk.f32.gmra.mxu1 %vm513_vm0, %v507_v27  ;;  %1367 = vmatprep.mubr.f32.mxu0 %v6648_v37 }
 0x1a1   : > { %6674 = vst [vmem:[#allocation31_spill] sm:$0xff] %v5456_v4  ;;  %6675 = vst [vmem:[#allocation32_spill] sm:$0xff] %v5459_v59  ;;  %v5476_v48 = vadd.f32 %v2237_v21, %v2236_v22  ;;  %v2260_v25 = vadd.f32 %v2259_v33, %v6669_v13  ;;  %v2411_v16 = vmul.f32 %v1680_v34, %v4428_v60  ;;  %v1077_v32 = vpop.f32.mrf.mxu0  ;;  %1978 = vmatprep.mubr.f32.mxu1 %v6648_v37  ;;  %v6678_v4 = vld [vmem:[#allocation11_spill] sm:$0xff] }
 0x1a2   : > { %6676 = vst [vmem:[#allocation33_spill] sm:$0xff] %v5461_v41  ;;  %v2415_v55 = vmul.f32 %v1686_v62, %v4415_v52  ;;  %v2245_v3 = vrot.slane %v2244_v24, 2  ;;  %v2410_v23 = vmul.f32 %v1071_v30, %v4417_v53  ;;  %v2597_v27 = vadd.f32 %v2413_v36, %v2409_v63  ;;  %v1688_v45 = vpop.f32.mrf.mxu1 }
 0x1a3   : > { %v2414_v51 = vmul.f32 %v1077_v32, %v4403_v35  ;;  %v2283_v26 = vrot.slane %v6678_v4, 4  ;;  %v2412_v22 = vmul.f32 %v1682_v39, %v4419_v54  ;;  %v2416_v13 = vmul.f32 %v1688_v45, %v4405_v43  ;;  %v1081_v34 = vpop.f32.mrf.mxu0  ;;  %4045 = vmatmul.mubr.msk.f32.gmra.mxu0 %vm513_vm0, %v508_v19  ;;  %v509_v39 = vld [vmem:[%s6601_s1 + $0x2b8] sm:$0xff] }
 0x1a4   : > { %v2615_v21 = vadd.f32 %v2415_v55, %v2411_v16  ;;  %v2231_v33 = vrot.slane %v5465_v61, 1  ;;  %v2268_v62 = vadd.f32 %v2267_v47, %v6677_v50  ;;  %v2417_v30 = vmul.f32 %v1081_v34, %v4383_v14  ;;  %v1692_v63 = vpop.f32.mrf.mxu1  ;;  %4136 = vmatmul.mubr.msk.f32.gmra.mxu1 %vm513_vm0, %v508_v19  ;;  %1373 = vmatprep.mubr.f32.mxu0 %v6648_v37  ;;  %v6679_v47 = vld [vmem:[#allocation12_spill] sm:$0xff] }
 0x1a5   : > { %v2606_v41 = vadd.f32 %v2414_v51, %v2410_v23  ;;  %v2254_v45 = vadd.f32 %v2253_v18, %v2252_v42  ;;  %v2261_v36 = vrot.slane %v2260_v25, 2  ;;  %v2624_v16 = vadd.f32 %v2416_v13, %v2412_v22  ;;  %v1083_v32 = vpop.f32.mrf.mxu0  ;;  %1984 = vmatprep.mubr.f32.mxu1 %v6648_v37 }
 0x1a6   : > { %v2419_v55 = vmul.f32 %v1692_v63, %v4389_v20  ;;  %v2239_v50 = vrot.slane %v5476_v48, 1  ;;  %v2275_v23 = vrot.slane %v6679_v47, 4  ;;  %v2598_v51 = vadd.f32 %v2597_v27, %v2417_v30  ;;  %v1694_v34 = vpop.f32.mrf.mxu1  ;;  %v6680_v63 = vld [vmem:[#allocation13_spill] sm:$0xff] }
 0x1a7   : > { %v2418_v19 = vmul.f32 %v1083_v32, %v4377_v10  ;;  %v5501_v46 = vadd.f32 %v2245_v3, %v2244_v24  ;;  %v2284_v59 = vadd.f32 %v2283_v26, %v6678_v4  ;;  %v2420_v18 = vmul.f32 %v1694_v34, %v4379_v11  ;;  %v1087_v22 = vpop.f32.mrf.mxu0  ;;  %4046 = vmatmul.mubr.msk.f32.gmra.mxu0 %vm513_vm0, %v509_v39  ;;  %v510_v26 = vld [vmem:[%s6601_s1 + $0x2c0] sm:$0xff] }
 0x1a8   : > { %v2616_v42 = vadd.f32 %v2615_v21, %v2419_v55  ;;  %v2269_v13 = vrot.slane %v2268_v62, 2  ;;  %v2291_v40 = vrot.slane %v6680_v63, 4  ;;  %v2421_v28 = vmul.f32 %v1087_v22, %v4373_v7  ;;  %v1698_v27 = vpop.f32.mrf.mxu1  ;;  %4137 = vmatmul.mubr.msk.f32.gmra.mxu1 %vm513_vm0, %v509_v39  ;;  %1379 = vmatprep.mubr.f32.mxu0 %v6648_v37 }
 0x1a9   : > { %v2607_v29 = vadd.f32 %v2606_v41, %v2418_v19  ;;  %v2255_v4 = vrot.slane %v2254_v45, 1  ;;  %v2299_v24 = vrot.slane %v5125_v58, 4  ;;  %v2625_v3 = vadd.f32 %v2624_v16, %v2420_v18  ;;  %v1089_v30 = vpop.f32.mrf.mxu0  ;;  %1990 = vmatprep.mubr.f32.mxu1 %v6648_v37 }
 0x1aa   : > { %v2423_v21 = vmul.f32 %v1698_v27, %v4375_v9  ;;  %v5516_v41 = vadd.f32 %v2261_v36, %v2260_v25  ;;  %v2276_v55 = vadd.f32 %v2275_v23, %v6679_v47  ;;  %v5519_v39 = vadd.f32 %v2598_v51, %v2421_v28  ;;  %v1700_v19 = vpop.f32.mrf.mxu1  ;;  %v511_v47 = vld [vmem:[%s6601_s1 + $0x2c8] sm:$0xff] }
 0x1ab   : > { %v2422_v32 = vmul.f32 %v1089_v30, %v4369_v5  ;;  %v2285_v34 = vrot.slane %v2284_v59, 2  ;;  %v2315_v22 = vrot.slane %v5128_v12, 4  ;;  %v2424_v16 = vmul.f32 %v1700_v19, %v4371_v6  ;;  %v1093_v18 = vpop.f32.mrf.mxu0  ;;  %4047 = vmatmul.mubr.msk.f32.gmra.mxu0 %vm513_vm0, %v510_v26 }
 0x1ac   : > { %v5523_v1 = vadd.f32 %v2616_v42, %v2423_v21  ;;  %v5527_v27 = vadd.f32 %v2269_v13, %v2268_v62  ;;  %v2292_v25 = vadd.f32 %v2291_v40, %v6680_v63  ;;  %v1704_v28 = vpop.f32.mrf.mxu1  ;;  %4138 = vmatmul.mubr.msk.f32.gmra.mxu1 %vm513_vm0, %v510_v26  ;;  %1385 = vmatprep.mubr.f32.mxu0 %v6648_v37  ;;  %v6681_v23 = vrot.slane %v5419_v31, 1 }
 0x1ad   : > { %v5530_v36 = vadd.f32 %v2607_v29, %v2422_v32  ;;  %v5543_v62 = vadd.f32 %v2231_v33, %v5465_v61  ;;  %v2300_v40 = vadd.f32 %v2299_v24, %v5125_v58  ;;  %v5546_v29 = vadd.f32 %v2625_v3, %v2424_v16  ;;  %v1095_v42 = vpop.f32.mrf.mxu0  ;;  %1996 = vmatprep.mubr.f32.mxu1 %v6648_v37  ;;  %v6686_v32 = vld [vmem:[#allocation14_spill] sm:$0xff] }
 0x1ae   : > { %v5540_v51 = vadd.f32 %v6681_v23, %v5419_v31  ;;  %v5550_v13 = vadd.f32 %v2239_v50, %v5476_v48  ;;  %v5552_v63 = vadd.f32 %v2255_v4, %v2254_v45  ;;  %v2307_v31 = vrot.slane %v5132_v0, 4  ;;  %v1706_v21 = vpop.f32.mrf.mxu1 }
 0x1af   : > { %6683 = vst [vmem:[#allocation11_spill] sm:$0xff] %v5543_v62  ;;  %v5557_v33 = vadd.f32 %v2285_v34, %v2284_v59  ;;  %v2277_v58 = vrot.slane %v2276_v55, 2  ;;  %v2316_v24 = vadd.f32 %v2315_v22, %v5128_v12  ;;  %v1099_v3 = vpop.f32.mrf.mxu0  ;;  %4048 = vmatmul.mubr.msk.f32.gmra.mxu0 %vm513_vm0, %v511_v47  ;;  %v2293_v50 = vrot.slane %v2292_v25, 2  ;;  %v512_v59 = vld [vmem:[%s6601_s1 + $0x2d0] sm:$0xff] }
 0x1b0   : > { %6682 = vst [vmem:[#allocation10_spill] sm:$0xff] %v5540_v51  ;;  %6684 = vst [vmem:[#allocation12_spill] sm:$0xff] %v5550_v13  ;;  %v2425_v45 = vmul.f32 %v1093_v18, %v4422_v56  ;;  %v2429_v4 = vmul.f32 %v1099_v3, %v4409_v49  ;;  %v1710_v30 = vpop.f32.mrf.mxu1  ;;  %4139 = vmatmul.mubr.msk.f32.gmra.mxu1 %vm513_vm0, %v511_v47  ;;  %1391 = vmatprep.mubr.f32.mxu0 %v6648_v37  ;;  %v2301_v12 = vrot.slane %v2300_v40, 2 }
 0x1b1   : > { %6685 = vst [vmem:[#allocation13_spill] sm:$0xff] %v5552_v63  ;;  %v2323_v19 = vrot.slane %v6686_v32, 4  ;;  %v2427_v34 = vmul.f32 %v1704_v28, %v4428_v60  ;;  %v2431_v22 = vmul.f32 %v1710_v30, %v4415_v52  ;;  %v1101_v16 = vpop.f32.mrf.mxu0  ;;  %2002 = vmatprep.mubr.f32.mxu1 %v6648_v37  ;;  %v2308_v18 = vadd.f32 %v2307_v31, %v5132_v0 }
 0x1b2   : > { %v2426_v47 = vmul.f32 %v1095_v42, %v4417_v53  ;;  %v2633_v23 = vadd.f32 %v2429_v4, %v2425_v45  ;;  %v2430_v3 = vmul.f32 %v1101_v16, %v4403_v35  ;;  %v1712_v48 = vpop.f32.mrf.mxu1  ;;  %v2317_v61 = vrot.slane %v2316_v24, 2 }
 0x1b3   : > { %v2428_v26 = vmul.f32 %v1706_v21, %v4419_v54  ;;  %v2651_v62 = vadd.f32 %v2431_v22, %v2427_v34  ;;  %v2432_v51 = vmul.f32 %v1712_v48, %v4405_v43  ;;  %v1105_v28 = vpop.f32.mrf.mxu0  ;;  %4049 = vmatmul.mubr.msk.f32.gmra.mxu0 %vm513_vm0, %v512_v59  ;;  %v2278_v30 = vadd.f32 %v2277_v58, %v2276_v55 }
 0x1b4   : > { %v2294_v63 = vadd.f32 %v2293_v50, %v2292_v25  ;;  %v2642_v37 = vadd.f32 %v2430_v3, %v2426_v47  ;;  %v2433_v0 = vmul.f32 %v1105_v28, %v4383_v14  ;;  %v1716_v31 = vpop.f32.mrf.mxu1  ;;  %4140 = vmatmul.mubr.msk.f32.gmra.mxu1 %vm513_vm0, %v512_v59  ;;  %v2287_v42 = vrot.slane %v5557_v33, 1 }
 0x1b5   : > { %v2324_v45 = vadd.f32 %v2323_v19, %v6686_v32  ;;  %v2660_v4 = vadd.f32 %v2432_v51, %v2428_v26  ;;  %v2435_v21 = vmul.f32 %v1716_v31, %v4389_v20  ;;  %v1107_v34 = vpop.f32.mrf.mxu0  ;;  %v2302_v48 = vadd.f32 %v2301_v12, %v2300_v40 }
 0x1b6   : > { %v2331_v22 = vrot.slane %v5167_v2, 4  ;;  %v2634_v16 = vadd.f32 %v2633_v23, %v2433_v0  ;;  %v2434_v55 = vmul.f32 %v1107_v34, %v4377_v10  ;;  %v1718_v25 = vpop.f32.mrf.mxu1  ;;  %v2318_v58 = vadd.f32 %v2317_v61, %v2316_v24 }
 0x1b7   : > { %v2309_v50 = vrot.slane %v2308_v18, 2  ;;  %v2652_v47 = vadd.f32 %v2651_v62, %v2435_v21  ;;  %v2436_v59 = vmul.f32 %v1718_v25, %v4379_v11  ;;  %v1111_v3 = vpop.f32.mrf.mxu0  ;;  %v2279_v28 = vrot.slane %v2278_v30, 1 }
 0x1b8   : > { %v2295_v13 = vrot.slane %v2294_v63, 1  ;;  %v2643_v32 = vadd.f32 %v2642_v37, %v2434_v55  ;;  %v2437_v51 = vmul.f32 %v1111_v3, %v4373_v7  ;;  %v1722_v26 = vpop.f32.mrf.mxu1  ;;  %v2325_v19 = vrot.slane %v2324_v45, 2 }
 0x1b9   : > { %v2347_v40 = vrot.slane %v5170_v44, 4  ;;  %v2661_v12 = vadd.f32 %v2660_v4, %v2436_v59  ;;  %v2439_v23 = vmul.f32 %v1722_v26, %v4375_v9  ;;  %v1113_v0 = vpop.f32.mrf.mxu0  ;;  %v2303_v31 = vrot.slane %v2302_v48, 1 }
 0x1ba   : > { %v2332_v61 = vadd.f32 %v2331_v22, %v5167_v2  ;;  %v5591_v62 = vadd.f32 %v2634_v16, %v2437_v51  ;;  %v2438_v24 = vmul.f32 %v1113_v0, %v4369_v5  ;;  %v1724_v21 = vpop.f32.mrf.mxu1  ;;  %v2319_v34 = vrot.slane %v2318_v58, 1 }
 0x1bb   : > { %v5594_v37 = vadd.f32 %v2309_v50, %v2308_v18  ;;  %v5596_v55 = vadd.f32 %v2652_v47, %v2439_v23  ;;  %v2440_v25 = vmul.f32 %v1724_v21, %v4371_v6  ;;  %v1117_v3 = vpop.f32.mrf.mxu0  ;;  %v6687_v4 = vrot.slane %v5501_v46, 1 }
 0x1bc   : > { %v6689_v2 = vrot.slane %v5516_v41, 1  ;;  %v2339_v16 = vrot.slane %v5175_v8, 4  ;;  %v5610_v51 = vadd.f32 %v2643_v32, %v2438_v24  ;;  %v1728_v18 = vpop.f32.mrf.mxu1  ;;  %v6691_v50 = vrot.slane %v5527_v27, 1 }
 0x1bd   : > { %v5602_v59 = vadd.f32 %v6687_v4, %v5501_v46  ;;  %v2348_v26 = vadd.f32 %v2347_v40, %v5170_v44  ;;  %v2355_v46 = vrot.slane %v5183_v15, 4  ;;  %v5619_v23 = vadd.f32 %v2661_v12, %v2440_v25  ;;  %v1119_v0 = vpop.f32.mrf.mxu0  ;;  %v6699_v44 = vld [vmem:[#allocation16_spill] sm:$0xff] }
 0x1be   : > { %v5607_v22 = vadd.f32 %v6689_v2, %v5516_v41  ;;  %v5615_v47 = vadd.f32 %v6691_v50, %v5527_v27  ;;  %v5622_v41 = vadd.f32 %v2287_v42, %v5557_v33  ;;  %v5624_v21 = vadd.f32 %v2279_v28, %v2278_v30  ;;  %v1730_v4 = vpop.f32.mrf.mxu1  ;;  %v6698_v50 = vld [vmem:[#allocation15_spill] sm:$0xff] }
 0x1bf   : > { %6688 = vst [vmem:[#allocation14_spill] sm:$0xff] %v5602_v59  ;;  %v5626_v32 = vadd.f32 %v2295_v13, %v2294_v63  ;;  %v2333_v24 = vrot.slane %v2332_v61, 2  ;;  %v5628_v2 = vadd.f32 %v2303_v31, %v2302_v48  ;;  %v5630_v27 = vadd.f32 %v2319_v34, %v2318_v58  ;;  %v1123_v12 = vpop.f32.mrf.mxu0 }
 0x1c0   : > { %6690 = vst [vmem:[#allocation34_spill] sm:$0xff] %v5607_v22  ;;  %6692 = vst [vmem:[#allocation35_spill] sm:$0xff] %v5615_v47  ;;  %v5633_v40 = vadd.f32 %v2325_v19, %v2324_v45  ;;  %v2340_v25 = vadd.f32 %v2339_v16, %v5175_v8  ;;  %v2492_v33 = vrot.slane %v6698_v50, 4  ;;  %v2441_v30 = vmul.f32 %v1117_v3, %v4422_v56  ;;  %v1734_v63 = vpop.f32.mrf.mxu1 }
 0x1c1   : > { %6693 = vst [vmem:[#allocation36_spill] sm:$0xff] %v5622_v41  ;;  %6694 = vst [vmem:[#allocation37_spill] sm:$0xff] %v5624_v21  ;;  %v2445_v13 = vmul.f32 %v1123_v12, %v4409_v49  ;;  %v2349_v42 = vrot.slane %v2348_v26, 2  ;;  %v2356_v48 = vadd.f32 %v2355_v46, %v5183_v15  ;;  %v2443_v58 = vmul.f32 %v1728_v18, %v4428_v60  ;;  %v1125_v31 = vpop.f32.mrf.mxu0  ;;  %v6700_v41 = vld [vmem:[#allocation17_spill] sm:$0xff] }
 0x1c2   : > { %6695 = vst [vmem:[#allocation38_spill] sm:$0xff] %v5626_v32  ;;  %6696 = vst [vmem:[#allocation39_spill] sm:$0xff] %v5628_v2  ;;  %v2447_v28 = vmul.f32 %v1734_v63, %v4415_v52  ;;  %v2334_v45 = vadd.f32 %v2333_v24, %v2332_v61  ;;  %v2442_v19 = vmul.f32 %v1119_v0, %v4417_v53  ;;  %v1736_v16 = vpop.f32.mrf.mxu1  ;;  %v2510_v3 = vrot.slane %v6699_v44, 4 }
 0x1c3   : > { %6697 = vst [vmem:[#allocation40_spill] sm:$0xff] %v5630_v27  ;;  %v2669_v34 = vadd.f32 %v2445_v13, %v2441_v30  ;;  %v2446_v8 = vmul.f32 %v1125_v31, %v4403_v35  ;;  %v2444_v12 = vmul.f32 %v1730_v4, %v4419_v54  ;;  %v2448_v22 = vmul.f32 %v1736_v16, %v4405_v43  ;;  %v1129_v15 = vpop.f32.mrf.mxu0 }
 0x1c4   : > { %v2687_v32 = vadd.f32 %v2447_v28, %v2443_v58  ;;  %v2327_v18 = vrot.slane %v5633_v40, 1  ;;  %v2493_v46 = vadd.f32 %v2492_v33, %v6698_v50  ;;  %v2449_v61 = vmul.f32 %v1129_v15, %v4383_v14  ;;  %v1740_v0 = vpop.f32.mrf.mxu1 }
 0x1c5   : > { %v2678_v63 = vadd.f32 %v2446_v8, %v2442_v19  ;;  %v2350_v24 = vadd.f32 %v2349_v42, %v2348_v26  ;;  %v2341_v30 = vrot.slane %v2340_v25, 2  ;;  %v2696_v13 = vadd.f32 %v2448_v22, %v2444_v12  ;;  %v1131_v21 = vpop.f32.mrf.mxu0  ;;  %v6701_v42 = vld [vmem:[#allocation18_spill] sm:$0xff] }
 0x1c6   : > { %v2451_v31 = vmul.f32 %v1740_v0, %v4389_v20  ;;  %v2335_v59 = vrot.slane %v2334_v45, 1  ;;  %v2357_v4 = vrot.slane %v2356_v48, 2  ;;  %v2670_v58 = vadd.f32 %v2669_v34, %v2449_v61  ;;  %v1742_v16 = vpop.f32.mrf.mxu1 }
 0x1c7   : > { %v2450_v28 = vmul.f32 %v1131_v21, %v4377_v10  ;;  %v2511_v27 = vadd.f32 %v2510_v3, %v6699_v44  ;;  %v2501_v50 = vrot.slane %v6700_v41, 4  ;;  %v2452_v19 = vmul.f32 %v1742_v16, %v4379_v11  ;;  %v1135_v8 = vpop.f32.mrf.mxu0 }
 0x1c8   : > { %v2688_v33 = vadd.f32 %v2687_v32, %v2451_v31  ;;  %v2494_v26 = vrot.slane %v2493_v46, 2  ;;  %v2519_v22 = vrot.slane %v6701_v42, 4  ;;  %v2453_v15 = vmul.f32 %v1135_v8, %v4373_v7  ;;  %v1746_v0 = vpop.f32.mrf.mxu1 }
 0x1c9   : > { %v2679_v12 = vadd.f32 %v2678_v63, %v2450_v28  ;;  %v5657_v2 = vadd.f32 %v2341_v30, %v2340_v25  ;;  %v2528_v21 = vrot.slane %v5313_v17, 4  ;;  %v2697_v34 = vadd.f32 %v2696_v13, %v2452_v19  ;;  %v1137_v3 = vpop.f32.mrf.mxu0 }
 0x1ca   : > { %v2455_v44 = vmul.f32 %v1746_v0, %v4375_v9  ;;  %v2351_v61 = vrot.slane %v2350_v24, 1  ;;  %v5661_v32 = vadd.f32 %v2357_v4, %v2356_v48  ;;  %v5663_v31 = vadd.f32 %v2670_v58, %v2453_v15  ;;  %v1748_v47 = vpop.f32.mrf.mxu1 }
 0x1cb   : > { %v2454_v16 = vmul.f32 %v1137_v3, %v4369_v5  ;;  %v2512_v63 = vrot.slane %v2511_v27, 2  ;;  %v2502_v28 = vadd.f32 %v2501_v50, %v6700_v41  ;;  %v2456_v25 = vmul.f32 %v1748_v47, %v4371_v6  ;;  %v1141_v30 = vpop.f32.mrf.mxu0 }
 0x1cc   : > { %6702 = vst [vmem:[#allocation15_spill] sm:$0xff] %v5663_v31  ;;  %v5667_v8 = vadd.f32 %v2688_v33, %v2455_v44  ;;  %v6704_v13 = vrot.slane %v5594_v37, 1  ;;  %v5675_v48 = vadd.f32 %v2494_v26, %v2493_v46  ;;  %v2520_v4 = vadd.f32 %v2519_v22, %v6701_v42  ;;  %v1752_v15 = vpop.f32.mrf.mxu1  ;;  %v6711_v26 = vld [vmem:[#allocation21_spill] sm:$0xff] }
 0x1cd   : > { %v5678_v58 = vadd.f32 %v2679_v12, %v2454_v16  ;;  %v5681_v0 = vadd.f32 %v2327_v18, %v5633_v40  ;;  %v2529_v41 = vadd.f32 %v2528_v21, %v5313_v17  ;;  %v2546_v47 = vrot.slane %v5318_v38, 4  ;;  %v1143_v33 = vpop.f32.mrf.mxu0  ;;  %v6712_v17 = vld [vmem:[#allocation24_spill] sm:$0xff] }
 0x1ce   : > { %6703 = vst [vmem:[#allocation16_spill] sm:$0xff] %v5667_v8  ;;  %v5673_v19 = vadd.f32 %v6704_v13, %v5594_v37  ;;  %v5685_v50 = vadd.f32 %v2697_v34, %v2456_v25  ;;  %v5687_v44 = vadd.f32 %v2335_v59, %v2334_v45  ;;  %v5689_v37 = vadd.f32 %v2351_v61, %v2350_v24  ;;  %v1754_v22 = vpop.f32.mrf.mxu1 }
 0x1cf   : > { %6706 = vst [vmem:[#allocation18_spill] sm:$0xff] %v5678_v58  ;;  %6707 = vst [vmem:[#allocation41_spill] sm:$0xff] %v5681_v0  ;;  %v2537_v42 = vrot.slane %v6711_v26, 4  ;;  %v5694_v40 = vadd.f32 %v2512_v63, %v2511_v27  ;;  %v2503_v18 = vrot.slane %v2502_v28, 2  ;;  %v2555_v21 = vrot.slane %v6712_v17, 4  ;;  %v1147_v3 = vpop.f32.mrf.mxu0 }
 0x1d0   : > { %6705 = vst [vmem:[#allocation17_spill] sm:$0xff] %v5673_v19  ;;  %6708 = vst [vmem:[#allocation42_spill] sm:$0xff] %v5685_v50  ;;  %v2521_v16 = vrot.slane %v2520_v4, 2  ;;  %v2457_v59 = vmul.f32 %v1141_v30, %v4422_v56  ;;  %v2461_v45 = vmul.f32 %v1147_v3, %v4409_v49  ;;  %v1758_v24 = vpop.f32.mrf.mxu1  ;;  %v2530_v61 = vrot.slane %v2529_v41, 2 }
 0x1d1   : > { %6709 = vst [vmem:[#allocation43_spill] sm:$0xff] %v5687_v44  ;;  %6710 = vst [vmem:[#allocation44_spill] sm:$0xff] %v5689_v37  ;;  %v2547_v25 = vadd.f32 %v2546_v47, %v5318_v38  ;;  %v2459_v13 = vmul.f32 %v1752_v15, %v4428_v60  ;;  %v2463_v27 = vmul.f32 %v1758_v24, %v4415_v52  ;;  %v1149_v63 = vpop.f32.mrf.mxu0  ;;  %v2514_v15 = vrot.slane %v5694_v40, 1 }
 0x1d2   : > { %v2538_v12 = vadd.f32 %v2537_v42, %v6711_v26  ;;  %v2458_v46 = vmul.f32 %v1143_v33, %v4417_v53  ;;  %v2705_v0 = vadd.f32 %v2461_v45, %v2457_v59  ;;  %v2462_v34 = vmul.f32 %v1149_v63, %v4403_v35  ;;  %v1760_v19 = vpop.f32.mrf.mxu1 }
 0x1d3   : > { %v2556_v30 = vadd.f32 %v2555_v21, %v6712_v17  ;;  %v2460_v3 = vmul.f32 %v1754_v22, %v4419_v54  ;;  %v2723_v37 = vadd.f32 %v2463_v27, %v2459_v13  ;;  %v2464_v38 = vmul.f32 %v1760_v19, %v4405_v43  ;;  %v1153_v47 = vpop.f32.mrf.mxu0 }
 0x1d4   : > { %v2504_v24 = vadd.f32 %v2503_v18, %v2502_v28  ;;  %v2714_v44 = vadd.f32 %v2462_v34, %v2458_v46  ;;  %v2465_v26 = vmul.f32 %v1153_v47, %v4383_v14  ;;  %v1764_v42 = vpop.f32.mrf.mxu1  ;;  %v2522_v33 = vadd.f32 %v2521_v16, %v2520_v4  ;;  %v6713_v4 = vld [vmem:[#allocation6_spill] sm:$0xff] }
 0x1d5   : > { %v2564_v59 = vrot.slane %v5416_v57, 4  ;;  %v2732_v45 = vadd.f32 %v2464_v38, %v2460_v3  ;;  %v2467_v63 = vmul.f32 %v1764_v42, %v4389_v20  ;;  %v1155_v17 = vpop.f32.mrf.mxu0  ;;  %v2531_v21 = vadd.f32 %v2530_v61, %v2529_v41 }
 0x1d6   : > { %v2548_v22 = vrot.slane %v2547_v25, 2  ;;  %v2706_v13 = vadd.f32 %v2705_v0, %v2465_v26  ;;  %v2466_v19 = vmul.f32 %v1155_v17, %v4377_v10  ;;  %v1766_v27 = vpop.f32.mrf.mxu1  ;;  %v2539_v50 = vrot.slane %v2538_v12, 2 }
 0x1d7   : > { %v2557_v58 = vrot.slane %v2556_v30, 2  ;;  %v2724_v28 = vadd.f32 %v2723_v37, %v2467_v63  ;;  %v2468_v46 = vmul.f32 %v1766_v27, %v4379_v11  ;;  %v1159_v18 = vpop.f32.mrf.mxu0  ;;  %v2505_v34 = vrot.slane %v2504_v24, 1 }
 0x1d8   : > { %v2582_v16 = vrot.slane %v6713_v4, 4  ;;  %v2715_v47 = vadd.f32 %v2714_v44, %v2466_v19  ;;  %v2469_v3 = vmul.f32 %v1159_v18, %v4373_v7  ;;  %v1770_v38 = vpop.f32.mrf.mxu1  ;;  %v2523_v42 = vrot.slane %v2522_v33, 1 }
 0x1d9   : > { %v2565_v41 = vadd.f32 %v2564_v59, %v5416_v57  ;;  %v2733_v0 = vadd.f32 %v2732_v45, %v2468_v46  ;;  %v2471_v61 = vmul.f32 %v1770_v38, %v4375_v9  ;;  %v1161_v26 = vpop.f32.mrf.mxu0  ;;  %v2532_v17 = vrot.slane %v2531_v21, 1 }
 0x1da   : > { %v5719_v8 = vadd.f32 %v2548_v22, %v2547_v25  ;;  %v5721_v37 = vadd.f32 %v2706_v13, %v2469_v3  ;;  %v2470_v63 = vmul.f32 %v1161_v26, %v4369_v5  ;;  %v1772_v27 = vpop.f32.mrf.mxu1  ;;  %v5724_v31 = vadd.f32 %v2539_v50, %v2538_v12  ;;  %v6716_v22 = vld [vmem:[#allocation8_spill] sm:$0xff] }
 0x1db   : > { %v5726_v44 = vadd.f32 %v2557_v58, %v2556_v30  ;;  %v5728_v19 = vadd.f32 %v2724_v28, %v2471_v61  ;;  %v2472_v57 = vmul.f32 %v1772_v27, %v4371_v6  ;;  %v1165_v59 = vpop.f32.mrf.mxu0  ;;  %v6714_v45 = vrot.slane %v5657_v2, 1  ;;  %v6719_v28 = vld [vmem:[#allocation9_spill] sm:$0xff] }
 0x1dc   : > { %v2583_v25 = vadd.f32 %v2582_v16, %v6713_v4  ;;  %v2573_v13 = vrot.slane %v6716_v22, 4  ;;  %v5738_v18 = vadd.f32 %v2715_v47, %v2470_v63  ;;  %v1776_v50 = vpop.f32.mrf.mxu1  ;;  %v6717_v58 = vrot.slane %v5661_v32, 1 }
 0x1dd   : > { %v5734_v46 = vadd.f32 %v6714_v45, %v5657_v2  ;;  %v2566_v30 = vrot.slane %v2565_v41, 2  ;;  %v2591_v3 = vrot.slane %v6719_v28, 4  ;;  %v5746_v38 = vadd.f32 %v2733_v0, %v2472_v57  ;;  %v1167_v61 = vpop.f32.mrf.mxu0 }
 0x1de   : > { %v5743_v12 = vadd.f32 %v6717_v58, %v5661_v32  ;;  %v6720_v2 = vrot.slane %v5675_v48, 1  ;;  %v5754_v16 = vadd.f32 %v2514_v15, %v5694_v40  ;;  %v5756_v47 = vadd.f32 %v2505_v34, %v2504_v24  ;;  %v1778_v32 = vpop.f32.mrf.mxu1 }
 0x1df   : > { %6715 = vst [vmem:[#allocation21_spill] sm:$0xff] %v5734_v46  ;;  %v5758_v26 = vadd.f32 %v2523_v42, %v2522_v33  ;;  %v5760_v63 = vadd.f32 %v2532_v17, %v2531_v21  ;;  %v1171_v45 = vpop.f32.mrf.mxu0  ;;  %v2584_v58 = vrot.slane %v2583_v25, 2  ;;  %v2473_v40 = vmul.f32 %v1165_v59, %v4422_v56  ;;  %v6737_v46 = vld [vmem:[#allocation16_spill] sm:$0xff] }
 0x1e0   : > { %6718 = vst [vmem:[#allocation24_spill] sm:$0xff] %v5743_v12  ;;  %v5751_v4 = vadd.f32 %v6720_v2, %v5675_v48  ;;  %6722 = vst [vmem:[#allocation8_spill] sm:$0xff] %v5754_v16  ;;  %v2574_v48 = vadd.f32 %v2573_v13, %v6716_v22  ;;  %v2477_v15 = vmul.f32 %v1171_v45, %v4409_v49  ;;  %v1782_v24 = vpop.f32.mrf.mxu1  ;;  %v2600_v2 = vrot.slane %v5519_v39, 4 }
 0x1e1   : > { %6723 = vst [vmem:[#allocation9_spill] sm:$0xff] %v5756_v47  ;;  %6724 = vst [vmem:[#allocation45_spill] sm:$0xff] %v5758_v26  ;;  %v5768_v33 = vadd.f32 %v2566_v30, %v2565_v41  ;;  %v2592_v21 = vadd.f32 %v2591_v3, %v6719_v28  ;;  %v2475_v34 = vmul.f32 %v1776_v50, %v4428_v60  ;;  %v1173_v17 = vpop.f32.mrf.mxu0  ;;  %v2618_v13 = vrot.slane %v5523_v1, 4 }
 0x1e2   : > { %6721 = vst [vmem:[#allocation6_spill] sm:$0xff] %v5751_v4  ;;  %6725 = vst [vmem:[#allocation46_spill] sm:$0xff] %v5760_v63  ;;  %v2479_v42 = vmul.f32 %v1782_v24, %v4415_v52  ;;  %v2474_v57 = vmul.f32 %v1167_v61, %v4417_v53  ;;  %v2741_v0 = vadd.f32 %v2477_v15, %v2473_v40  ;;  %v1784_v59 = vpop.f32.mrf.mxu1  ;;  %v2575_v50 = vrot.slane %v2574_v48, 2 }
 0x1e3   : > { %v2478_v22 = vmul.f32 %v1173_v17, %v4403_v35  ;;  %v2476_v41 = vmul.f32 %v1778_v32, %v4419_v54  ;;  %v2480_v28 = vmul.f32 %v1784_v59, %v4405_v43  ;;  %v1177_v3 = vpop.f32.mrf.mxu0  ;;  %v2609_v45 = vrot.slane %v5530_v36, 4 }
 0x1e4   : > { %v2759_v30 = vadd.f32 %v2479_v42, %v2475_v34  ;;  %v2481_v27 = vmul.f32 %v1177_v3, %v4383_v14  ;;  %v1788_v26 = vpop.f32.mrf.mxu1  ;;  %v2585_v61 = vadd.f32 %v2584_v58, %v2583_v25  ;;  %v2627_v40 = vrot.slane %v5546_v29, 4 }
 0x1e5   : > { %v2750_v24 = vadd.f32 %v2478_v22, %v2474_v57  ;;  %v2768_v15 = vadd.f32 %v2480_v28, %v2476_v41  ;;  %v2483_v17 = vmul.f32 %v1788_v26, %v4389_v20  ;;  %v1179_v47 = vpop.f32.mrf.mxu0  ;;  %v2568_v32 = vrot.slane %v5768_v33, 1 }
 0x1e6   : > { %v2593_v34 = vrot.slane %v2592_v21, 2  ;;  %v2742_v42 = vadd.f32 %v2741_v0, %v2481_v27  ;;  %v2482_v59 = vmul.f32 %v1179_v47, %v4377_v10  ;;  %v1790_v16 = vpop.f32.mrf.mxu1  ;;  %v2601_v63 = vadd.f32 %v2600_v2, %v5519_v39 }
 0x1e7   : > { %v2619_v57 = vadd.f32 %v2618_v13, %v5523_v1  ;;  %v2760_v22 = vadd.f32 %v2759_v30, %v2483_v17  ;;  %v2484_v25 = vmul.f32 %v1790_v16, %v4379_v11  ;;  %v1183_v58 = vpop.f32.mrf.mxu0  ;;  %v5788_v3 = vadd.f32 %v2575_v50, %v2574_v48 }
 0x1e8   : > { %v2610_v26 = vadd.f32 %v2609_v45, %v5530_v36  ;;  %v2751_v41 = vadd.f32 %v2750_v24, %v2482_v59  ;;  %v2485_v28 = vmul.f32 %v1183_v58, %v4373_v7  ;;  %v1794_v4 = vpop.f32.mrf.mxu1  ;;  %v2586_v27 = vrot.slane %v2585_v61, 1 }
 0x1e9   : > { %v2628_v47 = vadd.f32 %v2627_v40, %v5546_v29  ;;  %v2769_v0 = vadd.f32 %v2768_v15, %v2484_v25  ;;  %v2487_v39 = vmul.f32 %v1794_v4, %v4375_v9  ;;  %v1185_v2 = vpop.f32.mrf.mxu0  ;;  %v5794_v1 = vadd.f32 %v2593_v34, %v2592_v21 }
 0x1ea   : > { %v2636_v16 = vrot.slane %v5591_v62, 4  ;;  %v5797_v13 = vadd.f32 %v2742_v42, %v2485_v28  ;;  %v2486_v48 = vmul.f32 %v1185_v2, %v4369_v5  ;;  %v1796_v36 = vpop.f32.mrf.mxu1  ;;  %v2602_v30 = vrot.slane %v2601_v63, 2 }
 0x1eb   : > { %v2620_v50 = vrot.slane %v2619_v57, 2  ;;  %v5800_v45 = vadd.f32 %v2760_v22, %v2487_v39  ;;  %v2488_v24 = vmul.f32 %v1796_v36, %v4371_v6  ;;  %v1189_v29 = vpop.f32.mrf.mxu0  ;;  %v6726_v4 = vrot.slane %v5719_v8, 1 }
 0x1ec   : > { %v2611_v21 = vrot.slane %v2610_v26, 2  ;;  %v2654_v15 = vrot.slane %v5596_v55, 4  ;;  %v5809_v17 = vadd.f32 %v2751_v41, %v2486_v48  ;;  %v1800_v34 = vpop.f32.mrf.mxu1  ;;  %v6729_v42 = vrot.slane %v5724_v31, 1 }
 0x1ed   : > { %v5806_v40 = vadd.f32 %v6726_v4, %v5719_v8  ;;  %v6731_v22 = vrot.slane %v5726_v44, 1  ;;  %v2629_v58 = vrot.slane %v2628_v47, 2  ;;  %v5821_v28 = vadd.f32 %v2769_v0, %v2488_v24  ;;  %v1191_v8 = vpop.f32.mrf.mxu0 }
 0x1ee   : > { %6728 = vst [vmem:[#allocation48_spill] sm:$0xff] %v5809_v17  ;;  %v5814_v59 = vadd.f32 %v6729_v42, %v5724_v31  ;;  %v5824_v39 = vadd.f32 %v2568_v32, %v5768_v33  ;;  %v5826_v41 = vadd.f32 %v2586_v27, %v2585_v61  ;;  %v2637_v48 = vadd.f32 %v2636_v16, %v5591_v62  ;;  %v1802_v31 = vpop.f32.mrf.mxu1 }
 0x1ef   : > { %6727 = vst [vmem:[#allocation47_spill] sm:$0xff] %v5806_v40  ;;  %v5819_v25 = vadd.f32 %v6731_v22, %v5726_v44  ;;  %6733 = vst [vmem:[#allocation51_spill] sm:$0xff] %v5821_v28  ;;  %v5831_v4 = vadd.f32 %v2602_v30, %v2601_v63  ;;  %v5833_v44 = vadd.f32 %v2620_v50, %v2619_v57  ;;  %v2645_v0 = vrot.slane %v5610_v51, 4  ;;  %v1195_v24 = vpop.f32.mrf.mxu0 }
 0x1f0   : > { %6730 = vst [vmem:[#allocation49_spill] sm:$0xff] %v5814_v59  ;;  %6734 = vst [vmem:[#allocation52_spill] sm:$0xff] %v5824_v39  ;;  %v5836_v42 = vadd.f32 %v2611_v21, %v2610_v26  ;;  %v2655_v33 = vadd.f32 %v2654_v15, %v5596_v55  ;;  %v2777_v61 = vmul.f32 %v1189_v29, %v4422_v56  ;;  %v1806_v27 = vpop.f32.mrf.mxu1  ;;  %v2663_v16 = vrot.slane %v5619_v23, 4 }
 0x1f1   : > { %6732 = vst [vmem:[#allocation50_spill] sm:$0xff] %v5819_v25  ;;  %6735 = vst [vmem:[#allocation53_spill] sm:$0xff] %v5826_v41  ;;  %v2781_v32 = vmul.f32 %v1195_v24, %v4409_v49  ;;  %v5841_v62 = vadd.f32 %v2629_v58, %v2628_v47  ;;  %v2779_v63 = vmul.f32 %v1800_v34, %v4428_v60  ;;  %v1197_v30 = vpop.f32.mrf.mxu0  ;;  %v2638_v50 = vrot.slane %v2637_v48, 2 }
 0x1f2   : > { %v2783_v57 = vmul.f32 %v1806_v27, %v4415_v52  ;;  %v2778_v26 = vmul.f32 %v1191_v8, %v4417_v53  ;;  %v2782_v55 = vmul.f32 %v1197_v30, %v4403_v35  ;;  %v1808_v15 = vpop.f32.mrf.mxu1  ;;  %v2646_v29 = vadd.f32 %v2645_v0, %v5610_v51 }
 0x1f3   : > { %v2905_v21 = vadd.f32 %v2781_v32, %v2777_v61  ;;  %v2780_v22 = vmul.f32 %v1802_v31, %v4419_v54  ;;  %v2784_v58 = vmul.f32 %v1808_v15, %v4405_v43  ;;  %v1201_v24 = vpop.f32.mrf.mxu0  ;;  %v2604_v34 = vrot.slane %v5831_v4, 1 }
 0x1f4   : > { %v2923_v47 = vadd.f32 %v2783_v57, %v2779_v63  ;;  %v2656_v36 = vrot.slane %v2655_v33, 2  ;;  %v2914_v27 = vadd.f32 %v2782_v55, %v2778_v26  ;;  %v2785_v2 = vmul.f32 %v1201_v24, %v4383_v14  ;;  %v1812_v25 = vpop.f32.mrf.mxu1 }
 0x1f5   : > { %v2622_v8 = vrot.slane %v5833_v44, 1  ;;  %v2613_v61 = vrot.slane %v5836_v42, 1  ;;  %v2932_v32 = vadd.f32 %v2784_v58, %v2780_v22  ;;  %v2787_v51 = vmul.f32 %v1812_v25, %v4389_v20  ;;  %v1203_v0 = vpop.f32.mrf.mxu0  ;;  %v6736_v22 = vld [vmem:[#allocation15_spill] sm:$0xff] }
 0x1f6   : > { %v2631_v31 = vrot.slane %v5841_v62, 1  ;;  %v2664_v63 = vadd.f32 %v2663_v16, %v5619_v23  ;;  %v2906_v57 = vadd.f32 %v2905_v21, %v2785_v2  ;;  %v2786_v30 = vmul.f32 %v1203_v0, %v4377_v10  ;;  %v1814_v15 = vpop.f32.mrf.mxu1  ;;  %v6738_v2 = vld [vmem:[#allocation18_spill] sm:$0xff] }
 0x1f7   : > { %v2639_v26 = vadd.f32 %v2638_v50, %v2637_v48  ;;  %v2647_v55 = vrot.slane %v2646_v29, 2  ;;  %v2924_v24 = vadd.f32 %v2923_v47, %v2787_v51  ;;  %v2788_v59 = vmul.f32 %v1814_v15, %v4379_v11  ;;  %v1207_v41 = vpop.f32.mrf.mxu0  ;;  %v6739_v51 = vld [vmem:[#allocation42_spill] sm:$0xff] }
 0x1f8   : > { %v5860_v40 = vadd.f32 %v2656_v36, %v2655_v33  ;;  %v2672_v58 = vrot.slane %v6736_v22, 4  ;;  %v2915_v25 = vadd.f32 %v2914_v27, %v2786_v30  ;;  %v2789_v39 = vmul.f32 %v1207_v41, %v4373_v7  ;;  %v1818_v12 = vpop.f32.mrf.mxu1 }
 0x1f9   : > { %v2690_v23 = vrot.slane %v6737_v46, 4  ;;  %v2681_v16 = vrot.slane %v6738_v2, 4  ;;  %v2933_v21 = vadd.f32 %v2932_v32, %v2788_v59  ;;  %v2791_v48 = vmul.f32 %v1818_v12, %v4375_v9  ;;  %v1209_v50 = vpop.f32.mrf.mxu0 }
 0x1fa   : > { %v2665_v47 = vrot.slane %v2664_v63, 2  ;;  %v2699_v0 = vrot.slane %v6739_v51, 4  ;;  %v5868_v15 = vadd.f32 %v2906_v57, %v2789_v39  ;;  %v2790_v36 = vmul.f32 %v1209_v50, %v4369_v5  ;;  %v1820_v33 = vpop.f32.mrf.mxu1 }
 0x1fb   : > { %v2640_v27 = vrot.slane %v2639_v26, 1  ;;  %v5871_v30 = vadd.f32 %v2647_v55, %v2646_v29  ;;  %v5873_v41 = vadd.f32 %v2924_v24, %v2791_v48  ;;  %v2792_v28 = vmul.f32 %v1820_v33, %v4371_v6  ;;  %v1213_v17 = vpop.f32.mrf.mxu0 }
 0x1fc   : > { %v6740_v12 = vrot.slane %v5788_v3, 1  ;;  %v6742_v39 = vrot.slane %v5794_v1, 1  ;;  %v2673_v57 = vadd.f32 %v2672_v58, %v6736_v22  ;;  %v5887_v50 = vadd.f32 %v2915_v25, %v2790_v36  ;;  %v1824_v29 = vpop.f32.mrf.mxu1 }
 0x1fd   : > { %v5890_v55 = vadd.f32 %v2604_v34, %v5831_v4  ;;  %v2691_v24 = vadd.f32 %v2690_v23, %v6737_v46  ;;  %v2682_v48 = vadd.f32 %v2681_v16, %v6738_v2  ;;  %v5894_v33 = vadd.f32 %v2933_v21, %v2792_v28 }
 0x1fe   : > { %v5879_v59 = vadd.f32 %v6740_v12, %v5788_v3  ;;  %v5884_v32 = vadd.f32 %v6742_v39, %v5794_v1  ;;  %v1215_v3 = vpop.f32.mrf.mxu0  ;;  %v5897_v12 = vadd.f32 %v2622_v8, %v5833_v44  ;;  %v5900_v1 = vadd.f32 %v2613_v61, %v5836_v42  ;;  %v1826_v4 = vpop.f32.mrf.mxu1 }
 0x1ff   : > { %v5903_v22 = vadd.f32 %v2631_v31, %v5841_v62  ;;  %v2700_v58 = vadd.f32 %v2699_v0, %v6739_v51  ;;  %v5906_v34 = vadd.f32 %v2640_v27, %v2639_v26  ;;  %v5910_v25 = vadd.f32 %v2665_v47, %v2664_v63 }
 0x200   : > { %6741 = vst [vmem:[#allocation15_spill] sm:$0xff] %v5879_v59  ;;  %6743 = vst [vmem:[#allocation16_spill] sm:$0xff] %v5884_v32  ;;  %v1219_v23 = vpop.f32.mrf.mxu0  ;;  %v2674_v44 = vrot.slane %v2673_v57, 2  ;;  %v2708_v8 = vrot.slane %v5721_v37, 4  ;;  %v2793_v42 = vmul.f32 %v1213_v17, %v4422_v56  ;;  %v1830_v61 = vpop.f32.mrf.mxu1  ;;  %v2692_v31 = vrot.slane %v2691_v24, 2 }
 0x201   : > { %6744 = vst [vmem:[#allocation18_spill] sm:$0xff] %v5897_v12  ;;  %6745 = vst [vmem:[#allocation42_spill] sm:$0xff] %v5900_v1  ;;  %v2797_v62 = vmul.f32 %v1219_v23, %v4409_v49  ;;  %v2683_v2 = vrot.slane %v2682_v48, 2  ;;  %v2795_v26 = vmul.f32 %v1824_v29, %v4428_v60  ;;  %v2799_v16 = vmul.f32 %v1830_v61, %v4415_v52 }
 0x202   : > { %6746 = vst [vmem:[#allocation54_spill] sm:$0xff] %v5903_v22  ;;  %v1221_v21 = vpop.f32.mrf.mxu0  ;;  %v2701_v51 = vrot.slane %v2700_v58, 2  ;;  %v2794_v63 = vmul.f32 %v1215_v3, %v4417_v53  ;;  %v1832_v36 = vpop.f32.mrf.mxu1  ;;  %v2726_v27 = vrot.slane %v5728_v19, 4  ;;  %v2796_v17 = vmul.f32 %v1826_v4, %v4419_v54 }
 0x203   : > { %v2941_v47 = vadd.f32 %v2797_v62, %v2793_v42  ;;  %v2798_v0 = vmul.f32 %v1221_v21, %v4403_v35  ;;  %v2959_v39 = vadd.f32 %v2799_v16, %v2795_v26  ;;  %v2800_v23 = vmul.f32 %v1832_v36, %v4405_v43 }
 0x204   : > { %v1225_v28 = vpop.f32.mrf.mxu0  ;;  %v2667_v29 = vrot.slane %v5910_v25, 1  ;;  %v2709_v61 = vadd.f32 %v2708_v8, %v5721_v37  ;;  %v1836_v3 = vpop.f32.mrf.mxu1  ;;  %v2675_v42 = vadd.f32 %v2674_v44, %v2673_v57  ;;  %v2693_v62 = vadd.f32 %v2692_v31, %v2691_v24 }
 0x205   : > { %v2950_v46 = vadd.f32 %v2798_v0, %v2794_v63  ;;  %v2801_v22 = vmul.f32 %v1225_v28, %v4383_v14  ;;  %v2968_v21 = vadd.f32 %v2800_v23, %v2796_v17  ;;  %v2803_v32 = vmul.f32 %v1836_v3, %v4389_v20 }
 0x206   : > { %v1227_v1 = vpop.f32.mrf.mxu0  ;;  %v2684_v59 = vadd.f32 %v2683_v2, %v2682_v48  ;;  %v2702_v4 = vadd.f32 %v2701_v51, %v2700_v58  ;;  %v1838_v36 = vpop.f32.mrf.mxu1  ;;  %v2727_v12 = vadd.f32 %v2726_v27, %v5728_v19  ;;  %v2717_v37 = vrot.slane %v5738_v18, 4 }
 0x207   : > { %v2942_v26 = vadd.f32 %v2941_v47, %v2801_v22  ;;  %v2802_v16 = vmul.f32 %v1227_v1, %v4377_v10  ;;  %v2960_v8 = vadd.f32 %v2959_v39, %v2803_v32  ;;  %v2804_v28 = vmul.f32 %v1838_v36, %v4379_v11 }
 0x208   : > { %v1231_v63 = vpop.f32.mrf.mxu0  ;;  %v2710_v57 = vrot.slane %v2709_v61, 2  ;;  %v2735_v24 = vrot.slane %v5746_v38, 4  ;;  %v1842_v48 = vpop.f32.mrf.mxu1  ;;  %v2676_v58 = vrot.slane %v2675_v42, 1  ;;  %v2694_v22 = vrot.slane %v2693_v62, 1 }
 0x209   : > { %v2951_v44 = vadd.f32 %v2950_v46, %v2802_v16  ;;  %v2805_v31 = vmul.f32 %v1231_v63, %v4373_v7  ;;  %v2969_v2 = vadd.f32 %v2968_v21, %v2804_v28  ;;  %v2807_v1 = vmul.f32 %v1842_v48, %v4375_v9 }
 0x20a   : > { %v1233_v51 = vpop.f32.mrf.mxu0  ;;  %v2685_v19 = vrot.slane %v2684_v59, 1  ;;  %v2703_v47 = vrot.slane %v2702_v4, 1  ;;  %v1844_v27 = vpop.f32.mrf.mxu1  ;;  %v2728_v17 = vrot.slane %v2727_v12, 2  ;;  %v2718_v39 = vadd.f32 %v2717_v37, %v5738_v18 }
 0x20b   : > { %v5933_v0 = vadd.f32 %v2942_v26, %v2805_v31  ;;  %v2806_v32 = vmul.f32 %v1233_v51, %v4369_v5  ;;  %v5937_v46 = vadd.f32 %v2960_v8, %v2807_v1  ;;  %v2808_v23 = vmul.f32 %v1844_v27, %v4371_v6 }
 0x20c   : > { %v1237_v3 = vpop.f32.mrf.mxu0  ;;  %v6747_v21 = vrot.slane %v5860_v40, 1  ;;  %v5945_v36 = vadd.f32 %v2710_v57, %v2709_v61  ;;  %v2736_v26 = vadd.f32 %v2735_v24, %v5746_v38  ;;  %v1848_v63 = vpop.f32.mrf.mxu1  ;;  %v6749_v18 = vrot.slane %v5871_v30, 1 }
 0x20d   : > { %v5948_v28 = vadd.f32 %v2951_v44, %v2806_v32  ;;  %v2744_v8 = vrot.slane %v5797_v13, 4  ;;  %v2762_v31 = vrot.slane %v5800_v45, 4  ;;  %v5957_v48 = vadd.f32 %v2969_v2, %v2808_v23  ;;  %v6756_v32 = vld [vmem:[#allocation48_spill] sm:$0xff] }
 0x20e   : > { %v5943_v16 = vadd.f32 %v6747_v21, %v5860_v40  ;;  %v5953_v37 = vadd.f32 %v6749_v18, %v5871_v30  ;;  %v1239_v40 = vpop.f32.mrf.mxu0  ;;  %v5960_v61 = vadd.f32 %v2667_v29, %v5910_v25  ;;  %v5962_v57 = vadd.f32 %v2676_v58, %v2675_v42  ;;  %v1850_v44 = vpop.f32.mrf.mxu1 }
 0x20f   : > { %v5964_v38 = vadd.f32 %v2694_v22, %v2693_v62  ;;  %v5966_v24 = vadd.f32 %v2685_v19, %v2684_v59  ;;  %v5968_v1 = vadd.f32 %v2703_v47, %v2702_v4  ;;  %v5970_v30 = vadd.f32 %v2728_v17, %v2727_v12  ;;  %v6757_v22 = vld [vmem:[#allocation51_spill] sm:$0xff] }
 0x210   : > { %6748 = vst [vmem:[#allocation55_spill] sm:$0xff] %v5943_v16  ;;  %6750 = vst [vmem:[#allocation56_spill] sm:$0xff] %v5953_v37  ;;  %v2719_v51 = vrot.slane %v2718_v39, 2  ;;  %v2753_v27 = vrot.slane %v6756_v32, 4  ;;  %v1243_v2 = vpop.f32.mrf.mxu0  ;;  %v2712_v23 = vrot.slane %v5945_v36, 1  ;;  %v2737_v21 = vrot.slane %v2736_v26, 2  ;;  %v1854_v42 = vpop.f32.mrf.mxu1 }
 0x211   : > { %6751 = vst [vmem:[#allocation57_spill] sm:$0xff] %v5960_v61  ;;  %6752 = vst [vmem:[#allocation58_spill] sm:$0xff] %v5962_v57  ;;  %v2809_v25 = vmul.f32 %v1237_v3, %v4422_v56  ;;  %v2813_v29 = vmul.f32 %v1243_v2, %v4409_v49  ;;  %v2745_v59 = vadd.f32 %v2744_v8, %v5797_v13  ;;  %v2771_v19 = vrot.slane %v6757_v22, 4 }
 0x212   : > { %6753 = vst [vmem:[#allocation59_spill] sm:$0xff] %v5964_v38  ;;  %6754 = vst [vmem:[#allocation60_spill] sm:$0xff] %v5966_v24  ;;  %v2763_v62 = vadd.f32 %v2762_v31, %v5800_v45  ;;  %v2811_v4 = vmul.f32 %v1848_v63, %v4428_v60  ;;  %v2815_v12 = vmul.f32 %v1854_v42, %v4415_v52  ;;  %v1245_v58 = vpop.f32.mrf.mxu0  ;;  %v1856_v3 = vpop.f32.mrf.mxu1  ;;  %v2730_v63 = vrot.slane %v5970_v30, 1 }
 0x213   : > { %6755 = vst [vmem:[#allocation61_spill] sm:$0xff] %v5968_v1  ;;  %v2810_v47 = vmul.f32 %v1239_v40, %v4417_v53  ;;  %v2977_v17 = vadd.f32 %v2813_v29, %v2809_v25  ;;  %v2814_v18 = vmul.f32 %v1245_v58, %v4403_v35  ;;  %v2754_v2 = vadd.f32 %v2753_v27, %v6756_v32 }
 0x214   : > { %v2812_v1 = vmul.f32 %v1850_v44, %v4419_v54  ;;  %v2995_v13 = vadd.f32 %v2815_v12, %v2811_v4  ;;  %v2816_v45 = vmul.f32 %v1856_v3, %v4405_v43  ;;  %v1249_v8 = vpop.f32.mrf.mxu0  ;;  %v2720_v31 = vadd.f32 %v2719_v51, %v2718_v39  ;;  %v1860_v24 = vpop.f32.mrf.mxu1 }
 0x215   : > { %v2986_v42 = vadd.f32 %v2814_v18, %v2810_v47  ;;  %v2817_v61 = vmul.f32 %v1249_v8, %v4383_v14  ;;  %v2738_v40 = vadd.f32 %v2737_v21, %v2736_v26  ;;  %v2746_v25 = vrot.slane %v2745_v59, 2 }
 0x216   : > { %v3004_v29 = vadd.f32 %v2816_v45, %v2812_v1  ;;  %v2819_v58 = vmul.f32 %v1860_v24, %v4389_v20  ;;  %v1251_v37 = vpop.f32.mrf.mxu0  ;;  %v2764_v32 = vrot.slane %v2763_v62, 2  ;;  %v2772_v44 = vadd.f32 %v2771_v19, %v6757_v22  ;;  %v1862_v12 = vpop.f32.mrf.mxu1 }
 0x217   : > { %v2978_v27 = vadd.f32 %v2977_v17, %v2817_v61  ;;  %v2818_v4 = vmul.f32 %v1251_v37, %v4377_v10  ;;  %v2755_v3 = vrot.slane %v2754_v2, 2  ;;  %v2908_v39 = vrot.slane %v5868_v15, 4 }
 0x218   : > { %v2996_v51 = vadd.f32 %v2995_v13, %v2819_v58  ;;  %v2820_v47 = vmul.f32 %v1862_v12, %v4379_v11  ;;  %v1255_v18 = vpop.f32.mrf.mxu0  ;;  %v2721_v26 = vrot.slane %v2720_v31, 1  ;;  %v2926_v1 = vrot.slane %v5873_v41, 4  ;;  %v1866_v45 = vpop.f32.mrf.mxu1 }
 0x219   : > { %v2987_v21 = vadd.f32 %v2986_v42, %v2818_v4  ;;  %v2821_v24 = vmul.f32 %v1255_v18, %v4373_v7  ;;  %v2739_v8 = vrot.slane %v2738_v40, 1  ;;  %v5995_v22 = vadd.f32 %v2746_v25, %v2745_v59 }
 0x21a   : > { %v3005_v61 = vadd.f32 %v3004_v29, %v2820_v47  ;;  %v2823_v37 = vmul.f32 %v1866_v45, %v4375_v9  ;;  %v1257_v19 = vpop.f32.mrf.mxu0  ;;  %v5998_v17 = vadd.f32 %v2764_v32, %v2763_v62  ;;  %v2773_v13 = vrot.slane %v2772_v44, 2  ;;  %v1868_v38 = vpop.f32.mrf.mxu1 }
 0x21b   : > { %v6000_v58 = vadd.f32 %v2978_v27, %v2821_v24  ;;  %v2822_v12 = vmul.f32 %v1257_v19, %v4369_v5  ;;  %v6003_v16 = vadd.f32 %v2755_v3, %v2754_v2  ;;  %v2909_v42 = vadd.f32 %v2908_v39, %v5868_v15 }
 0x21c   : > { %v6006_v4 = vadd.f32 %v2996_v51, %v2823_v37  ;;  %v2824_v59 = vmul.f32 %v1868_v38, %v4371_v6  ;;  %v1261_v25 = vpop.f32.mrf.mxu0  ;;  %v6010_v29 = vadd.f32 %v2712_v23, %v5945_v36  ;;  %v2927_v62 = vadd.f32 %v2926_v1, %v5873_v41  ;;  %v1872_v47 = vpop.f32.mrf.mxu1 }
 0x21d   : > { %v2917_v32 = vrot.slane %v5887_v50, 4  ;;  %v6014_v27 = vadd.f32 %v2987_v21, %v2822_v12  ;;  %v6017_v2 = vadd.f32 %v2730_v63, %v5970_v30  ;;  %v2935_v15 = vrot.slane %v5894_v33, 4 }
 0x21e   : > { %6758 = vst [vmem:[#allocation48_spill] sm:$0xff] %v6010_v29  ;;  %v2944_v3 = vrot.slane %v5933_v0, 4  ;;  %v6021_v39 = vadd.f32 %v3005_v61, %v2824_v59  ;;  %v1263_v38 = vpop.f32.mrf.mxu0  ;;  %v6023_v51 = vadd.f32 %v2721_v26, %v2720_v31  ;;  %v6025_v36 = vadd.f32 %v2739_v8, %v2738_v40  ;;  %v1874_v18 = vpop.f32.mrf.mxu1 }
 0x21f   : > { %6759 = vst [vmem:[#allocation51_spill] sm:$0xff] %v6017_v2  ;;  %v6030_v30 = vadd.f32 %v2773_v13, %v2772_v44  ;;  %v2910_v63 = vrot.slane %v2909_v42, 2  ;;  %v2962_v21 = vrot.slane %v5937_v46, 4  ;;  %v2928_v45 = vrot.slane %v2927_v62, 2 }
 0x220   : > { %6760 = vst [vmem:[#allocation62_spill] sm:$0xff] %v6023_v51  ;;  %6761 = vst [vmem:[#allocation63_spill] sm:$0xff] %v6025_v36  ;;  %v1267_v24 = vpop.f32.mrf.mxu0  ;;  %v2918_v61 = vadd.f32 %v2917_v32, %v5887_v50  ;;  %v2825_v31 = vmul.f32 %v1261_v25, %v4422_v56  ;;  %v1878_v26 = vpop.f32.mrf.mxu1  ;;  %v2936_v8 = vadd.f32 %v2935_v15, %v5894_v33  ;;  %v2953_v12 = vrot.slane %v5948_v28, 4 }
 0x221   : > { %v2829_v40 = vmul.f32 %v1267_v24, %v4409_v49  ;;  %v2945_v37 = vadd.f32 %v2944_v3, %v5933_v0  ;;  %v2827_v19 = vmul.f32 %v1872_v47, %v4428_v60  ;;  %v2831_v44 = vmul.f32 %v1878_v26, %v4415_v52 }
 0x222   : > { %v1269_v13 = vpop.f32.mrf.mxu0  ;;  %v2826_v59 = vmul.f32 %v1263_v38, %v4417_v53  ;;  %v1880_v25 = vpop.f32.mrf.mxu1  ;;  %v2963_v32 = vadd.f32 %v2962_v21, %v5937_v46  ;;  %v2828_v24 = vmul.f32 %v1874_v18, %v4419_v54  ;;  %v6046_v47 = vadd.f32 %v2910_v63, %v2909_v42 }
 0x223   : > { %v3013_v1 = vadd.f32 %v2829_v40, %v2825_v31  ;;  %v2830_v50 = vmul.f32 %v1269_v13, %v4403_v35  ;;  %v3031_v33 = vadd.f32 %v2831_v44, %v2827_v19  ;;  %v2832_v0 = vmul.f32 %v1880_v25, %v4405_v43 }
 0x224   : > { %v1273_v15 = vpop.f32.mrf.mxu0  ;;  %v2971_v3 = vrot.slane %v5957_v48, 4  ;;  %v1884_v38 = vpop.f32.mrf.mxu1  ;;  %v6050_v31 = vadd.f32 %v2928_v45, %v2927_v62  ;;  %v2919_v40 = vrot.slane %v2918_v61, 2  ;;  %v2937_v18 = vrot.slane %v2936_v8, 2 }
 0x225   : > { %v3022_v26 = vadd.f32 %v2830_v50, %v2826_v59  ;;  %v2833_v23 = vmul.f32 %v1273_v15, %v4383_v14  ;;  %v3040_v13 = vadd.f32 %v2832_v0, %v2828_v24  ;;  %v2835_v46 = vmul.f32 %v1884_v38, %v4389_v20 }
 0x226   : > { %v1275_v21 = vpop.f32.mrf.mxu0  ;;  %v2946_v19 = vrot.slane %v2945_v37, 2  ;;  %v1886_v42 = vpop.f32.mrf.mxu1  ;;  %v2964_v63 = vrot.slane %v2963_v32, 2  ;;  %v2954_v41 = vadd.f32 %v2953_v12, %v5948_v28  ;;  %v2972_v62 = vadd.f32 %v2971_v3, %v5957_v48 }
 0x227   : > { %v3014_v44 = vadd.f32 %v3013_v1, %v2833_v23  ;;  %v2834_v25 = vmul.f32 %v1275_v21, %v4377_v10  ;;  %v3032_v59 = vadd.f32 %v3031_v33, %v2835_v46  ;;  %v2836_v50 = vmul.f32 %v1886_v42, %v4379_v11 }
 0x228   : > { %v1279_v15 = vpop.f32.mrf.mxu0  ;;  %v2980_v45 = vrot.slane %v6000_v58, 4  ;;  %v1890_v38 = vpop.f32.mrf.mxu1  ;;  %v2920_v36 = vadd.f32 %v2919_v40, %v2918_v61  ;;  %v2998_v23 = vrot.slane %v6006_v4, 4  ;;  %v2938_v28 = vadd.f32 %v2937_v18, %v2936_v8 }
 0x229   : > { %v3023_v24 = vadd.f32 %v3022_v26, %v2834_v25  ;;  %v2837_v0 = vmul.f32 %v1279_v15, %v4373_v7  ;;  %v3041_v1 = vadd.f32 %v3040_v13, %v2836_v50  ;;  %v2839_v21 = vmul.f32 %v1890_v38, %v4375_v9 }
 0x22a   : > { %v1281_v51 = vpop.f32.mrf.mxu0  ;;  %v2947_v12 = vadd.f32 %v2946_v19, %v2945_v37  ;;  %v1892_v42 = vpop.f32.mrf.mxu1  ;;  %v2965_v48 = vadd.f32 %v2964_v63, %v2963_v32  ;;  %v2955_v3 = vrot.slane %v2954_v41, 2  ;;  %v2973_v61 = vrot.slane %v2972_v62, 2 }
 0x22b   : > { %v3015_v33 = vadd.f32 %v3014_v44, %v2837_v0  ;;  %v2838_v46 = vmul.f32 %v1281_v51, %v4369_v5  ;;  %v6062_v2 = vadd.f32 %v3032_v59, %v2839_v21  ;;  %v2840_v26 = vmul.f32 %v1892_v42, %v4371_v6 }
 0x22c   : > { %v1285_v25 = vpop.f32.mrf.mxu0  ;;  %v2981_v40 = vadd.f32 %v2980_v45, %v6000_v58  ;;  %v2989_v13 = vrot.slane %v6014_v27, 4  ;;  %v1896_v8 = vpop.f32.mrf.mxu1  ;;  %v2775_v37 = vrot.slane %v6030_v30, 1  ;;  %v2999_v51 = vadd.f32 %v2998_v23, %v6006_v4 }
 0x22d   : > { %v6067_v50 = vadd.f32 %v3023_v24, %v2838_v46  ;;  %v3007_v32 = vrot.slane %v6021_v39, 4  ;;  %v6072_v18 = vadd.f32 %v3041_v1, %v2840_v26  ;;  %v6762_v44 = vrot.slane %v5995_v22, 1 }
 0x22e   : > { %v1287_v19 = vpop.f32.mrf.mxu0  ;;  %v2912_v58 = vrot.slane %v6046_v47, 1  ;;  %v2930_v59 = vrot.slane %v6050_v31, 1  ;;  %v2921_v15 = vrot.slane %v2920_v36, 1  ;;  %v6081_v45 = vpop.f32.mrf.mxu1  ;;  %v2939_v24 = vrot.slane %v2938_v28, 1 }
 0x22f   : > { %v6077_v63 = vadd.f32 %v6762_v44, %v5995_v22  ;;  %v2948_v0 = vrot.slane %v2947_v12, 1  ;;  %v2966_v4 = vrot.slane %v2965_v48, 1  ;;  %v6083_v38 = vadd.f32 %v2955_v3, %v2954_v41 }
 0x230   : > { %v1291_v23 = vpop.f32.mrf.mxu0  ;;  %v6764_v1 = vrot.slane %v5998_v17, 1  ;;  %v6090_v22 = vadd.f32 %v2973_v61, %v2972_v62  ;;  %v2982_v46 = vrot.slane %v2981_v40, 2  ;;  %v2990_v42 = vadd.f32 %v2989_v13, %v6014_v27  ;;  %v1902_v26 = vpop.f32.mrf.mxu1 }
 0x231   : > { %6763 = vst [vmem:[#allocation64_spill] sm:$0xff] %v6077_v63  ;;  %v6765_v44 = vrot.slane %v6003_v16, 1  ;;  %v6099_v41 = vadd.f32 %v2775_v37, %v6030_v30  ;;  %v3000_v3 = vrot.slane %v2999_v51, 2  ;;  %v3008_v29 = vadd.f32 %v3007_v32, %v6021_v39 }
 0x232   : > { %v6088_v21 = vadd.f32 %v6764_v1, %v5998_v17  ;;  %v1293_v57 = vpop.f32.mrf.mxu0  ;;  %v6103_v17 = vadd.f32 %v2912_v58, %v6046_v47  ;;  %v6106_v62 = vadd.f32 %v2930_v59, %v6050_v31  ;;  %v6108_v27 = vadd.f32 %v2921_v15, %v2920_v36  ;;  %v1904_v13 = vpop.f32.mrf.mxu1 }
 0x233   : > { %v6096_v63 = vadd.f32 %v6765_v44, %v6003_v16  ;;  %6767 = vst [vmem:[#allocation66_spill] sm:$0xff] %v6099_v41  ;;  %v3016_v61 = vrot.slane %v3015_v33, 4  ;;  %v6110_v1 = vadd.f32 %v2939_v24, %v2938_v28  ;;  %v6112_v16 = vadd.f32 %v2948_v0, %v2947_v12 }
 0x234   : > { %6768 = vst [vmem:[#allocation67_spill] sm:$0xff] %v6103_v17  ;;  %6769 = vst [vmem:[#allocation68_spill] sm:$0xff] %v6106_v62  ;;  %v6114_v30 = vadd.f32 %v2966_v4, %v2965_v48  ;;  %v2957_v37 = vrot.slane %v6083_v38, 1  ;;  %v1297_v39 = vpop.f32.mrf.mxu0  ;;  %v2975_v32 = vrot.slane %v6090_v22, 1  ;;  %v2983_v47 = vadd.f32 %v2982_v46, %v2981_v40  ;;  %v1908_v59 = vpop.f32.mrf.mxu1 }
 0x235   : > { %6766 = vst [vmem:[#allocation65_spill] sm:$0xff] %v6096_v63  ;;  %6770 = vst [vmem:[#allocation69_spill] sm:$0xff] %v6108_v27  ;;  %v2991_v58 = vrot.slane %v2990_v42, 2  ;;  %v2845_v31 = vmul.f32 %v1291_v23, %v4409_v49  ;;  %v3001_v36 = vadd.f32 %v3000_v3, %v2999_v51  ;;  %v3009_v15 = vrot.slane %v3008_v29, 2 }
 0x236   : > { %6771 = vst [vmem:[#allocation70_spill] sm:$0xff] %v6110_v1  ;;  %6772 = vst [vmem:[#allocation71_spill] sm:$0xff] %v6112_v16  ;;  %v3034_v44 = vrot.slane %v6062_v2, 4  ;;  %v2847_v28 = vmul.f32 %v1902_v26, %v4415_v52  ;;  %v1299_v12 = vpop.f32.mrf.mxu0  ;;  %v3017_v24 = vadd.f32 %v3016_v61, %v3015_v33  ;;  %v3025_v48 = vrot.slane %v6067_v50, 4  ;;  %v1910_v1 = vpop.f32.mrf.mxu1 }
 0x237   : > { %6773 = vst [vmem:[#allocation72_spill] sm:$0xff] %v6114_v30  ;;  %v2841_v0 = vmul.f32 %v1285_v25, %v4422_v56  ;;  %v2849_v4 = vmul.f32 %v1297_v39, %v4383_v14  ;;  %v3043_v40 = vrot.slane %v6072_v18, 4  ;;  %v2843_v23 = vmul.f32 %v1896_v8, %v4428_v60 }
 0x238   : > { %v2846_v51 = vmul.f32 %v1293_v57, %v4403_v35  ;;  %v2851_v46 = vmul.f32 %v1908_v59, %v4389_v20  ;;  %v1303_v3 = vpop.f32.mrf.mxu0  ;;  %v2984_v27 = vrot.slane %v2983_v47, 1  ;;  %v2842_v26 = vmul.f32 %v1287_v19, %v4417_v53  ;;  %v1914_v30 = vpop.f32.mrf.mxu1 }
 0x239   : > { %v3049_v33 = vadd.f32 %v2845_v31, %v2841_v0  ;;  %v2853_v61 = vmul.f32 %v1303_v3, %v4373_v7  ;;  %v3035_v25 = vadd.f32 %v3034_v44, %v6062_v2  ;;  %v3067_v39 = vadd.f32 %v2847_v28, %v2843_v23 }
 0x23a   : > { %v2850_v62 = vmul.f32 %v1299_v12, %v4377_v10  ;;  %v2855_v16 = vmul.f32 %v1914_v30, %v4375_v9  ;;  %v1305_v8 = vpop.f32.mrf.mxu0  ;;  %v3018_v17 = vrot.slane %v3017_v24, 2  ;;  %v3026_v57 = vadd.f32 %v3025_v48, %v6067_v50  ;;  %v1916_v63 = vpop.f32.mrf.mxu1 }
 0x23b   : > { %v2848_v59 = vmul.f32 %v1904_v13, %v4405_v43  ;;  %v3050_v41 = vadd.f32 %v3049_v33, %v2849_v4  ;;  %v3044_v19 = vadd.f32 %v3043_v40, %v6072_v18  ;;  %v3058_v31 = vadd.f32 %v2846_v51, %v2842_v26 }
 0x23c   : > { %v3068_v0 = vadd.f32 %v3067_v39, %v2851_v46  ;;  %v2854_v3 = vmul.f32 %v1305_v8, %v4369_v5  ;;  %v1309_v2 = vpop.f32.mrf.mxu0  ;;  %v6137_v44 = vadd.f32 %v2991_v58, %v2990_v42  ;;  %v2844_v30 = vmul.f32 %v6081_v45, %v4419_v54  ;;  %v1920_v50 = vpop.f32.mrf.mxu1 }
 0x23d   : > { %v2852_v28 = vmul.f32 %v1910_v1, %v4379_v11  ;;  %v3051_v12 = vadd.f32 %v3050_v41, %v2853_v61  ;;  %v3002_v48 = vrot.slane %v3001_v36, 1  ;;  %v6142_v13 = vadd.f32 %v3009_v15, %v3008_v29 }
 0x23e   : > { %v3059_v4 = vadd.f32 %v3058_v31, %v2850_v62  ;;  %v3069_v23 = vadd.f32 %v3068_v0, %v2855_v16  ;;  %v1311_v18 = vpop.f32.mrf.mxu0  ;;  %v6144_v40 = vadd.f32 %v3018_v17, %v3017_v24  ;;  %v3036_v51 = vrot.slane %v3035_v25, 2  ;;  %v1922_v58 = vpop.f32.mrf.mxu1 }
 0x23f   : > { %v3076_v46 = vadd.f32 %v2848_v59, %v2844_v30  ;;  %v2856_v42 = vmul.f32 %v1916_v63, %v4371_v6  ;;  %v6148_v26 = vadd.f32 %v2957_v37, %v6083_v38  ;;  %v3027_v45 = vrot.slane %v3026_v57, 2 }
 0x240   : > { %v3045_v1 = vrot.slane %v3044_v19, 2  ;;  %v3060_v41 = vadd.f32 %v3059_v4, %v2854_v3  ;;  %v1315_v33 = vpop.f32.mrf.mxu0  ;;  %v6151_v29 = vadd.f32 %v2975_v32, %v6090_v22  ;;  %v6153_v62 = vadd.f32 %v2984_v27, %v2983_v47  ;;  %v1926_v15 = vpop.f32.mrf.mxu1 }
 0x241   : > { %6774 = vst [vmem:[#allocation73_spill] sm:$0xff] %v6148_v26  ;;  %v3077_v16 = vadd.f32 %v3076_v46, %v2852_v28  ;;  %v3052_v17 = vrot.slane %v3051_v12, 4  ;;  %v6155_v24 = vadd.f32 %v3002_v48, %v3001_v36  ;;  %v2993_v63 = vrot.slane %v6137_v44, 1 }
 0x242   : > { %6775 = vst [vmem:[#allocation74_spill] sm:$0xff] %v6151_v29  ;;  %v3070_v38 = vrot.slane %v3069_v23, 4  ;;  %v1317_v37 = vpop.f32.mrf.mxu0  ;;  %v6160_v8 = vadd.f32 %v3036_v51, %v3035_v25  ;;  %v2861_v22 = vmul.f32 %v1315_v33, %v4409_v49  ;;  %v1928_v27 = vpop.f32.mrf.mxu1  ;;  %v6163_v32 = vadd.f32 %v3027_v45, %v3026_v57 }
 0x243   : > { %v3078_v59 = vadd.f32 %v3077_v16, %v2856_v42  ;;  %v6165_v47 = vadd.f32 %v3045_v1, %v3044_v19  ;;  %v3061_v36 = vrot.slane %v3060_v41, 4  ;;  %v2863_v31 = vmul.f32 %v1926_v15, %v4415_v52 }
 0x244   : > { %v1321_v0 = vpop.f32.mrf.mxu0  ;;  %v3053_v3 = vadd.f32 %v3052_v17, %v3051_v12  ;;  %v2857_v30 = vmul.f32 %v1309_v2, %v4422_v56  ;;  %v2862_v28 = vmul.f32 %v1317_v37, %v4403_v35  ;;  %v1932_v48 = vpop.f32.mrf.mxu1  ;;  %v3071_v4 = vadd.f32 %v3070_v38, %v3069_v23 }
 0x245   : > { %v2865_v25 = vmul.f32 %v1321_v0, %v4383_v14  ;;  %v2859_v51 = vmul.f32 %v1920_v50, %v4428_v60  ;;  %v2864_v57 = vmul.f32 %v1928_v27, %v4405_v43  ;;  %v2867_v19 = vmul.f32 %v1932_v48, %v4389_v20 }
 0x246   : > { %v1323_v46 = vpop.f32.mrf.mxu0  ;;  %v3079_v42 = vrot.slane %v3078_v59, 4  ;;  %v2858_v45 = vmul.f32 %v1311_v18, %v4417_v53  ;;  %v3085_v1 = vadd.f32 %v2861_v22, %v2857_v30  ;;  %v1934_v2 = vpop.f32.mrf.mxu1  ;;  %v3062_v33 = vadd.f32 %v3061_v36, %v3060_v41 }
 0x247   : > { %v2866_v12 = vmul.f32 %v1323_v46, %v4377_v10  ;;  %v2860_v16 = vmul.f32 %v1922_v58, %v4419_v54  ;;  %v3103_v17 = vadd.f32 %v2863_v31, %v2859_v51  ;;  %v2868_v23 = vmul.f32 %v1934_v2, %v4379_v11 }
 0x248   : > { %v1327_v15 = vpop.f32.mrf.mxu0  ;;  %v3054_v50 = vrot.slane %v3053_v3, 2  ;;  %v3094_v38 = vadd.f32 %v2862_v28, %v2858_v45  ;;  %v3086_v37 = vadd.f32 %v3085_v1, %v2865_v25  ;;  %v1938_v0 = vpop.f32.mrf.mxu1  ;;  %v3072_v48 = vrot.slane %v3071_v4, 2 }
 0x249   : > { %v2869_v27 = vmul.f32 %v1327_v15, %v4373_v7  ;;  %v3112_v39 = vadd.f32 %v2864_v57, %v2860_v16  ;;  %v3104_v18 = vadd.f32 %v3103_v17, %v2867_v19  ;;  %v2871_v22 = vmul.f32 %v1938_v0, %v4375_v9 }
 0x24a   : > { %v1329_v30 = vpop.f32.mrf.mxu0  ;;  %v3080_v46 = vadd.f32 %v3079_v42, %v3078_v59  ;;  %v3095_v41 = vadd.f32 %v3094_v38, %v2866_v12  ;;  %v1940_v31 = vpop.f32.mrf.mxu1  ;;  %v3063_v51 = vrot.slane %v3062_v33, 2  ;;  %v3038_v45 = vrot.slane %v6160_v8, 1 }
 0x24b   : > { %v3087_v36 = vadd.f32 %v3086_v37, %v2869_v27  ;;  %v2870_v58 = vmul.f32 %v1329_v30, %v4369_v5  ;;  %v3113_v2 = vadd.f32 %v3112_v39, %v2868_v23  ;;  %v3105_v61 = vadd.f32 %v3104_v18, %v2871_v22 }
 0x24c   : > { %v2872_v28 = vmul.f32 %v1940_v31, %v4371_v6  ;;  %v1333_v25 = vpop.f32.mrf.mxu0  ;;  %v3029_v57 = vrot.slane %v6163_v32, 1  ;;  %v1944_v16 = vpop.f32.mrf.mxu1  ;;  %v3047_v59 = vrot.slane %v6165_v47, 1  ;;  %v6185_v42 = vadd.f32 %v3054_v50, %v3053_v3 }
 0x24d   : > { %v3088_v19 = vrot.slane %v3087_v36, 4  ;;  %v3096_v1 = vadd.f32 %v3095_v41, %v2870_v58  ;;  %v3106_v12 = vrot.slane %v3105_v61, 4  ;;  %v6187_v38 = vadd.f32 %v3072_v48, %v3071_v4 }
 0x24e   : > { %v3114_v17 = vadd.f32 %v3113_v2, %v2872_v28  ;;  %v1335_v15 = vpop.f32.mrf.mxu0  ;;  %v3081_v39 = vrot.slane %v3080_v46, 2  ;;  %v1946_v27 = vpop.f32.mrf.mxu1  ;;  %v6192_v0 = vadd.f32 %v2993_v63, %v6137_v44  ;;  %v6194_v18 = vadd.f32 %v3063_v51, %v3062_v33 }
 0x24f   : > { %v3089_v23 = vadd.f32 %v3088_v19, %v3087_v36  ;;  %v3097_v37 = vrot.slane %v3096_v1, 4  ;;  %v3107_v22 = vadd.f32 %v3106_v12, %v3105_v61  ;;  %v6777_v50 = vrot.slane %v6142_v13, 1 }
 0x250   : > { %6776 = vst [vmem:[#allocation75_spill] sm:$0xff] %v6192_v0  ;;  %v3115_v30 = vrot.slane %v3114_v17, 4  ;;  %v1339_v3 = vpop.f32.mrf.mxu0  ;;  %v6779_v4 = vrot.slane %v6144_v40, 1  ;;  %v6207_v36 = vadd.f32 %v3038_v45, %v6160_v8  ;;  %v1950_v63 = vpop.f32.mrf.mxu1  ;;  %v6210_v33 = vadd.f32 %v3029_v57, %v6163_v32 }
 0x251   : > { %v6199_v41 = vadd.f32 %v6777_v50, %v6142_v13  ;;  %v3098_v44 = vadd.f32 %v3097_v37, %v3096_v1  ;;  %v6213_v61 = vadd.f32 %v3047_v59, %v6165_v47  ;;  %v3056_v58 = vrot.slane %v6185_v42, 1 }
 0x252   : > { %v6204_v48 = vadd.f32 %v6779_v4, %v6144_v40  ;;  %6780 = vst [vmem:[#allocation77_spill] sm:$0xff] %v6207_v36  ;;  %6781 = vst [vmem:[#allocation78_spill] sm:$0xff] %v6210_v33  ;;  %v3116_v13 = vadd.f32 %v3115_v30, %v3114_v17  ;;  %v1341_v31 = vpop.f32.mrf.mxu0  ;;  %v3074_v51 = vrot.slane %v6187_v38, 1  ;;  %v3082_v2 = vadd.f32 %v3081_v39, %v3080_v46  ;;  %v1952_v8 = vpop.f32.mrf.mxu1 }
 0x253   : > { %6778 = vst [vmem:[#allocation76_spill] sm:$0xff] %v6199_v41  ;;  %6782 = vst [vmem:[#allocation79_spill] sm:$0xff] %v6213_v61  ;;  %v3090_v40 = vrot.slane %v3089_v23, 2  ;;  %v2877_v28 = vmul.f32 %v1339_v3, %v4409_v49  ;;  %v3065_v45 = vrot.slane %v6194_v18, 1  ;;  %v3108_v19 = vrot.slane %v3107_v22, 2 }
 0x254   : > { %v3099_v1 = vrot.slane %v3098_v44, 2  ;;  %v2879_v32 = vmul.f32 %v1950_v63, %v4415_v52  ;;  %v1345_v57 = vpop.f32.mrf.mxu0  ;;  %v3117_v47 = vrot.slane %v3116_v13, 2  ;;  %v2873_v59 = vmul.f32 %v1333_v25, %v4422_v56  ;;  %v1956_v37 = vpop.f32.mrf.mxu1 }
 0x255   : > { %v2878_v12 = vmul.f32 %v1341_v31, %v4403_v35  ;;  %v2881_v17 = vmul.f32 %v1345_v57, %v4383_v14  ;;  %v2875_v46 = vmul.f32 %v1944_v16, %v4428_v60  ;;  %v2874_v39 = vmul.f32 %v1335_v15, %v4417_v53 }
 0x256   : > { %v2880_v30 = vmul.f32 %v1952_v8, %v4405_v43  ;;  %v2883_v3 = vmul.f32 %v1956_v37, %v4389_v20  ;;  %v1347_v50 = vpop.f32.mrf.mxu0  ;;  %v3091_v4 = vadd.f32 %v3090_v40, %v3089_v23  ;;  %v2876_v63 = vmul.f32 %v1946_v27, %v4419_v54  ;;  %v1958_v41 = vpop.f32.mrf.mxu1 }
 0x257   : > { %v3121_v61 = vadd.f32 %v2877_v28, %v2873_v59  ;;  %v2882_v25 = vmul.f32 %v1347_v50, %v4377_v10  ;;  %v3109_v31 = vadd.f32 %v3108_v19, %v3107_v22  ;;  %v3100_v29 = vadd.f32 %v3099_v1, %v3098_v44 }
 0x258   : > { %v3139_v57 = vadd.f32 %v2879_v32, %v2875_v46  ;;  %v2884_v33 = vmul.f32 %v1958_v41, %v4379_v11  ;;  %v1351_v16 = vpop.f32.mrf.mxu0  ;;  %v3118_v0 = vadd.f32 %v3117_v47, %v3116_v13  ;;  %v3130_v15 = vadd.f32 %v2878_v12, %v2874_v39  ;;  %v1962_v37 = vpop.f32.mrf.mxu1 }
 0x259   : > { %v3122_v26 = vadd.f32 %v3121_v61, %v2881_v17  ;;  %v2885_v8 = vmul.f32 %v1351_v16, %v4373_v7  ;;  %v3083_v36 = vrot.slane %v3082_v2, 1  ;;  %v3148_v23 = vadd.f32 %v2880_v30, %v2876_v63 }
 0x25a   : > { %v3140_v40 = vadd.f32 %v3139_v57, %v2883_v3  ;;  %v2887_v27 = vmul.f32 %v1962_v37, %v4375_v9  ;;  %v1353_v28 = vpop.f32.mrf.mxu0  ;;  %v3092_v59 = vrot.slane %v3091_v4, 1  ;;  %v3131_v50 = vadd.f32 %v3130_v15, %v2882_v25  ;;  %v1964_v19 = vpop.f32.mrf.mxu1 }
 0x25b   : > { %v3123_v22 = vadd.f32 %v3122_v26, %v2885_v8  ;;  %v2886_v44 = vmul.f32 %v1353_v28, %v4369_v5  ;;  %v3110_v41 = vrot.slane %v3109_v31, 1  ;;  %v3149_v1 = vadd.f32 %v3148_v23, %v2884_v33 }
 0x25c   : > { %v3141_v13 = vadd.f32 %v3140_v40, %v2887_v27  ;;  %v2888_v61 = vmul.f32 %v1964_v19, %v4371_v6  ;;  %v1357_v32 = vpop.f32.mrf.mxu0  ;;  %v3101_v47 = vrot.slane %v3100_v29, 1  ;;  %v3119_v12 = vrot.slane %v3118_v0, 1  ;;  %v1968_v39 = vpop.f32.mrf.mxu1 }
 0x25d   : > { %v3124_v17 = vrot.slane %v3123_v22, 4  ;;  %v3132_v46 = vadd.f32 %v3131_v50, %v2886_v44  ;;  %v6235_v30 = vadd.f32 %v3056_v58, %v6185_v42  ;;  %v6238_v3 = vadd.f32 %v3074_v51, %v6187_v38 }
 0x25e   : > { %v3142_v26 = vrot.slane %v3141_v13, 4  ;;  %v3150_v63 = vadd.f32 %v3149_v1, %v2888_v61  ;;  %v1359_v25 = vpop.f32.mrf.mxu0  ;;  %v6241_v33 = vadd.f32 %v3065_v45, %v6194_v18  ;;  %v6243_v57 = vadd.f32 %v3083_v36, %v3082_v2  ;;  %v1970_v8 = vpop.f32.mrf.mxu1 }
 0x25f   : > { %v3125_v16 = vadd.f32 %v3124_v17, %v3123_v22  ;;  %v3133_v15 = vrot.slane %v3132_v46, 4  ;;  %v6245_v37 = vadd.f32 %v3092_v59, %v3091_v4  ;;  %v6247_v23 = vadd.f32 %v3110_v41, %v3109_v31 }
 0x260   : > { %v3143_v42 = vadd.f32 %v3142_v26, %v3141_v13  ;;  %v3151_v58 = vrot.slane %v3150_v63, 4  ;;  %v1363_v40 = vpop.f32.mrf.mxu0  ;;  %v6249_v38 = vadd.f32 %v3101_v47, %v3100_v29  ;;  %v6251_v51 = vadd.f32 %v3119_v12, %v3118_v0  ;;  %v1974_v18 = vpop.f32.mrf.mxu1 }
 0x261   : > { %v3126_v27 = vrot.slane %v3125_v16, 2  ;;  %v3134_v28 = vadd.f32 %v3133_v15, %v3132_v46  ;;  %v2889_v2 = vmul.f32 %v1357_v32, %v4422_v56  ;;  %v2891_v50 = vmul.f32 %v1968_v39, %v4428_v60 }
 0x262   : > { %v3144_v45 = vrot.slane %v3143_v42, 2  ;;  %v3152_v36 = vadd.f32 %v3151_v58, %v3150_v63  ;;  %v1365_v4 = vpop.f32.mrf.mxu0  ;;  %v2890_v22 = vmul.f32 %v1359_v25, %v4417_v53  ;;  %v2893_v44 = vmul.f32 %v1363_v40, %v4409_v49  ;;  %v1976_v29 = vpop.f32.mrf.mxu1 }
 0x263   : > { %v3127_v59 = vadd.f32 %v3126_v27, %v3125_v16  ;;  %v3135_v31 = vrot.slane %v3134_v28, 2  ;;  %v2895_v41 = vmul.f32 %v1974_v18, %v4415_v52  ;;  %v2894_v61 = vmul.f32 %v1365_v4, %v4403_v35 }
 0x264   : > { %v3145_v19 = vadd.f32 %v3144_v45, %v3143_v42  ;;  %v3153_v0 = vrot.slane %v3152_v36, 2  ;;  %v1369_v1 = vpop.f32.mrf.mxu0  ;;  %v2896_v56 = vmul.f32 %v1976_v29, %v4405_v43  ;;  %v1980_v32 = vpop.f32.mrf.mxu1  ;;  %v2892_v39 = vmul.f32 %v1970_v8, %v4419_v54 }
 0x265   : > { %v3136_v13 = vadd.f32 %v3135_v31, %v3134_v28  ;;  %v2897_v60 = vmul.f32 %v1369_v1, %v4383_v14  ;;  %v3128_v47 = vrot.slane %v3127_v59, 1  ;;  %v2899_v53 = vmul.f32 %v1980_v32, %v4389_v20 }
 0x266   : > { %v3146_v12 = vrot.slane %v3145_v19, 1  ;;  %v3154_v17 = vadd.f32 %v3153_v0, %v3152_v36  ;;  %v1371_v49 = vpop.f32.mrf.mxu0  ;;  %v3157_v26 = vadd.f32 %v2893_v44, %v2889_v2  ;;  %v1982_v63 = vpop.f32.mrf.mxu1  ;;  %v3175_v35 = vadd.f32 %v2895_v41, %v2891_v50 }
 0x267   : > { %v3137_v46 = vrot.slane %v3136_v13, 1  ;;  %v2898_v52 = vmul.f32 %v1371_v49, %v4377_v10  ;;  %v2900_v43 = vmul.f32 %v1982_v63, %v4379_v11  ;;  %v4251_v14 = vmov 1966171168  }
 0x268   : > { %v3155_v25 = vrot.slane %v3154_v17, 1  ;;  %v1375_v16 = vpop.f32.mrf.mxu0  ;;  %v6265_v15 = vunpack.c.l.s4 %v4251_v14  ;;  %v3166_v42 = vadd.f32 %v2894_v61, %v2890_v22  ;;  %v3184_v58 = vadd.f32 %v2896_v56, %v2892_v39  ;;  %v1986_v27 = vpop.f32.mrf.mxu1 }
 0x269   : > { %v3158_v40 = vadd.f32 %v3157_v26, %v2897_v60  ;;  %v2901_v20 = vmul.f32 %v1375_v16, %v4373_v7  ;;  %v6268_v28 = vadd.f32 %v3128_v47, %v3127_v59  ;;  %v6270_v54 = vadd.f32 %v3146_v12, %v3145_v19  ;;  %v6783_v12 = vld [vmem:[#allocation19_spill] sm:$0xff]  ;;  %v6785_v26 = vld [vmem:[#allocation28_spill] sm:$0xff] }
 0x26a   : > { %v3176_v10 = vadd.f32 %v3175_v35, %v2899_v53  ;;  %v2903_v8 = vmul.f32 %v1986_v27, %v4375_v9  ;;  %v1377_v18 = vpop.f32.mrf.mxu0  ;;  %v6273_v45 = vadd.f32 %v3137_v46, %v3136_v13  ;;  %v3167_v11 = vadd.f32 %v3166_v42, %v2898_v52  ;;  %v1988_v50 = vpop.f32.mrf.mxu1  ;;  %v6784_v46 = vld [vmem:[#allocation25_spill] sm:$0xff]  ;;  %v6786_v35 = vld [vmem:[#allocation32_spill] sm:$0xff]  ;;  %v6789_v27 = vld [vmem:[#allocation39_spill] sm:$0xff] }
 0x26b   : > { %v3159_v36 = vadd.f32 %v3158_v40, %v2901_v20  ;;  %v2902_v2 = vmul.f32 %v1377_v18, %v4369_v5  ;;  %v6276_v4 = vadd.f32 %v3155_v25, %v3154_v17  ;;  %v3185_v7 = vadd.f32 %v3184_v58, %v2900_v43  ;;  %v6787_v16 = vld [vmem:[#allocation12_spill] sm:$0xff]  ;;  %v6788_v40 = vld [vmem:[#allocation35_spill] sm:$0xff] }
 0x26c   : > { %v3177_v31 = vadd.f32 %v3176_v10, %v2903_v8  ;;  %v2904_v59 = vmul.f32 %v1988_v50, %v4371_v6  ;;  %v1381_v22 = vpop.f32.mrf.mxu0 }
 0x26d   : > { %v3160_v44 = vrot.slane %v3159_v36, 4  ;;  %v3168_v29 = vadd.f32 %v3167_v11, %v2902_v2  ;;  %v3197_v9 = vrot.slane %v1381_v22, 1  ;;  %v3201_v19 = vrot.slane %v1381_v22, 2  ;;  %v6790_v11 = vld [vmem:[#allocation43_spill] sm:$0xff] }
 0x26e   : > { %v3178_v0 = vrot.slane %v3177_v31, 4  ;;  %v3186_v41 = vadd.f32 %v3185_v7, %v2904_v59  ;;  %v3205_v1 = vrot.slane %v1381_v22, 3  ;;  %v3209_v13 = vrot.slane %v1381_v22, 4 }
 0x26f   : > { %v3161_v5 = vadd.f32 %v3160_v44, %v3159_v36  ;;  %v3169_v61 = vrot.slane %v3168_v29, 4  ;;  %v3213_v56 = vrot.slane %v1381_v22, 5  ;;  %v3217_v60 = vrot.slane %v1381_v22, 6 }
 0x270   : > { %v3179_v32 = vadd.f32 %v3178_v0, %v3177_v31  ;;  %v3187_v47 = vrot.slane %v3186_v41, 4  ;;  %v3221_v6 = vrot.slane %v1381_v22, 7  ;;  %v3257_v17 = vmul.f32 %v6783_v12, %v1381_v22 }
 0x271   : > { %v3162_v53 = vrot.slane %v3161_v5, 2  ;;  %v3170_v49 = vadd.f32 %v3169_v61, %v3168_v29  ;;  %v3261_v39 = vmul.f32 %v3197_v9, %v6784_v46  ;;  %v3265_v52 = vmul.f32 %v3201_v19, %v6785_v26  ;;  %v1992_v19 = vpop.f32.mrf.mxu1 }
 0x272   : > { %v3180_v63 = vrot.slane %v3179_v32, 2  ;;  %v3188_v25 = vadd.f32 %v3187_v47, %v3186_v41  ;;  %v3269_v43 = vmul.f32 %v3205_v1, %v6786_v35  ;;  %v3273_v14 = vmul.f32 %v3209_v13, %v6787_v16 }
 0x273   : > { %v3163_v42 = vadd.f32 %v3162_v53, %v3161_v5  ;;  %v3171_v58 = vrot.slane %v3170_v49, 2  ;;  %v3277_v20 = vmul.f32 %v3213_v56, %v6788_v40  ;;  %v3281_v10 = vmul.f32 %v3217_v60, %v6789_v27 }
 0x274   : > { %v3181_v8 = vadd.f32 %v3180_v63, %v3179_v32  ;;  %v3189_v18 = vrot.slane %v3188_v25, 2  ;;  %v6287_v36 = vmul.f32 %v3221_v6, %v6790_v11  ;;  %v3321_v2 = vrot.slane %v3261_v39, 7 }
 0x275   : > { %v3164_v50 = vrot.slane %v3163_v42, 1  ;;  %v3172_v7 = vadd.f32 %v3171_v58, %v3170_v49  ;;  %v3324_v31 = vrot.slane %v3265_v52, 6  ;;  %v3327_v59 = vrot.slane %v3269_v43, 5  ;;  %v6791_v43 = vld [vmem:[#allocation20_spill] sm:$0xff]  ;;  %v6793_v58 = vld [vmem:[#allocation29_spill] sm:$0xff] }
 0x276   : > { %v3182_v22 = vrot.slane %v3181_v8, 1  ;;  %v3190_v44 = vadd.f32 %v3189_v18, %v3188_v25  ;;  %v3323_v29 = vsel %vm3322_vm1, %v3321_v2, %v3257_v17  ;;  %v3330_v9 = vrot.slane %v3273_v14, 4  ;;  %v1383_v25 = vpop.f32.mrf.mxu0  ;;  %v6792_v14 = vld [vmem:[#allocation26_spill] sm:$0xff]  ;;  %v6796_v18 = vld [vmem:[#allocation36_spill] sm:$0xff] }
 0x277   : > { %v6290_v0 = vadd.f32 %v3164_v50, %v3163_v42  ;;  %v3173_v41 = vrot.slane %v3172_v7, 1  ;;  %v3326_v1 = vsel %vm3325_vm2, %v3324_v31, %v3323_v29  ;;  %v3333_v13 = vrot.slane %v3277_v20, 3  ;;  %v6794_v20 = vld [vmem:[#allocation33_spill] sm:$0xff]  ;;  %v6797_v2 = vld [vmem:[#allocation40_spill] sm:$0xff] }
 0x278   : > { %v6293_v5 = vadd.f32 %v3182_v22, %v3181_v8  ;;  %v3191_v61 = vrot.slane %v3190_v44, 1  ;;  %v3329_v56 = vsel %vm3328_vm3, %v3327_v59, %v3326_v1  ;;  %v3336_v60 = vrot.slane %v3281_v10, 2  ;;  %v6795_v10 = vld [vmem:[#allocation13_spill] sm:$0xff] }
 0x279   : > { %v6296_v32 = vadd.f32 %v3173_v41, %v3172_v7  ;;  %v3332_v47 = vsel %vm3331_vm4, %v3330_v9, %v3329_v56  ;;  %v3339_v6 = vrot.slane %v6287_v36, 1  ;;  %v3199_v12 = vrot.slane %v1992_v19, 1  ;;  %v6798_v7 = vld [vmem:[#allocation44_spill] sm:$0xff] }
 0x27a   : > { %v6300_v17 = vadd.f32 %v3191_v61, %v3190_v44  ;;  %v3335_v53 = vsel %vm3334_vm5, %v3333_v13, %v3332_v47  ;;  %v3203_v49 = vrot.slane %v1992_v19, 2  ;;  %v3207_v46 = vrot.slane %v1992_v19, 3  ;;  %v6842_v13 = vld [vmem:[#allocation63_spill] sm:$0xff] }
 0x27b   : > { %v6304_v39 = vsel %vm3337_vm6, %v3336_v60, %v3335_v53  ;;  %v3211_v26 = vrot.slane %v1992_v19, 4  ;;  %v3215_v52 = vrot.slane %v1992_v19, 5  ;;  %v3219_v63 = vrot.slane %v1992_v19, 6 }
 0x27c   : > { %v3223_v35 = vrot.slane %v1992_v19, 7  ;;  %v3259_v16 = vmul.f32 %v6791_v43, %v1992_v19  ;;  %v3263_v42 = vmul.f32 %v3199_v12, %v6792_v14  ;;  %v3267_v40 = vmul.f32 %v3203_v49, %v6793_v58  ;;  %v6801_v14 = vld [vmem:[#allocation30_spill] sm:$0xff] }
 0x27d   : > { %v3271_v27 = vmul.f32 %v3207_v46, %v6794_v20  ;;  %v3275_v8 = vmul.f32 %v3211_v26, %v6795_v10  ;;  %v3279_v11 = vmul.f32 %v3215_v52, %v6796_v18  ;;  %v3283_v50 = vmul.f32 %v3219_v63, %v6797_v2  ;;  %v6799_v26 = vld [vmem:[#allocation22_spill] sm:$0xff]  ;;  %v6800_v63 = vld [vmem:[#allocation27_spill] sm:$0xff]  ;;  %v6804_v10 = vld [vmem:[#allocation37_spill] sm:$0xff] }
 0x27e   : > { %v6314_v31 = vmul.f32 %v3223_v35, %v6798_v7  ;;  %v3356_v59 = vrot.slane %v3263_v42, 7  ;;  %v3358_v22 = vrot.slane %v3267_v40, 6  ;;  %v3198_v44 = vrot.slane %v1383_v25, 1  ;;  %v6802_v42 = vld [vmem:[#allocation10_spill] sm:$0xff]  ;;  %v6805_v18 = vld [vmem:[#allocation17_spill] sm:$0xff] }
 0x27f   : > { %v3360_v29 = vrot.slane %v3271_v27, 5  ;;  %v3362_v9 = vrot.slane %v3275_v8, 4  ;;  %v3364_v19 = vrot.slane %v3279_v11, 3  ;;  %v3366_v41 = vrot.slane %v3283_v50, 2  ;;  %v6803_v40 = vld [vmem:[#allocation14_spill] sm:$0xff]  ;;  %v6806_v2 = vld [vmem:[#allocation21_spill] sm:$0xff] }
 0x280   : > { %v3357_v1 = vsel %vm3322_vm1, %v3356_v59, %v3259_v16  ;;  %v3202_v61 = vrot.slane %v1383_v25, 2  ;;  %v3206_v56 = vrot.slane %v1383_v25, 3  ;;  %v3210_v47 = vrot.slane %v1383_v25, 4 }
 0x281   : > { %v3359_v60 = vsel %vm3325_vm2, %v3358_v22, %v3357_v1  ;;  %v3214_v12 = vrot.slane %v1383_v25, 5  ;;  %v3218_v53 = vrot.slane %v1383_v25, 6  ;;  %v3222_v46 = vrot.slane %v1383_v25, 7 }
 0x282   : > { %v3361_v49 = vsel %vm3328_vm3, %v3360_v29, %v3359_v60  ;;  %v3258_v52 = vmul.f32 %v6799_v26, %v1383_v25  ;;  %v3262_v35 = vmul.f32 %v3198_v44, %v6800_v63  ;;  %v3266_v16 = vmul.f32 %v3202_v61, %v6801_v14  ;;  %v1994_v25 = vpop.f32.mrf.mxu1  ;;  %v6807_v63 = vld [vmem:[#allocation23_spill] sm:$0xff] }
 0x283   : > { %v3363_v43 = vsel %vm3331_vm4, %v3362_v9, %v3361_v49  ;;  %v3270_v58 = vmul.f32 %v3206_v56, %v6802_v42  ;;  %v3274_v20 = vmul.f32 %v3210_v47, %v6803_v40  ;;  %v3278_v8 = vmul.f32 %v3214_v12, %v6804_v10  ;;  %v6809_v42 = vld [vmem:[#allocation31_spill] sm:$0xff] }
 0x284   : > { %v3365_v27 = vsel %vm3334_vm5, %v3364_v19, %v3363_v43  ;;  %v3282_v11 = vmul.f32 %v3218_v53, %v6805_v18  ;;  %v6330_v50 = vmul.f32 %v3222_v46, %v6806_v2  ;;  %v3342_v59 = vrot.slane %v3262_v35, 7  ;;  %v6808_v43 = vld [vmem:[#allocation7_spill] sm:$0xff] }
 0x285   : > { %v6333_v7 = vsel %vm3337_vm6, %v3366_v41, %v3365_v27  ;;  %v3344_v22 = vrot.slane %v3266_v16, 6  ;;  %v3346_v44 = vrot.slane %v3270_v58, 5  ;;  %v3348_v29 = vrot.slane %v3274_v20, 4  ;;  %v6811_v20 = vld [vmem:[#allocation34_spill] sm:$0xff] }
 0x286   : > { %v3350_v9 = vrot.slane %v3278_v8, 3  ;;  %v3352_v1 = vrot.slane %v3282_v11, 2  ;;  %v3343_v19 = vsel %vm3322_vm1, %v3342_v59, %v3258_v52  ;;  %v3200_v56 = vrot.slane %v1994_v25, 1  ;;  %v6810_v52 = vld [vmem:[#allocation11_spill] sm:$0xff]  ;;  %v6812_v8 = vld [vmem:[#allocation38_spill] sm:$0xff]  ;;  %v6813_v11 = vld [vmem:[#allocation41_spill] sm:$0xff] }
 0x287   : > { %v3204_v60 = vrot.slane %v1994_v25, 2  ;;  %v3208_v47 = vrot.slane %v1994_v25, 3  ;;  %v3345_v12 = vsel %vm3325_vm2, %v3344_v22, %v3343_v19  ;;  %v3212_v53 = vrot.slane %v1994_v25, 4  ;;  %v6814_v59 = vld [vmem:[#allocation24_spill] sm:$0xff] }
 0x288   : > { %v3216_v49 = vrot.slane %v1994_v25, 5  ;;  %v3220_v46 = vrot.slane %v1994_v25, 6  ;;  %v3347_v41 = vsel %vm3328_vm3, %v3346_v44, %v3345_v12  ;;  %v3224_v26 = vrot.slane %v1994_v25, 7 }
 0x289   : > { %v3260_v35 = vmul.f32 %v6807_v63, %v1994_v25  ;;  %v3264_v14 = vmul.f32 %v3200_v56, %v6808_v43  ;;  %v3349_v16 = vsel %vm3331_vm4, %v3348_v29, %v3347_v41  ;;  %v3268_v58 = vmul.f32 %v3204_v60, %v6809_v42  ;;  %v1387_v25 = vpop.f32.mrf.mxu0  ;;  %v6815_v42 = vld [vmem:[#allocation6_spill] sm:$0xff] }
 0x28a   : > { %v3272_v40 = vmul.f32 %v3208_v47, %v6810_v52  ;;  %v3276_v27 = vmul.f32 %v3212_v53, %v6811_v20  ;;  %v3351_v10 = vsel %vm3334_vm5, %v3350_v9, %v3349_v16  ;;  %v3280_v18 = vmul.f32 %v3216_v49, %v6812_v8  ;;  %v6816_v52 = vld [vmem:[#allocation46_spill] sm:$0xff] }
 0x28b   : > { %v3284_v2 = vmul.f32 %v3220_v46, %v6813_v11  ;;  %v6349_v22 = vmul.f32 %v3224_v26, %v6814_v59  ;;  %v6352_v44 = vsel %vm3337_vm6, %v3352_v1, %v3351_v10  ;;  %v3370_v29 = vrot.slane %v3264_v14, 7  ;;  %v6818_v11 = vld [vmem:[#allocation58_spill] sm:$0xff]  ;;  %v6819_v59 = vld [vmem:[#allocation48_spill] sm:$0xff] }
 0x28c   : > { %v3372_v19 = vrot.slane %v3268_v58, 6  ;;  %v3374_v56 = vrot.slane %v3272_v40, 5  ;;  %v3376_v60 = vrot.slane %v3276_v27, 4  ;;  %v3378_v47 = vrot.slane %v3280_v18, 3  ;;  %v6817_v27 = vld [vmem:[#allocation52_spill] sm:$0xff] }
 0x28d   : > { %v3380_v12 = vrot.slane %v3284_v2, 2  ;;  %v3371_v9 = vsel %vm3322_vm1, %v3370_v29, %v3260_v35  ;;  %v3416_v49 = vrot.slane %v1387_v25, 1  ;;  %v3420_v41 = vrot.slane %v1387_v25, 2 }
 0x28e   : > { %v3424_v46 = vrot.slane %v1387_v25, 3  ;;  %v3373_v26 = vsel %vm3325_vm2, %v3372_v19, %v3371_v9  ;;  %v3428_v63 = vrot.slane %v1387_v25, 4  ;;  %v3432_v43 = vrot.slane %v1387_v25, 5  ;;  %v6820_v19 = vld [vmem:[#allocation64_spill] sm:$0xff] }
 0x28f   : > { %v3436_v16 = vrot.slane %v1387_v25, 6  ;;  %v3375_v1 = vsel %vm3328_vm3, %v3374_v56, %v3373_v26  ;;  %v3440_v14 = vrot.slane %v1387_v25, 7  ;;  %v3476_v58 = vmul.f32 %v6815_v42, %v1387_v25  ;;  %v1998_v25 = vpop.f32.mrf.mxu1 }
 0x290   : > { %v3480_v40 = vmul.f32 %v3416_v49, %v6816_v52  ;;  %v3377_v20 = vsel %vm3331_vm4, %v3376_v60, %v3375_v1  ;;  %v3484_v10 = vmul.f32 %v3420_v41, %v6817_v27  ;;  %v3488_v35 = vmul.f32 %v3424_v46, %v5890_v55 }
 0x291   : > { %v3492_v8 = vmul.f32 %v3428_v63, %v5906_v34  ;;  %v3379_v18 = vsel %vm3334_vm5, %v3378_v47, %v3377_v20  ;;  %v3496_v2 = vmul.f32 %v3432_v43, %v6818_v11  ;;  %v3500_v29 = vmul.f32 %v3436_v16, %v6819_v59  ;;  %v6821_v20 = vld [vmem:[#allocation8_spill] sm:$0xff]  ;;  %v6825_v59 = vld [vmem:[#allocation55_spill] sm:$0xff] }
 0x292   : > { %v6368_v56 = vmul.f32 %v3440_v14, %v6820_v19  ;;  %v6371_v9 = vsel %vm3337_vm6, %v3380_v12, %v3379_v18  ;;  %v3540_v60 = vrot.slane %v3480_v40, 7  ;;  %v3542_v49 = vrot.slane %v3484_v10, 6  ;;  %v6822_v10 = vld [vmem:[#allocation47_spill] sm:$0xff]  ;;  %v6823_v18 = vld [vmem:[#allocation53_spill] sm:$0xff] }
 0x293   : > { %v3544_v41 = vrot.slane %v3488_v35, 5  ;;  %v3546_v26 = vrot.slane %v3492_v8, 4  ;;  %v3548_v55 = vrot.slane %v3496_v2, 3  ;;  %v3550_v46 = vrot.slane %v3500_v29, 2 }
 0x294   : > { %v3541_v47 = vsel %vm3322_vm1, %v3540_v60, %v3476_v58  ;;  %v3418_v63 = vrot.slane %v1998_v25, 1  ;;  %v3422_v43 = vrot.slane %v1998_v25, 2  ;;  %v3426_v16 = vrot.slane %v1998_v25, 3  ;;  %v6824_v58 = vld [vmem:[#allocation18_spill] sm:$0xff]  ;;  %v6826_v60 = vld [vmem:[#allocation59_spill] sm:$0xff] }
 0x295   : > { %v3543_v1 = vsel %vm3325_vm2, %v3542_v49, %v3541_v47  ;;  %v3430_v14 = vrot.slane %v1998_v25, 4  ;;  %v3434_v42 = vrot.slane %v1998_v25, 5  ;;  %v3438_v52 = vrot.slane %v1998_v25, 6  ;;  %v6827_v47 = vld [vmem:[#allocation51_spill] sm:$0xff] }
 0x296   : > { %v3545_v12 = vsel %vm3328_vm3, %v3544_v41, %v3543_v1  ;;  %v3442_v40 = vrot.slane %v1998_v25, 7  ;;  %v3478_v27 = vmul.f32 %v6821_v20, %v1998_v25  ;;  %v3482_v35 = vmul.f32 %v3418_v63, %v6822_v10  ;;  %v1389_v25 = vpop.f32.mrf.mxu0 }
 0x297   : > { %v3547_v8 = vsel %vm3331_vm4, %v3546_v26, %v3545_v12  ;;  %v3486_v11 = vmul.f32 %v3422_v43, %v6823_v18  ;;  %v3490_v2 = vmul.f32 %v3426_v16, %v6824_v58  ;;  %v3494_v29 = vmul.f32 %v3430_v14, %v6825_v59  ;;  %v6834_v14 = vld [vmem:[#allocation62_spill] sm:$0xff] }
 0x298   : > { %v3549_v19 = vsel %vm3334_vm5, %v3548_v55, %v3547_v8  ;;  %v3498_v49 = vmul.f32 %v3434_v42, %v6826_v60  ;;  %v3502_v34 = vmul.f32 %v3438_v52, %v6827_v47  ;;  %v6387_v41 = vmul.f32 %v3442_v40, %v6088_v21 }
 0x299   : > { %v6390_v63 = vsel %vm3337_vm6, %v3550_v46, %v3549_v19  ;;  %v3568_v26 = vrot.slane %v3482_v35, 7  ;;  %v3570_v1 = vrot.slane %v3486_v11, 6  ;;  %v3572_v43 = vrot.slane %v3490_v2, 5  ;;  %v6828_v11 = vld [vmem:[#allocation9_spill] sm:$0xff] }
 0x29a   : > { %v3574_v12 = vrot.slane %v3494_v29, 4  ;;  %v3576_v16 = vrot.slane %v3498_v49, 3  ;;  %v3578_v20 = vrot.slane %v3502_v34, 2  ;;  %v3417_v42 = vrot.slane %v1389_v25, 1  ;;  %v6829_v2 = vld [vmem:[#allocation49_spill] sm:$0xff]  ;;  %v6830_v29 = vld [vmem:[#allocation15_spill] sm:$0xff] }
 0x29b   : > { %v3569_v55 = vsel %vm3322_vm1, %v3568_v26, %v3478_v27  ;;  %v3421_v10 = vrot.slane %v1389_v25, 2  ;;  %v3425_v52 = vrot.slane %v1389_v25, 3  ;;  %v3429_v40 = vrot.slane %v1389_v25, 4  ;;  %v6831_v27 = vld [vmem:[#allocation42_spill] sm:$0xff]  ;;  %v6832_v49 = vld [vmem:[#allocation56_spill] sm:$0xff] }
 0x29c   : > { %v3571_v21 = vsel %vm3325_vm2, %v3570_v1, %v3569_v55  ;;  %v3433_v8 = vrot.slane %v1389_v25, 5  ;;  %v3437_v18 = vrot.slane %v1389_v25, 6  ;;  %v3441_v35 = vrot.slane %v1389_v25, 7  ;;  %v6833_v1 = vld [vmem:[#allocation60_spill] sm:$0xff] }
 0x29d   : > { %v3573_v46 = vsel %vm3328_vm3, %v3572_v43, %v3571_v21  ;;  %v3477_v58 = vmul.f32 %v6828_v11, %v1389_v25  ;;  %v3481_v59 = vmul.f32 %v3417_v42, %v6829_v2  ;;  %v3485_v19 = vmul.f32 %v3421_v10, %v6830_v29  ;;  %v6835_v43 = vld [vmem:[#allocation65_spill] sm:$0xff]  ;;  %v2000_v25 = vpop.f32.mrf.mxu1 }
 0x29e   : > { %v3575_v34 = vsel %vm3331_vm4, %v3574_v12, %v3573_v46  ;;  %v3489_v60 = vmul.f32 %v3425_v52, %v6831_v27  ;;  %v3493_v47 = vmul.f32 %v3429_v40, %v6832_v49  ;;  %v3497_v55 = vmul.f32 %v3433_v8, %v6833_v1  ;;  %v6837_v49 = vld [vmem:[#allocation50_spill] sm:$0xff] }
 0x29f   : > { %v3577_v26 = vsel %vm3334_vm5, %v3576_v16, %v3575_v34  ;;  %v3501_v53 = vmul.f32 %v3437_v18, %v6834_v14  ;;  %v6406_v21 = vmul.f32 %v3441_v35, %v6835_v43  ;;  %v3554_v12 = vrot.slane %v3481_v59, 7  ;;  %v6840_v43 = vld [vmem:[#allocation57_spill] sm:$0xff] }
 0x2a0   : > { %v6409_v42 = vsel %vm3337_vm6, %v3578_v20, %v3577_v26  ;;  %v3556_v46 = vrot.slane %v3485_v19, 6  ;;  %v3558_v10 = vrot.slane %v3489_v60, 5  ;;  %v3560_v11 = vrot.slane %v3493_v47, 4  ;;  %v6836_v19 = vld [vmem:[#allocation45_spill] sm:$0xff]  ;;  %v6838_v26 = vld [vmem:[#allocation16_spill] sm:$0xff] }
 0x2a1   : > { %v3562_v52 = vrot.slane %v3497_v55, 3  ;;  %v3564_v2 = vrot.slane %v3501_v53, 2  ;;  %v3555_v16 = vsel %vm3322_vm1, %v3554_v12, %v3477_v58  ;;  %v3419_v8 = vrot.slane %v2000_v25, 1  ;;  %v6839_v58 = vld [vmem:[#allocation54_spill] sm:$0xff] }
 0x2a2   : > { %v3423_v34 = vrot.slane %v2000_v25, 2  ;;  %v3427_v14 = vrot.slane %v2000_v25, 3  ;;  %v3557_v18 = vsel %vm3325_vm2, %v3556_v46, %v3555_v16  ;;  %v3431_v35 = vrot.slane %v2000_v25, 4  ;;  %v6841_v16 = vld [vmem:[#allocation61_spill] sm:$0xff] }
 0x2a3   : > { %v3435_v29 = vrot.slane %v2000_v25, 5  ;;  %v3439_v27 = vrot.slane %v2000_v25, 6  ;;  %v3559_v20 = vsel %vm3328_vm3, %v3558_v10, %v3557_v18  ;;  %v3443_v59 = vrot.slane %v2000_v25, 7  ;;  %v6843_v10 = vld [vmem:[#allocation66_spill] sm:$0xff] }
 0x2a4   : > { %v3479_v60 = vmul.f32 %v6836_v19, %v2000_v25  ;;  %v3483_v47 = vmul.f32 %v3419_v8, %v6837_v49  ;;  %v3561_v53 = vsel %vm3331_vm4, %v3560_v11, %v3559_v20  ;;  %v3487_v1 = vmul.f32 %v3423_v34, %v6838_v26  ;;  %v1393_v25 = vpop.f32.mrf.mxu0 }
 0x2a5   : > { %v3491_v55 = vmul.f32 %v3427_v14, %v6839_v58  ;;  %v3495_v12 = vmul.f32 %v3431_v35, %v6840_v43  ;;  %v3563_v46 = vsel %vm3334_vm5, %v3562_v52, %v3561_v53  ;;  %v3499_v40 = vmul.f32 %v3435_v29, %v6841_v16  ;;  %v6845_v43 = vld [vmem:[#allocation71_spill] sm:$0xff] }
 0x2a6   : > { %v3503_v61 = vmul.f32 %v3439_v27, %v6842_v13  ;;  %v6425_v18 = vmul.f32 %v3443_v59, %v6843_v10  ;;  %v6428_v8 = vsel %vm3337_vm6, %v3564_v2, %v3563_v46  ;;  %v3582_v11 = vrot.slane %v3483_v47, 7 }
 0x2a7   : > { %v3584_v20 = vrot.slane %v3487_v1, 6  ;;  %v3586_v34 = vrot.slane %v3491_v55, 5  ;;  %v3588_v19 = vrot.slane %v3495_v12, 4  ;;  %v3590_v14 = vrot.slane %v3499_v40, 3  ;;  %v6844_v1 = vld [vmem:[#allocation67_spill] sm:$0xff] }
 0x2a8   : > { %v3592_v49 = vrot.slane %v3503_v61, 2  ;;  %v3594_v35 = vrot.slane %v6425_v18, 1  ;;  %v3583_v52 = vsel %vm3322_vm1, %v3582_v11, %v3479_v60  ;;  %v3632_v29 = vrot.slane %v1393_v25, 1 }
 0x2a9   : > { %v3636_v53 = vrot.slane %v1393_v25, 2  ;;  %v3640_v13 = vrot.slane %v1393_v25, 3  ;;  %v3585_v27 = vsel %vm3325_vm2, %v3584_v20, %v3583_v52  ;;  %v3644_v59 = vrot.slane %v1393_v25, 4 }
 0x2aa   : > { %v3648_v26 = vrot.slane %v1393_v25, 5  ;;  %v3652_v58 = vrot.slane %v1393_v25, 6  ;;  %v3587_v2 = vsel %vm3328_vm3, %v3586_v34, %v3585_v27  ;;  %v3656_v47 = vrot.slane %v1393_v25, 7 }
 0x2ab   : > { %v3692_v55 = vmul.f32 %v6844_v1, %v1393_v25  ;;  %v3696_v40 = vmul.f32 %v3632_v29, %v6845_v43  ;;  %v3589_v61 = vsel %vm3331_vm4, %v3588_v19, %v3587_v2  ;;  %v3700_v12 = vmul.f32 %v3636_v53, %v6153_v62  ;;  %v2004_v25 = vpop.f32.mrf.mxu1  ;;  %v6846_v2 = vld [vmem:[#allocation68_spill] sm:$0xff] }
 0x2ac   : > { %v3704_v60 = vmul.f32 %v3640_v13, %v6204_v48  ;;  %v3708_v46 = vmul.f32 %v3644_v59, %v6235_v30  ;;  %v3591_v16 = vsel %vm3334_vm5, %v3590_v14, %v3589_v61  ;;  %v3712_v10 = vmul.f32 %v3648_v26, %v6245_v37  ;;  %v6847_v1 = vld [vmem:[#allocation72_spill] sm:$0xff] }
 0x2ad   : > { %v6443_v11 = vmul.f32 %v3652_v58, %v6268_v28  ;;  %v6446_v20 = vmul.f32 %v3656_v47, %v6290_v0  ;;  %v6449_v34 = vsel %vm3337_vm6, %v3592_v49, %v3591_v16  ;;  %v3756_v19 = vrot.slane %v3696_v40, 7 }
 0x2ae   : > { %v3758_v62 = vrot.slane %v3700_v12, 6  ;;  %v3760_v52 = vrot.slane %v3704_v60, 5  ;;  %v3762_v48 = vrot.slane %v3708_v46, 4  ;;  %v3764_v29 = vrot.slane %v3712_v10, 3  ;;  %v1395_v46 = vpop.f32.mrf.mxu0 }
 0x2af   : > { %v3766_v30 = vrot.slane %v6443_v11, 2  ;;  %v3768_v14 = vrot.slane %v6446_v20, 1  ;;  %v3757_v37 = vsel %vm3322_vm1, %v3756_v19, %v3692_v55  ;;  %v3634_v28 = vrot.slane %v2004_v25, 1  ;;  %v6848_v55 = vld [vmem:[#allocation77_spill] sm:$0xff] }
 0x2b0   : > { %v3638_v53 = vrot.slane %v2004_v25, 2  ;;  %v3642_v13 = vrot.slane %v2004_v25, 3  ;;  %v3759_v0 = vsel %vm3325_vm2, %v3758_v62, %v3757_v37  ;;  %v3646_v27 = vrot.slane %v2004_v25, 4 }
 0x2b1   : > { %v3650_v59 = vrot.slane %v2004_v25, 5  ;;  %v3654_v49 = vrot.slane %v2004_v25, 6  ;;  %v3761_v26 = vsel %vm3328_vm3, %v3760_v52, %v3759_v0  ;;  %v3658_v58 = vrot.slane %v2004_v25, 7 }
 0x2b2   : > { %v3694_v47 = vmul.f32 %v6846_v2, %v2004_v25  ;;  %v3698_v43 = vmul.f32 %v3634_v28, %v6847_v1  ;;  %v3763_v40 = vsel %vm3331_vm4, %v3762_v48, %v3761_v26  ;;  %v3702_v61 = vmul.f32 %v3638_v53, %v6155_v24  ;;  %v6849_v26 = vld [vmem:[#allocation69_spill] sm:$0xff] }
 0x2b3   : > { %v3706_v12 = vmul.f32 %v3642_v13, %v6848_v55  ;;  %v3710_v60 = vmul.f32 %v3646_v27, %v6238_v3  ;;  %v6463_v16 = vsel %vm3334_vm5, %v3764_v29, %v3763_v40  ;;  %v3714_v10 = vmul.f32 %v3650_v59, %v6247_v23  ;;  %v6850_v2 = vld [vmem:[#allocation73_spill] sm:$0xff] }
 0x2b4   : > { %v6467_v19 = vmul.f32 %v3654_v49, %v6270_v54  ;;  %v6470_v25 = vmul.f32 %v3658_v58, %v6293_v5  ;;  %v3784_v62 = vrot.slane %v3698_v43, 7  ;;  %v3786_v52 = vrot.slane %v3702_v61, 6  ;;  %v6851_v43 = vld [vmem:[#allocation75_spill] sm:$0xff] }
 0x2b5   : > { %v3788_v48 = vrot.slane %v3706_v12, 5  ;;  %v3790_v24 = vrot.slane %v3710_v60, 4  ;;  %v3792_v37 = vrot.slane %v3714_v10, 3  ;;  %v3633_v53 = vrot.slane %v1395_v46, 1  ;;  %v2006_v10 = vpop.f32.mrf.mxu1 }
 0x2b6   : > { %v3794_v28 = vrot.slane %v6467_v19, 2  ;;  %v3796_v3 = vrot.slane %v6470_v25, 1  ;;  %v3785_v29 = vsel %vm3322_vm1, %v3784_v62, %v3694_v47  ;;  %v3637_v13 = vrot.slane %v1395_v46, 2  ;;  %v6852_v47 = vld [vmem:[#allocation78_spill] sm:$0xff] }
 0x2b7   : > { %v3641_v23 = vrot.slane %v1395_v46, 3  ;;  %v3645_v0 = vrot.slane %v1395_v46, 4  ;;  %v3787_v54 = vsel %vm3325_vm2, %v3786_v52, %v3785_v29  ;;  %v3649_v27 = vrot.slane %v1395_v46, 5 }
 0x2b8   : > { %v3653_v5 = vrot.slane %v1395_v46, 6  ;;  %v3657_v59 = vrot.slane %v1395_v46, 7  ;;  %v3789_v49 = vsel %vm3328_vm3, %v3788_v48, %v3787_v54  ;;  %v3693_v58 = vmul.f32 %v6849_v26, %v1395_v46 }
 0x2b9   : > { %v3697_v1 = vmul.f32 %v3633_v53, %v6850_v2  ;;  %v3701_v40 = vmul.f32 %v3637_v13, %v6851_v43  ;;  %v3791_v61 = vsel %vm3331_vm4, %v3790_v24, %v3789_v49  ;;  %v3705_v55 = vmul.f32 %v3641_v23, %v6852_v47  ;;  %v6853_v2 = vld [vmem:[#allocation70_spill] sm:$0xff] }
 0x2ba   : > { %v3709_v12 = vmul.f32 %v3645_v0, %v6241_v33  ;;  %v3713_v60 = vmul.f32 %v3649_v27, %v6249_v38  ;;  %v6485_v62 = vsel %vm3334_vm5, %v3792_v37, %v3791_v61  ;;  %v3717_v52 = vmul.f32 %v3653_v5, %v6273_v45  ;;  %v6854_v43 = vld [vmem:[#allocation74_spill] sm:$0xff] }
 0x2bb   : > { %v3721_v46 = vmul.f32 %v3657_v59, %v6296_v32  ;;  %v3770_v48 = vrot.slane %v3697_v1, 7  ;;  %v3772_v53 = vrot.slane %v3701_v40, 6  ;;  %v3774_v29 = vrot.slane %v3705_v55, 5  ;;  %v6856_v55 = vld [vmem:[#allocation79_spill] sm:$0xff] }
 0x2bc   : > { %v3776_v13 = vrot.slane %v3709_v12, 4  ;;  %v3778_v24 = vrot.slane %v3713_v60, 3  ;;  %v3780_v23 = vrot.slane %v3717_v52, 2  ;;  %v3635_v33 = vrot.slane %v2006_v10, 1 }
 0x2bd   : > { %v3771_v54 = vsel %vm3322_vm1, %v3770_v48, %v3693_v58  ;;  %v3782_v49 = vrot.slane %v3721_v46, 1  ;;  %v3639_v0 = vrot.slane %v2006_v10, 2  ;;  %v3643_v27 = vrot.slane %v2006_v10, 3  ;;  %v6855_v58 = vld [vmem:[#allocation76_spill] sm:$0xff] }
 0x2be   : > { %v3773_v38 = vsel %vm3325_vm2, %v3772_v53, %v3771_v54  ;;  %v3647_v37 = vrot.slane %v2006_v10, 4  ;;  %v3651_v45 = vrot.slane %v2006_v10, 5  ;;  %v3655_v5 = vrot.slane %v2006_v10, 6 }
 0x2bf   : > { %v3775_v26 = vsel %vm3328_vm3, %v3774_v29, %v3773_v38  ;;  %v3659_v32 = vrot.slane %v2006_v10, 7  ;;  %v3695_v1 = vmul.f32 %v6853_v2, %v2006_v10  ;;  %v3699_v40 = vmul.f32 %v3635_v33, %v6854_v43 }
 0x2c0   : > { %v3777_v59 = vsel %vm3331_vm4, %v3776_v13, %v3775_v26  ;;  %v3703_v61 = vmul.f32 %v3639_v0, %v6855_v58  ;;  %v3707_v12 = vmul.f32 %v3643_v27, %v6856_v55  ;;  %v3711_v60 = vmul.f32 %v3647_v37, %v6243_v57 }
 0x2c1   : > { %v3779_v47 = vsel %vm3334_vm5, %v3778_v24, %v3777_v59  ;;  %v3715_v52 = vmul.f32 %v3651_v45, %v6251_v51  ;;  %v3719_v48 = vmul.f32 %v3655_v5, %v6276_v4  ;;  %v3723_v53 = vmul.f32 %v3659_v32, %v6300_v17 }
 0x2c2   : > { %v3781_v46 = vsel %vm3337_vm6, %v3780_v23, %v3779_v47  ;;  %v3798_v29 = vrot.slane %v3699_v40, 7  ;;  %v3800_v13 = vrot.slane %v3703_v61, 6  ;;  %v3802_v54 = vrot.slane %v3707_v12, 5 }
 0x2c3   : > { %v6504_v10 = vsel %vm3340_vm7, %v3782_v49, %v3781_v46  ;;  %v3804_v33 = vrot.slane %v3711_v60, 4  ;;  %v3806_v57 = vrot.slane %v3715_v52, 3  ;;  %v3808_v0 = vrot.slane %v3719_v48, 2 }
 0x2c4   : > { %v3822_v24 = vrot.slane %v6504_v10, 4  ;;  %v3799_v38 = vsel %vm3322_vm1, %v3798_v29, %v3695_v1  ;;  %v3810_v23 = vrot.slane %v3723_v53, 1  ;;  %v3341_v4 = vsel %vm3340_vm7, %v3339_v6, %v6304_v39 }
 0x2c5   : > { %v3801_v51 = vsel %vm3325_vm2, %v3800_v13, %v3799_v38  ;;  %v6857_v17 = vrot.slane %v6330_v50, 1  ;;  %v6858_v37 = vrot.slane %v6314_v31, 1  ;;  %v6859_v45 = vrot.slane %v6349_v22, 1 }
 0x2c6   : > { %v3803_v27 = vsel %vm3328_vm3, %v3802_v54, %v3801_v51  ;;  %v3388_v36 = vrot.slane %v3341_v4, 4  ;;  %v6860_v2 = vrot.slane %v6368_v56, 1  ;;  %v6862_v47 = vrot.slane %v6387_v41, 1 }
 0x2c7   : > { %v3355_v49 = vsel %vm3340_vm7, %v6857_v17, %v6352_v44  ;;  %v3369_v26 = vsel %vm3340_vm7, %v6858_v37, %v6333_v7  ;;  %v3383_v5 = vsel %vm3340_vm7, %v6859_v45, %v6371_v9  ;;  %v3805_v6 = vsel %vm3331_vm4, %v3804_v33, %v3803_v27 }
 0x2c8   : > { %v3394_v39 = vrot.slane %v3355_v49, 4  ;;  %v3400_v32 = vrot.slane %v3369_v26, 4  ;;  %v3406_v50 = vrot.slane %v3383_v5, 4  ;;  %v3807_v44 = vsel %vm3334_vm5, %v3806_v57, %v3805_v6 }
 0x2c9   : > { %v3389_v59 = vadd.f32 %v3388_v36, %v3341_v4  ;;  %v3553_v31 = vsel %vm3340_vm7, %v6860_v2, %v6390_v63  ;;  %v6861_v7 = vrot.slane %v6406_v21, 1  ;;  %v3809_v9 = vsel %vm3337_vm6, %v3808_v0, %v3807_v44 }
 0x2ca   : > { %v3395_v1 = vadd.f32 %v3394_v39, %v3355_v49  ;;  %v3401_v43 = vadd.f32 %v3400_v32, %v3369_v26  ;;  %v3407_v40 = vadd.f32 %v3406_v50, %v3383_v5  ;;  %v3811_v58 = vsel %vm3340_vm7, %v3810_v23, %v3809_v9 }
 0x2cb   : > { %v3567_v22 = vsel %vm3340_vm7, %v6861_v7, %v6428_v8  ;;  %v3390_v61 = vrot.slane %v3389_v59, 2  ;;  %v3581_v56 = vsel %vm3340_vm7, %v6862_v47, %v6409_v42  ;;  %v3595_v63 = vsel %vm3340_vm7, %v3594_v35, %v6449_v34 }
 0x2cc   : > { %v3834_v21 = vrot.slane %v3811_v58, 4  ;;  %v3396_v8 = vrot.slane %v3395_v1, 2  ;;  %v3402_v55 = vrot.slane %v3401_v43, 2  ;;  %v3408_v12 = vrot.slane %v3407_v40, 2 }
 0x2cd   : > { %v3391_v60 = vadd.f32 %v3390_v61, %v3389_v59  ;;  %v3600_v52 = vrot.slane %v3553_v31, 4  ;;  %v3606_v46 = vrot.slane %v3567_v22, 4  ;;  %v3612_v48 = vrot.slane %v3581_v56, 4 }
 0x2ce   : > { %v3397_v53 = vadd.f32 %v3396_v8, %v3395_v1  ;;  %v3403_v29 = vadd.f32 %v3402_v55, %v3401_v43  ;;  %v3409_v13 = vadd.f32 %v3408_v12, %v3407_v40  ;;  %v3618_v54 = vrot.slane %v3595_v63, 4 }
 0x2cf   : > { %v3392_v41 = vrot.slane %v3391_v60, 1  ;;  %v3601_v33 = vadd.f32 %v3600_v52, %v3553_v31  ;;  %v3607_v42 = vadd.f32 %v3606_v46, %v3567_v22  ;;  %v3613_v38 = vadd.f32 %v3612_v48, %v3581_v56 }
 0x2d0   : > { %v3398_v57 = vrot.slane %v3397_v53, 1  ;;  %v3404_v18 = vrot.slane %v3403_v29, 1  ;;  %v3410_v0 = vrot.slane %v3409_v13, 1  ;;  %v3619_v35 = vadd.f32 %v3618_v54, %v3595_v63 }
 0x2d1   : > { %v3393_v34 = vadd.f32 %v3392_v41, %v3391_v60  ;;  %v3602_v51 = vrot.slane %v3601_v33, 2  ;;  %v3608_v23 = vrot.slane %v3607_v42, 2  ;;  %v3614_v4 = vrot.slane %v3613_v38, 2  ;;  %v6863_v41 = vld [vmem:[#allocation5_spill] sm:$0xff] }
 0x2d2   : > { %v3399_v17 = vadd.f32 %v3398_v57, %v3397_v53  ;;  %v3405_v49 = vadd.f32 %v3404_v18, %v3403_v29  ;;  %v3411_v27 = vadd.f32 %v3410_v0, %v3409_v13  ;;  %v3620_v37 = vrot.slane %v3619_v35, 2 }
 0x2d3   : > { %v3603_v26 = vadd.f32 %v3602_v51, %v3601_v33  ;;  %v3609_v45 = vadd.f32 %v3608_v23, %v3607_v42  ;;  %v3615_v5 = vadd.f32 %v3614_v4, %v3613_v38  ;;  %v3767_v36 = vsel %vm3337_vm6, %v3766_v30, %v6463_v16 }
 0x2d4   : > { %v3621_v6 = vadd.f32 %v3620_v37, %v3619_v35  ;;  %v3769_v39 = vsel %vm3340_vm7, %v3768_v14, %v3767_v36  ;;  %v3795_v32 = vsel %vm3337_vm6, %v3794_v28, %v6485_v62  ;;  %v3823_v50 = vadd.f32 %v3822_v24, %v6504_v10 }
 0x2d5   : > { %v3604_v44 = vrot.slane %v3603_v26, 1  ;;  %v3610_v59 = vrot.slane %v3609_v45, 1  ;;  %v3616_v2 = vrot.slane %v3615_v5, 1  ;;  %v3797_v11 = vsel %vm3340_vm7, %v3796_v3, %v3795_v32 }
 0x2d6   : > { %v3622_v30 = vrot.slane %v3621_v6, 1  ;;  %v3816_v20 = vrot.slane %v3769_v39, 4  ;;  %v3824_v16 = vrot.slane %v3823_v50, 2  ;;  %v3828_v14 = vrot.slane %v3797_v11, 4 }
 0x2d7   : > { %v3605_v31 = vadd.f32 %v3604_v44, %v3603_v26  ;;  %v3611_v7 = vadd.f32 %v3610_v59, %v3609_v45  ;;  %v3617_v19 = vadd.f32 %v3616_v2, %v3615_v5  ;;  %v3835_v22 = vadd.f32 %v3834_v21, %v3811_v58 }
 0x2d8   : > { %v3623_v28 = vadd.f32 %v3622_v30, %v3621_v6  ;;  %v3817_v62 = vadd.f32 %v3816_v20, %v3769_v39  ;;  %v3825_v9 = vadd.f32 %v3824_v16, %v3823_v50  ;;  %v3829_v10 = vadd.f32 %v3828_v14, %v3797_v11 }
 0x2d9   : > { %v3624_v24 = vadd.f32 %v3605_v31, %v3393_v34  ;;  %v3625_v1 = vadd.f32 %v3611_v7, %v3399_v17  ;;  %v3626_v43 = vadd.f32 %v3617_v19, %v3405_v49  ;;  %v3836_v40 = vrot.slane %v3835_v22, 2 }
 0x2da   : > { %v3627_v25 = vadd.f32 %v3623_v28, %v3411_v27  ;;  %v3818_v61 = vrot.slane %v3817_v62, 2  ;;  %v3826_v3 = vrot.slane %v3825_v9, 1  ;;  %v3830_v47 = vrot.slane %v3829_v10, 2 }
 0x2db   : > { %v3837_v56 = vadd.f32 %v3836_v40, %v3835_v22  ;;  %v3852_v52 = vunpack.c.0.s8 %v6265_v15  ;;  %v6864_v35 = vlaneseq }
 0x2dc   : > { %v3819_v63 = vadd.f32 %v3818_v61, %v3817_v62  ;;  %v3827_v8 = vadd.f32 %v3826_v3, %v3825_v9  ;;  %v3831_v55 = vadd.f32 %v3830_v47, %v3829_v10 }
 0x2dd   : > { %v3838_v12 = vrot.slane %v3837_v56, 1  ;;  %v3855_v33 = vsub.s32 %v3852_v52, %v6863_v41  ;;  %vm3875_vm8 = vcmp.lt.s32.totalorder %v6864_v35, 512 }
 0x2de   : > { %v3820_v58 = vrot.slane %v3819_v63, 1  ;;  %v3832_v21 = vrot.slane %v3831_v55, 1  ;;  %v3841_v60 = vadd.f32 %v3827_v8, %v3625_v1 }
 0x2df   : > { %v3839_v46 = vadd.f32 %v3838_v12, %v3837_v56 }
 0x2e0   : > { %v3821_v48 = vadd.f32 %v3820_v58, %v3819_v63  ;;  %v3833_v53 = vadd.f32 %v3832_v21, %v3831_v55 }
 0x2e1   : > { %v3843_v29 = vadd.f32 %v3839_v46, %v3627_v25 }
 0x2e2   : > { %v3840_v13 = vadd.f32 %v3821_v48, %v3624_v24  ;;  %v3842_v54 = vadd.f32 %v3833_v53, %v3626_v43 }
 0x2e4   : > { %v3848_v42 = vcombine.low %v3840_v13, %v3841_v60  ;;  %v3849_v38 = vcombine.low %v3842_v54, %v3843_v29 }
 0x2e6   : > { %v3856_v57 = vrot.slane %v3848_v42, %v3855_v33  ;;  %v3863_v18 = vrot.slane %v3849_v38, %v3855_v33 }
 0x2e8   : > { %v3864_v0 = vcombine.low %v3856_v57, %v3863_v18 }
 0x2ea   : > { %v3871_v15 = vrot.slane %v3864_v0, %v3855_v33 }
 0x2ec   : > { %3877 = vst.msk [vmem:[%s137_s21] sm:$0xf] %vm3875_vm8, %v3871_v15 }
 0x2ed   : > { %4201 = shalt.err (!%p4198_p3)
}
 0x2ee   : > { %s4202_s30 = scalar_lea.hbm %s3891_s25, 64  ;;  %s4206_s5 = scalar_lea.hbm %s6602_s2, 192 }
 0x2ef   : > { %p4203_p4 = scmp.ne.s32.totalorder %s3891_s25, %s4202_s30  ;;  %p4207_p9 = scmp.lt.s32.totalorder %s3891_s25, %s6602_s2 }
 0x2f0   : > { %p4208_p10 = scmp.lt.s32.totalorder %s4206_s5, %s4202_s30 }
 0x2f1   : > { %p4204_p7 = pnand %p4203_p4, %p4306_p5 }
 0x2f2   : > { %p4209_p11 = por %p4208_p10, %p4207_p9 }
 0x2f3   : > { %p4205_p8 = pneg %p4204_p7 }
 0x2f5   : > { %p4210_p12 = pnand %p4209_p11, %p4205_p8 }
 0x2f7   : > { %4213 = shalt.err (!%p4210_p12)
}
 0x2f8   : > { %4147 = dma.vmem_to_hbm [thread:$0]  (%p4306_p5), %s3894_s22, 64, %s3891_s25, %s3879_s26  }
 0x2f9 PF: > { %p4153_p13 = scmp.ge.s32.totalorder %s4248_s12, 2  ;;  %s3905_s8 = sand.u32 1, %s4236_s9  }
 0x2fa   : > { %s3906_s14 = scalar_lea.sflag [#allocation3], %s3905_s8 }
 0x2fb   : > { %p4150_p0 = pnand %p4153_p13, %p4310_p6 }
 0x2fd   : > { %p4151_p1 = pneg %p4150_p0 }
 0x2ff   : > { %4231 = dma.done.wait (%p4151_p1), %s3906_s14, 64  }
 0x300   : > { %4233 = vsyncadd (%p4151_p1), %s3906_s14, 4294967232  ;;  %p12_p2 = scmp.ge.s32.totalorder %s4293_s15, 5   ;;  %s6865_s9 = smov %s4240_s10 }
 0x301   : > { %s6866_s10 = smov %s4244_s11  ;;  %s6867_s11 = smov %s4304_s18 }
 0x302   : > { %s6868_s12 = smov %s4293_s15  ;;  %14 = sbr.rel (!%p12_p2) target bundleno = 3 (0x3), region = 63 }
 0x307   :  { %3911 = vsyncpa [#allocation3], 1 }
 0x308   :  { %3913 = vsyncpa [#allocation3 + $0x1], 1 }

</bundles_post_ra>
